<compile_context>
chip_gen: v7x
topology: tpu7x:2x2x1
jax: 0.10.0
libtpu: 0.0.40
codegen_flags: <defaults>
</compile_context>

<pallas_src>
import functools

import jax
import jax.numpy as jnp
from jax import lax
from jax.experimental import pallas as pl
from jax.experimental.pallas import tpu as pltpu


def _round_up(x, m):
    return -(-x // m) * m


# ---------------- kernel 1: fused 2-layer LSTM recurrence (wavefront) ----------
def _lstm_recurrence_kernel(emb_ref, bs_ref, lens_ref,
                            wih0e_ref, wih0b_ref, whh0_ref, b0_ref,
                            w1cat_ref, b1_ref,
                            h_out_ref,
                            g0_buf,
                            *, seq_len, batch, hidden, unroll):
    T, B, H = seq_len, batch, hidden
    H3 = 3 * H

    # Hoisted layer-0 input projection: one dense bf16 MXU pass over all T*B rows;
    # board_state contribution + b0 is folded in ONCE (not per step).
    bs_bias = (jnp.dot(bs_ref[...], wih0b_ref[...],
                       preferred_element_type=jnp.float32)
               + b0_ref[...])                                          # (B, 4H)
    g0_buf[...] = (jnp.dot(emb_ref[...], wih0e_ref[...],
                           preferred_element_type=jnp.float32)
                   + jnp.tile(bs_bias, (T, 1)))                        # (T*B, 4H)

    whh0 = whh0_ref[...]           # (H, 4H)   f32 (recurrent matmul kept f32)
    w1cat = w1cat_ref[...]         # (2H, 4H)  f32 : stacked [W_ih1; W_hh1]
    b1b = b1_ref[...]              # (1, 4H)
    lens = lens_ref[...]           # (B, 1) int32

    # TODO(synk): hold W_hh / W1cat in MXU staging registers across the loop with
    # pltpu.matmul_push_rhs / matmul_acc_lhs / matmul_pop to avoid re-pushing
    # weights every step (M is tiny).

    def gate_math(gates, c):
        # Gate columns were permuted to (i, f, o, g) in the wrapper:
        # one contiguous sigmoid slab + one tanh slab (4H transcendental elems/step).
        sig = jax.nn.sigmoid(gates[:, :H3])
        g_g = jnp.tanh(gates[:, H3:])
        i_g = sig[:, 0:H]
        f_g = sig[:, H:2 * H]
        o_g = sig[:, 2 * H:H3]
        c_new = f_g * c + i_g * g_g
        h_new = o_g * jnp.tanh(c_new)
        return h_new, c_new

    def row(t):
        r = t * B                       # B is a multiple of 8 -> sublane-aligned
        return r if isinstance(r, int) else pl.multiple_of(r, 8)

    def l0_step(t, h0, c0):
        gates = g0_buf[pl.ds(row(t), B), :] + jnp.dot(
            h0, whh0, preferred_element_type=jnp.float32)
        return gate_math(gates, c0)

    def l1_step(t1, h0_prev, h1, c1):
        x = jnp.concatenate([h0_prev, h1], axis=-1)                   # (B, 2H)
        gates = jnp.dot(x, w1cat, preferred_element_type=jnp.float32) + b1b
        h1n, c1n = gate_math(gates, c1)
        keep = (lens > t1).astype(jnp.float32)                        # pad_packed mask
        h_out_ref[pl.ds(row(t1), B), :] = h1n * keep
        return h1n, c1n

    zeros = jnp.zeros((B, H), jnp.float32)

    # Prologue: layer-0 step 0 (h0_{-1} = 0, so no recurrent matmul needed).
    h0, c0 = gate_math(g0_buf[pl.ds(0, B), :], zeros)

    # Wavefront: iteration t runs layer-1 step t-1 (consumes h0_{t-1}) and
    # layer-0 step t; the two are independent, so layer-1 MXU overlaps layer-0
    # EUP.  Total serial slots: T+1 instead of 2T.
    def fused(t, carry):
        h0, c0, h1, c1 = carry
        h1, c1 = l1_step(t - 1, h0, h1, c1)
        h0n, c0n = l0_step(t, h0, c0)
        return h0n, c0n, h1, c1

    h0, c0, h1, c1 = lax.fori_loop(1, T, fused, (h0, c0, zeros, zeros),
                                   unroll=unroll)

    # Epilogue: last layer-1 step.
    l1_step(T - 1, h0, h1, c1)

    # TODO(synk): for production T, chunk the time axis (grid axis / emit_pipeline)
    # so g0_buf stays within a per-chunk VMEM budget; on v7x additionally split the
    # batch across the two TensorCores with a leading 'parallel' grid axis.


# ---------------- kernel 2: tiled vocab projection + log(softmax + eps) --------
def _vocab_logprob_kernel(h_ref, w_ref, b_ref, o_ref, *, eps):
    logits = (jnp.dot(h_ref[...].astype(jnp.bfloat16), w_ref[...],
                      preferred_element_type=jnp.float32)
              + b_ref[...])                                            # (rows, Vp)
    m = jnp.max(logits, axis=-1, keepdims=True)
    e = jnp.exp(logits - m)
    s = jnp.sum(e, axis=-1, keepdims=True)
    # log(softmax(x) + eps) = log(e + eps*s) - log(s)    (division-free)
    o_ref[...] = jnp.log(e + eps * s) - jnp.log(s)
    # TODO(synk): for very large vocabularies also tile V (two-pass / online
    # max+sum) instead of holding the full (H, V) weight and (rows, V) tile in VMEM.


# ----------------------------------- wrapper -----------------------------------
def _permute_pad_gates(w, H, Hp):
    """Reorder gate columns (i,f,g,o) -> (i,f,o,g) and zero-pad each block to Hp."""
    i = w[:, 0 * H:1 * H]
    f = w[:, 1 * H:2 * H]
    g = w[:, 2 * H:3 * H]
    o = w[:, 3 * H:4 * H]
    pad = lambda blk: jnp.pad(blk, ((0, 0), (0, Hp - H)))
    return jnp.concatenate([pad(i), pad(f), pad(o), pad(g)], axis=1)


def base_decoder_forward(tok_in, lengths, board_state, params, *, eps=1e-5):
    """tok_in: (B, T) int32; lengths: (B,) int32 (concrete); board_state: (B, D) f32."""
    B, T = tok_in.shape
    E = params["wemb"].shape[1]
    D = board_state.shape[1]
    H = params["whh0"].shape[0]
    V = params["wout"].shape[1]

    Bp = _round_up(B, 8)        # sublane-dense per-step tiles
    Hp = _round_up(H, 128)      # lane-dense hidden / gate slices
    Vp = _round_up(V, 128)      # lane-dense vocab stores

    # ---- embedding gather (pure gather -> XLA), time-major, flattened, bf16 ----
    emb = jnp.take(params["wemb"], tok_in, axis=0)                    # (B, T, E)
    emb = jnp.transpose(emb, (1, 0, 2))                               # (T, B, E)
    emb = jnp.pad(emb, ((0, 0), (0, Bp - B), (0, 0)))
    emb_flat = emb.reshape(T * Bp, E).astype(jnp.bfloat16)

    bs = jnp.pad(board_state.astype(jnp.float32), ((0, Bp - B), (0, 0)))
    lens2d = jnp.pad(lengths.astype(jnp.int32), (0, Bp - B)).reshape(Bp, 1)

    # ---- weight prep: gate permutation / 128-padding, bf16 for dense matmuls ----
    wih0 = _permute_pad_gates(params["wih0"].astype(jnp.float32), H, Hp)
    wih0_e = wih0[:E].astype(jnp.bfloat16)                            # (E, 4Hp) bf16
    wih0_b = wih0[E:]                                                 # (D, 4Hp) f32
    whh0 = jnp.pad(_permute_pad_gates(params["whh0"].astype(jnp.float32), H, Hp),
                   ((0, Hp - H), (0, 0)))                             # (Hp, 4Hp)
    b0 = _permute_pad_gates(params["b0"].astype(jnp.float32), H, Hp)  # (1, 4Hp)
    wih1 = jnp.pad(_permute_pad_gates(params["wih1"].astype(jnp.float32), H, Hp),
                   ((0, Hp - H), (0, 0)))
    whh1 = jnp.pad(_permute_pad_gates(params["whh1"].astype(jnp.float32), H, Hp),
                   ((0, Hp - H), (0, 0)))
    w1cat = jnp.concatenate([wih1, whh1], axis=0)                     # (2Hp, 4Hp)
    b1 = _permute_pad_gates(params["b1"].astype(jnp.float32), H, Hp)

    wout = jnp.pad(params["wout"].astype(jnp.float32),
                   ((0, Hp - H), (0, Vp - V))).astype(jnp.bfloat16)   # (Hp, Vp) bf16
    bout = jnp.pad(params["bout"].astype(jnp.float32),
                   ((0, 0), (0, Vp - V)), constant_values=-1e9)       # mask padded cols

    # ------------------------- kernel 1: recurrence -----------------------------
    vmem = pl.BlockSpec(memory_space=pltpu.MemorySpace.VMEM)
    k1_inputs = (emb_flat, bs, lens2d, wih0_e, wih0_b, whh0, b0, w1cat, b1)
    k1_bytes = sum(x.size * x.dtype.itemsize for x in k1_inputs)
    k1_bytes += T * Bp * Hp * 4            # output
    k1_bytes += T * Bp * 4 * Hp * 4        # g0 scratch
    vmem_limit = int(min(127 * 1024 * 1024,
                         max(2 * k1_bytes + (4 << 20), 32 * 1024 * 1024)))

    kernel1 = functools.partial(_lstm_recurrence_kernel, seq_len=T, batch=Bp,
                                hidden=Hp, unroll=min(8, max(T - 1, 1)))
    h_seq = pl.pallas_call(
        kernel1,
        out_shape=jax.ShapeDtypeStruct((T * Bp, Hp), jnp.float32),
        in_specs=[vmem] * 9,
        out_specs=vmem,
        scratch_shapes=[pltpu.VMEM((T * Bp, 4 * Hp), jnp.float32)],   # g0_buf only
        compiler_params=pltpu.CompilerParams(vmem_limit_bytes=vmem_limit),
    )(*k1_inputs)

    # --------------- kernel 2: row-tiled vocab projection + log-softmax ----------
    if T % 4 == 0:
        n_tiles = 4
    elif T % 2 == 0:
        n_tiles = 2
    else:
        n_tiles = 1
    rt = (T // n_tiles) * Bp                                          # rows per tile

    kernel2 = functools.partial(_vocab_logprob_kernel, eps=eps)
    out_flat = pl.pallas_call(
        kernel2,
        out_shape=jax.ShapeDtypeStruct((T * Bp, Vp), jnp.float32),
        grid=(n_tiles,),
        in_specs=[pl.BlockSpec((rt, Hp), lambda i: (i, 0)),
                  pl.BlockSpec((Hp, Vp), lambda i: (0, 0)),
                  pl.BlockSpec((1, Vp), lambda i: (0, 0))],
        out_specs=pl.BlockSpec((rt, Vp), lambda i: (i, 0)),
        compiler_params=pltpu.CompilerParams(
            dimension_semantics=("parallel",)),
    )(h_seq, wout, bout)

    out = out_flat.reshape(T, Bp, Vp)[:, :B, :V]                      # (T, B, V)
    out = jnp.transpose(out, (1, 0, 2))                               # (B, T, V)

    # pad_packed_sequence returns max(lengths) timesteps (lengths are host-concrete,
    # exactly like PyTorch's pack_padded_sequence requirement).
    t_out = int(jax.device_get(jnp.max(lengths)))
    return out[:, :t_out]


# ----------------------------- pure-JAX reference -------------------------------
def reference_forward(tok_in, lengths, board_state, params, *, eps=1e-5):
    B, T = tok_in.shape
    H = params["whh0"].shape[0]
    emb = jnp.take(params["wemb"], tok_in, axis=0)
    bs = jnp.repeat(board_state[:, None, :], T, axis=1)
    x = jnp.concatenate([emb, bs], axis=-1).astype(jnp.float32)

    def cell(inp, h, c, wih, whh, b):
        g = inp @ wih + h @ whh + b
        i = jax.nn.sigmoid(g[:, 0 * H:1 * H])
        f = jax.nn.sigmoid(g[:, 1 * H:2 * H])
        gg = jnp.tanh(g[:, 2 * H:3 * H])
        o = jax.nn.sigmoid(g[:, 3 * H:4 * H])
        c2 = f * c + i * gg
        return o * jnp.tanh(c2), c2

    h0 = c0 = h1 = c1 = jnp.zeros((B, H), jnp.float32)
    outs = []
    for t in range(T):
        h0, c0 = cell(x[:, t], h0, c0, params["wih0"], params["whh0"], params["b0"])
        h1, c1 = cell(h0, h1, c1, params["wih1"], params["whh1"], params["b1"])
        mask = (lengths > t).astype(jnp.float32)[:, None]
        outs.append(h1 * mask)
    hid = jnp.stack(outs, axis=1)                                     # (B, T, H)
    logits = hid @ params["wout"] + params["bout"]
    out = jnp.log(jax.nn.softmax(logits, axis=-1) + eps)
    t_out = int(jax.device_get(jnp.max(lengths)))
    return out[:, :t_out]


# --------------------------------- main ------------------------------------------
if __name__ == "__main__":
    # small shapes consistent with the module
    vocab_size, emb_size, hidden_dim, board_state_dim = 32, 16, 32, 16
    B, T = 2, 8
    In0 = emb_size + board_state_dim

    key = jax.random.PRNGKey(0)
    ks = jax.random.split(key, 12)
    sc = 0.1
    params = {
        "wemb": sc * jax.random.normal(ks[0], (vocab_size, emb_size), jnp.float32),
        "wih0": sc * jax.random.normal(ks[1], (In0, 4 * hidden_dim), jnp.float32),
        "whh0": sc * jax.random.normal(ks[2], (hidden_dim, 4 * hidden_dim), jnp.float32),
        "b0":   sc * jax.random.normal(ks[3], (1, 4 * hidden_dim), jnp.float32),
        "wih1": sc * jax.random.normal(ks[4], (hidden_dim, 4 * hidden_dim), jnp.float32),
        "whh1": sc * jax.random.normal(ks[5], (hidden_dim, 4 * hidden_dim), jnp.float32),
        "b1":   sc * jax.random.normal(ks[6], (1, 4 * hidden_dim), jnp.float32),
        "wout": sc * jax.random.normal(ks[7], (hidden_dim, vocab_size), jnp.float32),
        "bout": sc * jax.random.normal(ks[8], (1, vocab_size), jnp.float32),
    }

    tok_in = jax.random.randint(ks[9], (B, T), 0, vocab_size, dtype=jnp.int32)
    board_state = sc * jax.random.normal(ks[10], (B, board_state_dim), jnp.float32)
    lengths = jnp.array([T, 5], dtype=jnp.int32)      # max(lengths) == T here

    out = base_decoder_forward(tok_in, lengths, board_state, params)
    out = jax.block_until_ready(out)

    ref = reference_forward(tok_in, lengths, board_state, params)
    assert out.shape == (B, T, vocab_size), out.shape
    err = float(jnp.max(jnp.abs(out - ref)))
    # bf16 MXU inputs (f32 accumulation) -> slightly looser tolerance than pure f32.
    assert jnp.allclose(out, ref, atol=1e-2, rtol=1e-2), err

    # TODO(synk): inter-layer LSTM dropout (p=0.5) is training-only; this forward is eval mode.
    print("KERNEL_OK")
</pallas_src>

<mosaic_0001>
module attributes {stable_mosaic.version = 11 : i64} {
  func.func @_lstm_recurrence_kernel(%arg0: memref<64x16xbf16, #tpu.memory_space<vmem>>, %arg1: memref<8x16xf32, #tpu.memory_space<vmem>>, %arg2: memref<8x1xi32, #tpu.memory_space<vmem>>, %arg3: memref<16x512xbf16, #tpu.memory_space<vmem>>, %arg4: memref<16x512xf32, #tpu.memory_space<vmem>>, %arg5: memref<128x512xf32, #tpu.memory_space<vmem>>, %arg6: memref<1x512xf32, #tpu.memory_space<vmem>>, %arg7: memref<256x512xf32, #tpu.memory_space<vmem>>, %arg8: memref<1x512xf32, #tpu.memory_space<vmem>>, %arg9: memref<64x128xf32, #tpu.memory_space<vmem>>, %arg10: memref<64x512xf32, #tpu.memory_space<vmem>>) attributes {dimension_semantics = [], scalar_prefetch = 0 : i64, scratch_operands = 1 : i64, tpu.core_type = #tpu.core_type<tc>} {
    %c0 = arith.constant 0 : index
    %c0_0 = arith.constant 0 : index
    %0 = vector.load %arg1[%c0, %c0_0] : memref<8x16xf32, #tpu.memory_space<vmem>>, vector<8x16xf32>
    %c0_1 = arith.constant 0 : index
    %c0_2 = arith.constant 0 : index
    %1 = vector.load %arg4[%c0_1, %c0_2] : memref<16x512xf32, #tpu.memory_space<vmem>>, vector<16x512xf32>
    %cst = arith.constant dense<0.000000e+00> : vector<8x512xf32>
    %2 = tpu.matmul %0, %1, %cst {dimension_numbers = #tpu.dot_dimension_numbers<[1], [0], [0], [1], [0, 0, 1, 1], [], []>} : vector<8x16xf32>, vector<16x512xf32>, vector<8x512xf32> -> vector<8x512xf32>
    %c0_3 = arith.constant 0 : index
    %c0_4 = arith.constant 0 : index
    %3 = vector.load %arg6[%c0_3, %c0_4] : memref<1x512xf32, #tpu.memory_space<vmem>>, vector<1x512xf32>
    %4 = vector.broadcast %3 : vector<1x512xf32> to vector<8x512xf32>
    %5 = arith.addf %2, %4 : vector<8x512xf32>
    %c0_5 = arith.constant 0 : index
    %c0_6 = arith.constant 0 : index
    %6 = vector.load %arg0[%c0_5, %c0_6] : memref<64x16xbf16, #tpu.memory_space<vmem>>, vector<64x16xbf16>
    %c0_7 = arith.constant 0 : index
    %c0_8 = arith.constant 0 : index
    %7 = vector.load %arg3[%c0_7, %c0_8] : memref<16x512xbf16, #tpu.memory_space<vmem>>, vector<16x512xbf16>
    %cst_9 = arith.constant dense<0.000000e+00> : vector<64x512xf32>
    %8 = tpu.matmul %6, %7, %cst_9 {dimension_numbers = #tpu.dot_dimension_numbers<[1], [0], [0], [1], [0, 0, 1, 1], [], []>} : vector<64x16xbf16>, vector<16x512xbf16>, vector<64x512xf32> -> vector<64x512xf32>
    %9 = tpu.concatenate %5, %5, %5, %5, %5, %5, %5, %5 in 0 : vector<8x512xf32>, vector<8x512xf32>, vector<8x512xf32>, vector<8x512xf32>, vector<8x512xf32>, vector<8x512xf32>, vector<8x512xf32>, vector<8x512xf32> -> vector<64x512xf32>
    %10 = arith.addf %8, %9 : vector<64x512xf32>
    %c0_10 = arith.constant 0 : index
    %c0_11 = arith.constant 0 : index
    %11 = vector.load %arg10[%c0_10, %c0_11] : memref<64x512xf32, #tpu.memory_space<vmem>>, vector<64x512xf32>
    tpu.vector_store %arg10[%c0_10, %c0_11], %10 {strides = array<i32>} : memref<64x512xf32, #tpu.memory_space<vmem>>, vector<64x512xf32>,
    %c0_12 = arith.constant 0 : index
    %c0_13 = arith.constant 0 : index
    %12 = vector.load %arg5[%c0_12, %c0_13] : memref<128x512xf32, #tpu.memory_space<vmem>>, vector<128x512xf32>
    %c0_14 = arith.constant 0 : index
    %c0_15 = arith.constant 0 : index
    %13 = vector.load %arg7[%c0_14, %c0_15] : memref<256x512xf32, #tpu.memory_space<vmem>>, vector<256x512xf32>
    %c0_16 = arith.constant 0 : index
    %c0_17 = arith.constant 0 : index
    %14 = vector.load %arg8[%c0_16, %c0_17] : memref<1x512xf32, #tpu.memory_space<vmem>>, vector<1x512xf32>
    %c0_18 = arith.constant 0 : index
    %c0_19 = arith.constant 0 : index
    %15 = vector.load %arg2[%c0_18, %c0_19] : memref<8x1xi32, #tpu.memory_space<vmem>>, vector<8x1xi32>
    %cst_20 = arith.constant 0.000000e+00 : f32
    %16 = vector.broadcast %cst_20 : f32 to vector<8x128xf32>
    %c0_21 = arith.constant 0 : index
    %c0_22 = arith.constant 0 : index
    %17 = vector.load %arg10[%c0_21, %c0_22] : memref<64x512xf32, #tpu.memory_space<vmem>>, vector<8x512xf32>
    %18 = vector.extract_strided_slice %17 {offsets = [0, 0], sizes = [8, 384], strides = [1, 1]} : vector<8x512xf32> to vector<8x384xf32>
    %19 = arith.negf %18 : vector<8x384xf32>
    %20 = math.exp %19 : vector<8x384xf32>
    %cst_23 = arith.constant 1.000000e+00 : f32
    %21 = vector.broadcast %cst_23 : f32 to vector<8x384xf32>
    %22 = arith.addf %21, %20 : vector<8x384xf32>
    %23 = arith.divf %21, %22 : vector<8x384xf32>
    %24 = vector.extract_strided_slice %17 {offsets = [0, 384], sizes = [8, 128], strides = [1, 1]} : vector<8x512xf32> to vector<8x128xf32>
    %25 = math.tanh %24 : vector<8x128xf32>
    %26 = vector.extract_strided_slice %23 {offsets = [0, 0], sizes = [8, 128], strides = [1, 1]} : vector<8x384xf32> to vector<8x128xf32>
    %27 = vector.extract_strided_slice %23 {offsets = [0, 128], sizes = [8, 128], strides = [1, 1]} : vector<8x384xf32> to vector<8x128xf32>
    %28 = vector.extract_strided_slice %23 {offsets = [0, 256], sizes = [8, 128], strides = [1, 1]} : vector<8x384xf32> to vector<8x128xf32>
    %29 = arith.mulf %27, %16 : vector<8x128xf32>
    %30 = arith.mulf %26, %25 : vector<8x128xf32>
    %31 = arith.addf %29, %30 : vector<8x128xf32>
    %32 = math.tanh %31 : vector<8x128xf32>
    %33 = arith.mulf %28, %32 : vector<8x128xf32>
    %c1_i32 = arith.constant 1 : i32
    %c1_i32_24 = arith.constant 1 : i32
    %34 = arith.subi %c1_i32, %c1_i32_24 : i32
    %35 = tpu.concatenate %33, %16 in 1 : vector<8x128xf32>, vector<8x128xf32> -> vector<8x256xf32>
    %cst_25 = arith.constant dense<0.000000e+00> : vector<8x512xf32>
    %36 = tpu.matmul %35, %13, %cst_25 {dimension_numbers = #tpu.dot_dimension_numbers<[1], [0], [0], [1], [0, 0, 1, 1], [], []>} : vector<8x256xf32>, vector<256x512xf32>, vector<8x512xf32> -> vector<8x512xf32>
    %37 = vector.broadcast %14 : vector<1x512xf32> to vector<8x512xf32>
    %38 = arith.addf %36, %37 : vector<8x512xf32>
    %39 = vector.extract_strided_slice %38 {offsets = [0, 0], sizes = [8, 384], strides = [1, 1]} : vector<8x512xf32> to vector<8x384xf32>
    %40 = arith.negf %39 : vector<8x384xf32>
    %41 = math.exp %40 : vector<8x384xf32>
    %cst_26 = arith.constant 1.000000e+00 : f32
    %42 = vector.broadcast %cst_26 : f32 to vector<8x384xf32>
    %43 = arith.addf %42, %41 : vector<8x384xf32>
    %44 = arith.divf %42, %43 : vector<8x384xf32>
    %45 = vector.extract_strided_slice %38 {offsets = [0, 384], sizes = [8, 128], strides = [1, 1]} : vector<8x512xf32> to vector<8x128xf32>
    %46 = math.tanh %45 : vector<8x128xf32>
    %47 = vector.extract_strided_slice %44 {offsets = [0, 0], sizes = [8, 128], strides = [1, 1]} : vector<8x384xf32> to vector<8x128xf32>
    %48 = vector.extract_strided_slice %44 {offsets = [0, 128], sizes = [8, 128], strides = [1, 1]} : vector<8x384xf32> to vector<8x128xf32>
    %49 = vector.extract_strided_slice %44 {offsets = [0, 256], sizes = [8, 128], strides = [1, 1]} : vector<8x384xf32> to vector<8x128xf32>
    %50 = arith.mulf %48, %16 : vector<8x128xf32>
    %51 = arith.mulf %47, %46 : vector<8x128xf32>
    %52 = arith.addf %50, %51 : vector<8x128xf32>
    %53 = math.tanh %52 : vector<8x128xf32>
    %54 = arith.mulf %49, %53 : vector<8x128xf32>
    %55 = vector.broadcast %34 : i32 to vector<8x1xi32>
    %56 = arith.cmpi sgt, %15, %55 : vector<8x1xi32>
    %57 = arith.extui %56 : vector<8x1xi1> to vector<8x1xi32>
    %58 = arith.sitofp %57 : vector<8x1xi32> to vector<8x1xf32>
    %59 = vector.broadcast %58 : vector<8x1xf32> to vector<8x128xf32>
    %60 = arith.mulf %54, %59 : vector<8x128xf32>
    %c8_i32 = arith.constant 8 : i32
    %61 = arith.muli %34, %c8_i32 : i32
    %62 = tpu.assume_multiple %61, 8 : i32
    %63 = arith.index_cast %62 : i32 to index
    %c0_27 = arith.constant 0 : index
    %64 = vector.load %arg9[%63, %c0_27] : memref<64x128xf32, #tpu.memory_space<vmem>>, vector<8x128xf32>
    tpu.vector_store %arg9[%63, %c0_27], %60 {strides = array<i32>} : memref<64x128xf32, #tpu.memory_space<vmem>>, vector<8x128xf32>,
    %c8_i32_28 = arith.constant 8 : i32
    %65 = arith.muli %c1_i32, %c8_i32_28 : i32
    %66 = tpu.assume_multiple %65, 8 : i32
    %67 = arith.index_cast %66 : i32 to index
    %c0_29 = arith.constant 0 : index
    %68 = vector.load %arg10[%67, %c0_29] : memref<64x512xf32, #tpu.memory_space<vmem>>, vector<8x512xf32>
    %cst_30 = arith.constant dense<0.000000e+00> : vector<8x512xf32>
    %69 = tpu.matmul %33, %12, %cst_30 {dimension_numbers = #tpu.dot_dimension_numbers<[1], [0], [0], [1], [0, 0, 1, 1], [], []>} : vector<8x128xf32>, vector<128x512xf32>, vector<8x512xf32> -> vector<8x512xf32>
    %70 = arith.addf %68, %69 : vector<8x512xf32>
    %71 = vector.extract_strided_slice %70 {offsets = [0, 0], sizes = [8, 384], strides = [1, 1]} : vector<8x512xf32> to vector<8x384xf32>
    %72 = arith.negf %71 : vector<8x384xf32>
    %73 = math.exp %72 : vector<8x384xf32>
    %cst_31 = arith.constant 1.000000e+00 : f32
    %74 = vector.broadcast %cst_31 : f32 to vector<8x384xf32>
    %75 = arith.addf %74, %73 : vector<8x384xf32>
    %76 = arith.divf %74, %75 : vector<8x384xf32>
    %77 = vector.extract_strided_slice %70 {offsets = [0, 384], sizes = [8, 128], strides = [1, 1]} : vector<8x512xf32> to vector<8x128xf32>
    %78 = math.tanh %77 : vector<8x128xf32>
    %79 = vector.extract_strided_slice %76 {offsets = [0, 0], sizes = [8, 128], strides = [1, 1]} : vector<8x384xf32> to vector<8x128xf32>
    %80 = vector.extract_strided_slice %76 {offsets = [0, 128], sizes = [8, 128], strides = [1, 1]} : vector<8x384xf32> to vector<8x128xf32>
    %81 = vector.extract_strided_slice %76 {offsets = [0, 256], sizes = [8, 128], strides = [1, 1]} : vector<8x384xf32> to vector<8x128xf32>
    %82 = arith.mulf %80, %31 : vector<8x128xf32>
    %83 = arith.mulf %79, %78 : vector<8x128xf32>
    %84 = arith.addf %82, %83 : vector<8x128xf32>
    %85 = math.tanh %84 : vector<8x128xf32>
    %86 = arith.mulf %81, %85 : vector<8x128xf32>
    %c2_i32 = arith.constant 2 : i32
    %c1_i32_32 = arith.constant 1 : i32
    %87 = arith.subi %c2_i32, %c1_i32_32 : i32
    %88 = tpu.concatenate %86, %54 in 1 : vector<8x128xf32>, vector<8x128xf32> -> vector<8x256xf32>
    %cst_33 = arith.constant dense<0.000000e+00> : vector<8x512xf32>
    %89 = tpu.matmul %88, %13, %cst_33 {dimension_numbers = #tpu.dot_dimension_numbers<[1], [0], [0], [1], [0, 0, 1, 1], [], []>} : vector<8x256xf32>, vector<256x512xf32>, vector<8x512xf32> -> vector<8x512xf32>
    %90 = vector.broadcast %14 : vector<1x512xf32> to vector<8x512xf32>
    %91 = arith.addf %89, %90 : vector<8x512xf32>
    %92 = vector.extract_strided_slice %91 {offsets = [0, 0], sizes = [8, 384], strides = [1, 1]} : vector<8x512xf32> to vector<8x384xf32>
    %93 = arith.negf %92 : vector<8x384xf32>
    %94 = math.exp %93 : vector<8x384xf32>
    %cst_34 = arith.constant 1.000000e+00 : f32
    %95 = vector.broadcast %cst_34 : f32 to vector<8x384xf32>
    %96 = arith.addf %95, %94 : vector<8x384xf32>
    %97 = arith.divf %95, %96 : vector<8x384xf32>
    %98 = vector.extract_strided_slice %91 {offsets = [0, 384], sizes = [8, 128], strides = [1, 1]} : vector<8x512xf32> to vector<8x128xf32>
    %99 = math.tanh %98 : vector<8x128xf32>
    %100 = vector.extract_strided_slice %97 {offsets = [0, 0], sizes = [8, 128], strides = [1, 1]} : vector<8x384xf32> to vector<8x128xf32>
    %101 = vector.extract_strided_slice %97 {offsets = [0, 128], sizes = [8, 128], strides = [1, 1]} : vector<8x384xf32> to vector<8x128xf32>
    %102 = vector.extract_strided_slice %97 {offsets = [0, 256], sizes = [8, 128], strides = [1, 1]} : vector<8x384xf32> to vector<8x128xf32>
    %103 = arith.mulf %101, %52 : vector<8x128xf32>
    %104 = arith.mulf %100, %99 : vector<8x128xf32>
    %105 = arith.addf %103, %104 : vector<8x128xf32>
    %106 = math.tanh %105 : vector<8x128xf32>
    %107 = arith.mulf %102, %106 : vector<8x128xf32>
    %108 = vector.broadcast %87 : i32 to vector<8x1xi32>
    %109 = arith.cmpi sgt, %15, %108 : vector<8x1xi32>
    %110 = arith.extui %109 : vector<8x1xi1> to vector<8x1xi32>
    %111 = arith.sitofp %110 : vector<8x1xi32> to vector<8x1xf32>
    %112 = vector.broadcast %111 : vector<8x1xf32> to vector<8x128xf32>
    %113 = arith.mulf %107, %112 : vector<8x128xf32>
    %c8_i32_35 = arith.constant 8 : i32
    %114 = arith.muli %87, %c8_i32_35 : i32
    %115 = tpu.assume_multiple %114, 8 : i32
    %116 = arith.index_cast %115 : i32 to index
    %c0_36 = arith.constant 0 : index
    %117 = vector.load %arg9[%116, %c0_36] : memref<64x128xf32, #tpu.memory_space<vmem>>, vector<8x128xf32>
    tpu.vector_store %arg9[%116, %c0_36], %113 {strides = array<i32>} : memref<64x128xf32, #tpu.memory_space<vmem>>, vector<8x128xf32>,
    %c8_i32_37 = arith.constant 8 : i32
    %118 = arith.muli %c2_i32, %c8_i32_37 : i32
    %119 = tpu.assume_multiple %118, 8 : i32
    %120 = arith.index_cast %119 : i32 to index
    %c0_38 = arith.constant 0 : index
    %121 = vector.load %arg10[%120, %c0_38] : memref<64x512xf32, #tpu.memory_space<vmem>>, vector<8x512xf32>
    %cst_39 = arith.constant dense<0.000000e+00> : vector<8x512xf32>
    %122 = tpu.matmul %86, %12, %cst_39 {dimension_numbers = #tpu.dot_dimension_numbers<[1], [0], [0], [1], [0, 0, 1, 1], [], []>} : vector<8x128xf32>, vector<128x512xf32>, vector<8x512xf32> -> vector<8x512xf32>
    %123 = arith.addf %121, %122 : vector<8x512xf32>
    %124 = vector.extract_strided_slice %123 {offsets = [0, 0], sizes = [8, 384], strides = [1, 1]} : vector<8x512xf32> to vector<8x384xf32>
    %125 = arith.negf %124 : vector<8x384xf32>
    %126 = math.exp %125 : vector<8x384xf32>
    %cst_40 = arith.constant 1.000000e+00 : f32
    %127 = vector.broadcast %cst_40 : f32 to vector<8x384xf32>
    %128 = arith.addf %127, %126 : vector<8x384xf32>
    %129 = arith.divf %127, %128 : vector<8x384xf32>
    %130 = vector.extract_strided_slice %123 {offsets = [0, 384], sizes = [8, 128], strides = [1, 1]} : vector<8x512xf32> to vector<8x128xf32>
    %131 = math.tanh %130 : vector<8x128xf32>
    %132 = vector.extract_strided_slice %129 {offsets = [0, 0], sizes = [8, 128], strides = [1, 1]} : vector<8x384xf32> to vector<8x128xf32>
    %133 = vector.extract_strided_slice %129 {offsets = [0, 128], sizes = [8, 128], strides = [1, 1]} : vector<8x384xf32> to vector<8x128xf32>
    %134 = vector.extract_strided_slice %129 {offsets = [0, 256], sizes = [8, 128], strides = [1, 1]} : vector<8x384xf32> to vector<8x128xf32>
    %135 = arith.mulf %133, %84 : vector<8x128xf32>
    %136 = arith.mulf %132, %131 : vector<8x128xf32>
    %137 = arith.addf %135, %136 : vector<8x128xf32>
    %138 = math.tanh %137 : vector<8x128xf32>
    %139 = arith.mulf %134, %138 : vector<8x128xf32>
    %c3_i32 = arith.constant 3 : i32
    %c1_i32_41 = arith.constant 1 : i32
    %140 = arith.subi %c3_i32, %c1_i32_41 : i32
    %141 = tpu.concatenate %139, %107 in 1 : vector<8x128xf32>, vector<8x128xf32> -> vector<8x256xf32>
    %cst_42 = arith.constant dense<0.000000e+00> : vector<8x512xf32>
    %142 = tpu.matmul %141, %13, %cst_42 {dimension_numbers = #tpu.dot_dimension_numbers<[1], [0], [0], [1], [0, 0, 1, 1], [], []>} : vector<8x256xf32>, vector<256x512xf32>, vector<8x512xf32> -> vector<8x512xf32>
    %143 = vector.broadcast %14 : vector<1x512xf32> to vector<8x512xf32>
    %144 = arith.addf %142, %143 : vector<8x512xf32>
    %145 = vector.extract_strided_slice %144 {offsets = [0, 0], sizes = [8, 384], strides = [1, 1]} : vector<8x512xf32> to vector<8x384xf32>
    %146 = arith.negf %145 : vector<8x384xf32>
    %147 = math.exp %146 : vector<8x384xf32>
    %cst_43 = arith.constant 1.000000e+00 : f32
    %148 = vector.broadcast %cst_43 : f32 to vector<8x384xf32>
    %149 = arith.addf %148, %147 : vector<8x384xf32>
    %150 = arith.divf %148, %149 : vector<8x384xf32>
    %151 = vector.extract_strided_slice %144 {offsets = [0, 384], sizes = [8, 128], strides = [1, 1]} : vector<8x512xf32> to vector<8x128xf32>
    %152 = math.tanh %151 : vector<8x128xf32>
    %153 = vector.extract_strided_slice %150 {offsets = [0, 0], sizes = [8, 128], strides = [1, 1]} : vector<8x384xf32> to vector<8x128xf32>
    %154 = vector.extract_strided_slice %150 {offsets = [0, 128], sizes = [8, 128], strides = [1, 1]} : vector<8x384xf32> to vector<8x128xf32>
    %155 = vector.extract_strided_slice %150 {offsets = [0, 256], sizes = [8, 128], strides = [1, 1]} : vector<8x384xf32> to vector<8x128xf32>
    %156 = arith.mulf %154, %105 : vector<8x128xf32>
    %157 = arith.mulf %153, %152 : vector<8x128xf32>
    %158 = arith.addf %156, %157 : vector<8x128xf32>
    %159 = math.tanh %158 : vector<8x128xf32>
    %160 = arith.mulf %155, %159 : vector<8x128xf32>
    %161 = vector.broadcast %140 : i32 to vector<8x1xi32>
    %162 = arith.cmpi sgt, %15, %161 : vector<8x1xi32>
    %163 = arith.extui %162 : vector<8x1xi1> to vector<8x1xi32>
    %164 = arith.sitofp %163 : vector<8x1xi32> to vector<8x1xf32>
    %165 = vector.broadcast %164 : vector<8x1xf32> to vector<8x128xf32>
    %166 = arith.mulf %160, %165 : vector<8x128xf32>
    %c8_i32_44 = arith.constant 8 : i32
    %167 = arith.muli %140, %c8_i32_44 : i32
    %168 = tpu.assume_multiple %167, 8 : i32
    %169 = arith.index_cast %168 : i32 to index
    %c0_45 = arith.constant 0 : index
    %170 = vector.load %arg9[%169, %c0_45] : memref<64x128xf32, #tpu.memory_space<vmem>>, vector<8x128xf32>
    tpu.vector_store %arg9[%169, %c0_45], %166 {strides = array<i32>} : memref<64x128xf32, #tpu.memory_space<vmem>>, vector<8x128xf32>,
    %c8_i32_46 = arith.constant 8 : i32
    %171 = arith.muli %c3_i32, %c8_i32_46 : i32
    %172 = tpu.assume_multiple %171, 8 : i32
    %173 = arith.index_cast %172 : i32 to index
    %c0_47 = arith.constant 0 : index
    %174 = vector.load %arg10[%173, %c0_47] : memref<64x512xf32, #tpu.memory_space<vmem>>, vector<8x512xf32>
    %cst_48 = arith.constant dense<0.000000e+00> : vector<8x512xf32>
    %175 = tpu.matmul %139, %12, %cst_48 {dimension_numbers = #tpu.dot_dimension_numbers<[1], [0], [0], [1], [0, 0, 1, 1], [], []>} : vector<8x128xf32>, vector<128x512xf32>, vector<8x512xf32> -> vector<8x512xf32>
    %176 = arith.addf %174, %175 : vector<8x512xf32>
    %177 = vector.extract_strided_slice %176 {offsets = [0, 0], sizes = [8, 384], strides = [1, 1]} : vector<8x512xf32> to vector<8x384xf32>
    %178 = arith.negf %177 : vector<8x384xf32>
    %179 = math.exp %178 : vector<8x384xf32>
    %cst_49 = arith.constant 1.000000e+00 : f32
    %180 = vector.broadcast %cst_49 : f32 to vector<8x384xf32>
    %181 = arith.addf %180, %179 : vector<8x384xf32>
    %182 = arith.divf %180, %181 : vector<8x384xf32>
    %183 = vector.extract_strided_slice %176 {offsets = [0, 384], sizes = [8, 128], strides = [1, 1]} : vector<8x512xf32> to vector<8x128xf32>
    %184 = math.tanh %183 : vector<8x128xf32>
    %185 = vector.extract_strided_slice %182 {offsets = [0, 0], sizes = [8, 128], strides = [1, 1]} : vector<8x384xf32> to vector<8x128xf32>
    %186 = vector.extract_strided_slice %182 {offsets = [0, 128], sizes = [8, 128], strides = [1, 1]} : vector<8x384xf32> to vector<8x128xf32>
    %187 = vector.extract_strided_slice %182 {offsets = [0, 256], sizes = [8, 128], strides = [1, 1]} : vector<8x384xf32> to vector<8x128xf32>
    %188 = arith.mulf %186, %137 : vector<8x128xf32>
    %189 = arith.mulf %185, %184 : vector<8x128xf32>
    %190 = arith.addf %188, %189 : vector<8x128xf32>
    %191 = math.tanh %190 : vector<8x128xf32>
    %192 = arith.mulf %187, %191 : vector<8x128xf32>
    %c4_i32 = arith.constant 4 : i32
    %c1_i32_50 = arith.constant 1 : i32
    %193 = arith.subi %c4_i32, %c1_i32_50 : i32
    %194 = tpu.concatenate %192, %160 in 1 : vector<8x128xf32>, vector<8x128xf32> -> vector<8x256xf32>
    %cst_51 = arith.constant dense<0.000000e+00> : vector<8x512xf32>
    %195 = tpu.matmul %194, %13, %cst_51 {dimension_numbers = #tpu.dot_dimension_numbers<[1], [0], [0], [1], [0, 0, 1, 1], [], []>} : vector<8x256xf32>, vector<256x512xf32>, vector<8x512xf32> -> vector<8x512xf32>
    %196 = vector.broadcast %14 : vector<1x512xf32> to vector<8x512xf32>
    %197 = arith.addf %195, %196 : vector<8x512xf32>
    %198 = vector.extract_strided_slice %197 {offsets = [0, 0], sizes = [8, 384], strides = [1, 1]} : vector<8x512xf32> to vector<8x384xf32>
    %199 = arith.negf %198 : vector<8x384xf32>
    %200 = math.exp %199 : vector<8x384xf32>
    %cst_52 = arith.constant 1.000000e+00 : f32
    %201 = vector.broadcast %cst_52 : f32 to vector<8x384xf32>
    %202 = arith.addf %201, %200 : vector<8x384xf32>
    %203 = arith.divf %201, %202 : vector<8x384xf32>
    %204 = vector.extract_strided_slice %197 {offsets = [0, 384], sizes = [8, 128], strides = [1, 1]} : vector<8x512xf32> to vector<8x128xf32>
    %205 = math.tanh %204 : vector<8x128xf32>
    %206 = vector.extract_strided_slice %203 {offsets = [0, 0], sizes = [8, 128], strides = [1, 1]} : vector<8x384xf32> to vector<8x128xf32>
    %207 = vector.extract_strided_slice %203 {offsets = [0, 128], sizes = [8, 128], strides = [1, 1]} : vector<8x384xf32> to vector<8x128xf32>
    %208 = vector.extract_strided_slice %203 {offsets = [0, 256], sizes = [8, 128], strides = [1, 1]} : vector<8x384xf32> to vector<8x128xf32>
    %209 = arith.mulf %207, %158 : vector<8x128xf32>
    %210 = arith.mulf %206, %205 : vector<8x128xf32>
    %211 = arith.addf %209, %210 : vector<8x128xf32>
    %212 = math.tanh %211 : vector<8x128xf32>
    %213 = arith.mulf %208, %212 : vector<8x128xf32>
    %214 = vector.broadcast %193 : i32 to vector<8x1xi32>
    %215 = arith.cmpi sgt, %15, %214 : vector<8x1xi32>
    %216 = arith.extui %215 : vector<8x1xi1> to vector<8x1xi32>
    %217 = arith.sitofp %216 : vector<8x1xi32> to vector<8x1xf32>
    %218 = vector.broadcast %217 : vector<8x1xf32> to vector<8x128xf32>
    %219 = arith.mulf %213, %218 : vector<8x128xf32>
    %c8_i32_53 = arith.constant 8 : i32
    %220 = arith.muli %193, %c8_i32_53 : i32
    %221 = tpu.assume_multiple %220, 8 : i32
    %222 = arith.index_cast %221 : i32 to index
    %c0_54 = arith.constant 0 : index
    %223 = vector.load %arg9[%222, %c0_54] : memref<64x128xf32, #tpu.memory_space<vmem>>, vector<8x128xf32>
    tpu.vector_store %arg9[%222, %c0_54], %219 {strides = array<i32>} : memref<64x128xf32, #tpu.memory_space<vmem>>, vector<8x128xf32>,
    %c8_i32_55 = arith.constant 8 : i32
    %224 = arith.muli %c4_i32, %c8_i32_55 : i32
    %225 = tpu.assume_multiple %224, 8 : i32
    %226 = arith.index_cast %225 : i32 to index
    %c0_56 = arith.constant 0 : index
    %227 = vector.load %arg10[%226, %c0_56] : memref<64x512xf32, #tpu.memory_space<vmem>>, vector<8x512xf32>
    %cst_57 = arith.constant dense<0.000000e+00> : vector<8x512xf32>
    %228 = tpu.matmul %192, %12, %cst_57 {dimension_numbers = #tpu.dot_dimension_numbers<[1], [0], [0], [1], [0, 0, 1, 1], [], []>} : vector<8x128xf32>, vector<128x512xf32>, vector<8x512xf32> -> vector<8x512xf32>
    %229 = arith.addf %227, %228 : vector<8x512xf32>
    %230 = vector.extract_strided_slice %229 {offsets = [0, 0], sizes = [8, 384], strides = [1, 1]} : vector<8x512xf32> to vector<8x384xf32>
    %231 = arith.negf %230 : vector<8x384xf32>
    %232 = math.exp %231 : vector<8x384xf32>
    %cst_58 = arith.constant 1.000000e+00 : f32
    %233 = vector.broadcast %cst_58 : f32 to vector<8x384xf32>
    %234 = arith.addf %233, %232 : vector<8x384xf32>
    %235 = arith.divf %233, %234 : vector<8x384xf32>
    %236 = vector.extract_strided_slice %229 {offsets = [0, 384], sizes = [8, 128], strides = [1, 1]} : vector<8x512xf32> to vector<8x128xf32>
    %237 = math.tanh %236 : vector<8x128xf32>
    %238 = vector.extract_strided_slice %235 {offsets = [0, 0], sizes = [8, 128], strides = [1, 1]} : vector<8x384xf32> to vector<8x128xf32>
    %239 = vector.extract_strided_slice %235 {offsets = [0, 128], sizes = [8, 128], strides = [1, 1]} : vector<8x384xf32> to vector<8x128xf32>
    %240 = vector.extract_strided_slice %235 {offsets = [0, 256], sizes = [8, 128], strides = [1, 1]} : vector<8x384xf32> to vector<8x128xf32>
    %241 = arith.mulf %239, %190 : vector<8x128xf32>
    %242 = arith.mulf %238, %237 : vector<8x128xf32>
    %243 = arith.addf %241, %242 : vector<8x128xf32>
    %244 = math.tanh %243 : vector<8x128xf32>
    %245 = arith.mulf %240, %244 : vector<8x128xf32>
    %c5_i32 = arith.constant 5 : i32
    %c1_i32_59 = arith.constant 1 : i32
    %246 = arith.subi %c5_i32, %c1_i32_59 : i32
    %247 = tpu.concatenate %245, %213 in 1 : vector<8x128xf32>, vector<8x128xf32> -> vector<8x256xf32>
    %cst_60 = arith.constant dense<0.000000e+00> : vector<8x512xf32>
    %248 = tpu.matmul %247, %13, %cst_60 {dimension_numbers = #tpu.dot_dimension_numbers<[1], [0], [0], [1], [0, 0, 1, 1], [], []>} : vector<8x256xf32>, vector<256x512xf32>, vector<8x512xf32> -> vector<8x512xf32>
    %249 = vector.broadcast %14 : vector<1x512xf32> to vector<8x512xf32>
    %250 = arith.addf %248, %249 : vector<8x512xf32>
    %251 = vector.extract_strided_slice %250 {offsets = [0, 0], sizes = [8, 384], strides = [1, 1]} : vector<8x512xf32> to vector<8x384xf32>
    %252 = arith.negf %251 : vector<8x384xf32>
    %253 = math.exp %252 : vector<8x384xf32>
    %cst_61 = arith.constant 1.000000e+00 : f32
    %254 = vector.broadcast %cst_61 : f32 to vector<8x384xf32>
    %255 = arith.addf %254, %253 : vector<8x384xf32>
    %256 = arith.divf %254, %255 : vector<8x384xf32>
    %257 = vector.extract_strided_slice %250 {offsets = [0, 384], sizes = [8, 128], strides = [1, 1]} : vector<8x512xf32> to vector<8x128xf32>
    %258 = math.tanh %257 : vector<8x128xf32>
    %259 = vector.extract_strided_slice %256 {offsets = [0, 0], sizes = [8, 128], strides = [1, 1]} : vector<8x384xf32> to vector<8x128xf32>
    %260 = vector.extract_strided_slice %256 {offsets = [0, 128], sizes = [8, 128], strides = [1, 1]} : vector<8x384xf32> to vector<8x128xf32>
    %261 = vector.extract_strided_slice %256 {offsets = [0, 256], sizes = [8, 128], strides = [1, 1]} : vector<8x384xf32> to vector<8x128xf32>
    %262 = arith.mulf %260, %211 : vector<8x128xf32>
    %263 = arith.mulf %259, %258 : vector<8x128xf32>
    %264 = arith.addf %262, %263 : vector<8x128xf32>
    %265 = math.tanh %264 : vector<8x128xf32>
    %266 = arith.mulf %261, %265 : vector<8x128xf32>
    %267 = vector.broadcast %246 : i32 to vector<8x1xi32>
    %268 = arith.cmpi sgt, %15, %267 : vector<8x1xi32>
    %269 = arith.extui %268 : vector<8x1xi1> to vector<8x1xi32>
    %270 = arith.sitofp %269 : vector<8x1xi32> to vector<8x1xf32>
    %271 = vector.broadcast %270 : vector<8x1xf32> to vector<8x128xf32>
    %272 = arith.mulf %266, %271 : vector<8x128xf32>
    %c8_i32_62 = arith.constant 8 : i32
    %273 = arith.muli %246, %c8_i32_62 : i32
    %274 = tpu.assume_multiple %273, 8 : i32
    %275 = arith.index_cast %274 : i32 to index
    %c0_63 = arith.constant 0 : index
    %276 = vector.load %arg9[%275, %c0_63] : memref<64x128xf32, #tpu.memory_space<vmem>>, vector<8x128xf32>
    tpu.vector_store %arg9[%275, %c0_63], %272 {strides = array<i32>} : memref<64x128xf32, #tpu.memory_space<vmem>>, vector<8x128xf32>,
    %c8_i32_64 = arith.constant 8 : i32
    %277 = arith.muli %c5_i32, %c8_i32_64 : i32
    %278 = tpu.assume_multiple %277, 8 : i32
    %279 = arith.index_cast %278 : i32 to index
    %c0_65 = arith.constant 0 : index
    %280 = vector.load %arg10[%279, %c0_65] : memref<64x512xf32, #tpu.memory_space<vmem>>, vector<8x512xf32>
    %cst_66 = arith.constant dense<0.000000e+00> : vector<8x512xf32>
    %281 = tpu.matmul %245, %12, %cst_66 {dimension_numbers = #tpu.dot_dimension_numbers<[1], [0], [0], [1], [0, 0, 1, 1], [], []>} : vector<8x128xf32>, vector<128x512xf32>, vector<8x512xf32> -> vector<8x512xf32>
    %282 = arith.addf %280, %281 : vector<8x512xf32>
    %283 = vector.extract_strided_slice %282 {offsets = [0, 0], sizes = [8, 384], strides = [1, 1]} : vector<8x512xf32> to vector<8x384xf32>
    %284 = arith.negf %283 : vector<8x384xf32>
    %285 = math.exp %284 : vector<8x384xf32>
    %cst_67 = arith.constant 1.000000e+00 : f32
    %286 = vector.broadcast %cst_67 : f32 to vector<8x384xf32>
    %287 = arith.addf %286, %285 : vector<8x384xf32>
    %288 = arith.divf %286, %287 : vector<8x384xf32>
    %289 = vector.extract_strided_slice %282 {offsets = [0, 384], sizes = [8, 128], strides = [1, 1]} : vector<8x512xf32> to vector<8x128xf32>
    %290 = math.tanh %289 : vector<8x128xf32>
    %291 = vector.extract_strided_slice %288 {offsets = [0, 0], sizes = [8, 128], strides = [1, 1]} : vector<8x384xf32> to vector<8x128xf32>
    %292 = vector.extract_strided_slice %288 {offsets = [0, 128], sizes = [8, 128], strides = [1, 1]} : vector<8x384xf32> to vector<8x128xf32>
    %293 = vector.extract_strided_slice %288 {offsets = [0, 256], sizes = [8, 128], strides = [1, 1]} : vector<8x384xf32> to vector<8x128xf32>
    %294 = arith.mulf %292, %243 : vector<8x128xf32>
    %295 = arith.mulf %291, %290 : vector<8x128xf32>
    %296 = arith.addf %294, %295 : vector<8x128xf32>
    %297 = math.tanh %296 : vector<8x128xf32>
    %298 = arith.mulf %293, %297 : vector<8x128xf32>
    %c6_i32 = arith.constant 6 : i32
    %c1_i32_68 = arith.constant 1 : i32
    %299 = arith.subi %c6_i32, %c1_i32_68 : i32
    %300 = tpu.concatenate %298, %266 in 1 : vector<8x128xf32>, vector<8x128xf32> -> vector<8x256xf32>
    %cst_69 = arith.constant dense<0.000000e+00> : vector<8x512xf32>
    %301 = tpu.matmul %300, %13, %cst_69 {dimension_numbers = #tpu.dot_dimension_numbers<[1], [0], [0], [1], [0, 0, 1, 1], [], []>} : vector<8x256xf32>, vector<256x512xf32>, vector<8x512xf32> -> vector<8x512xf32>
    %302 = vector.broadcast %14 : vector<1x512xf32> to vector<8x512xf32>
    %303 = arith.addf %301, %302 : vector<8x512xf32>
    %304 = vector.extract_strided_slice %303 {offsets = [0, 0], sizes = [8, 384], strides = [1, 1]} : vector<8x512xf32> to vector<8x384xf32>
    %305 = arith.negf %304 : vector<8x384xf32>
    %306 = math.exp %305 : vector<8x384xf32>
    %cst_70 = arith.constant 1.000000e+00 : f32
    %307 = vector.broadcast %cst_70 : f32 to vector<8x384xf32>
    %308 = arith.addf %307, %306 : vector<8x384xf32>
    %309 = arith.divf %307, %308 : vector<8x384xf32>
    %310 = vector.extract_strided_slice %303 {offsets = [0, 384], sizes = [8, 128], strides = [1, 1]} : vector<8x512xf32> to vector<8x128xf32>
    %311 = math.tanh %310 : vector<8x128xf32>
    %312 = vector.extract_strided_slice %309 {offsets = [0, 0], sizes = [8, 128], strides = [1, 1]} : vector<8x384xf32> to vector<8x128xf32>
    %313 = vector.extract_strided_slice %309 {offsets = [0, 128], sizes = [8, 128], strides = [1, 1]} : vector<8x384xf32> to vector<8x128xf32>
    %314 = vector.extract_strided_slice %309 {offsets = [0, 256], sizes = [8, 128], strides = [1, 1]} : vector<8x384xf32> to vector<8x128xf32>
    %315 = arith.mulf %313, %264 : vector<8x128xf32>
    %316 = arith.mulf %312, %311 : vector<8x128xf32>
    %317 = arith.addf %315, %316 : vector<8x128xf32>
    %318 = math.tanh %317 : vector<8x128xf32>
    %319 = arith.mulf %314, %318 : vector<8x128xf32>
    %320 = vector.broadcast %299 : i32 to vector<8x1xi32>
    %321 = arith.cmpi sgt, %15, %320 : vector<8x1xi32>
    %322 = arith.extui %321 : vector<8x1xi1> to vector<8x1xi32>
    %323 = arith.sitofp %322 : vector<8x1xi32> to vector<8x1xf32>
    %324 = vector.broadcast %323 : vector<8x1xf32> to vector<8x128xf32>
    %325 = arith.mulf %319, %324 : vector<8x128xf32>
    %c8_i32_71 = arith.constant 8 : i32
    %326 = arith.muli %299, %c8_i32_71 : i32
    %327 = tpu.assume_multiple %326, 8 : i32
    %328 = arith.index_cast %327 : i32 to index
    %c0_72 = arith.constant 0 : index
    %329 = vector.load %arg9[%328, %c0_72] : memref<64x128xf32, #tpu.memory_space<vmem>>, vector<8x128xf32>
    tpu.vector_store %arg9[%328, %c0_72], %325 {strides = array<i32>} : memref<64x128xf32, #tpu.memory_space<vmem>>, vector<8x128xf32>,
    %c8_i32_73 = arith.constant 8 : i32
    %330 = arith.muli %c6_i32, %c8_i32_73 : i32
    %331 = tpu.assume_multiple %330, 8 : i32
    %332 = arith.index_cast %331 : i32 to index
    %c0_74 = arith.constant 0 : index
    %333 = vector.load %arg10[%332, %c0_74] : memref<64x512xf32, #tpu.memory_space<vmem>>, vector<8x512xf32>
    %cst_75 = arith.constant dense<0.000000e+00> : vector<8x512xf32>
    %334 = tpu.matmul %298, %12, %cst_75 {dimension_numbers = #tpu.dot_dimension_numbers<[1], [0], [0], [1], [0, 0, 1, 1], [], []>} : vector<8x128xf32>, vector<128x512xf32>, vector<8x512xf32> -> vector<8x512xf32>
    %335 = arith.addf %333, %334 : vector<8x512xf32>
    %336 = vector.extract_strided_slice %335 {offsets = [0, 0], sizes = [8, 384], strides = [1, 1]} : vector<8x512xf32> to vector<8x384xf32>
    %337 = arith.negf %336 : vector<8x384xf32>
    %338 = math.exp %337 : vector<8x384xf32>
    %cst_76 = arith.constant 1.000000e+00 : f32
    %339 = vector.broadcast %cst_76 : f32 to vector<8x384xf32>
    %340 = arith.addf %339, %338 : vector<8x384xf32>
    %341 = arith.divf %339, %340 : vector<8x384xf32>
    %342 = vector.extract_strided_slice %335 {offsets = [0, 384], sizes = [8, 128], strides = [1, 1]} : vector<8x512xf32> to vector<8x128xf32>
    %343 = math.tanh %342 : vector<8x128xf32>
    %344 = vector.extract_strided_slice %341 {offsets = [0, 0], sizes = [8, 128], strides = [1, 1]} : vector<8x384xf32> to vector<8x128xf32>
    %345 = vector.extract_strided_slice %341 {offsets = [0, 128], sizes = [8, 128], strides = [1, 1]} : vector<8x384xf32> to vector<8x128xf32>
    %346 = vector.extract_strided_slice %341 {offsets = [0, 256], sizes = [8, 128], strides = [1, 1]} : vector<8x384xf32> to vector<8x128xf32>
    %347 = arith.mulf %345, %296 : vector<8x128xf32>
    %348 = arith.mulf %344, %343 : vector<8x128xf32>
    %349 = arith.addf %347, %348 : vector<8x128xf32>
    %350 = math.tanh %349 : vector<8x128xf32>
    %351 = arith.mulf %346, %350 : vector<8x128xf32>
    %c7_i32 = arith.constant 7 : i32
    %c1_i32_77 = arith.constant 1 : i32
    %352 = arith.subi %c7_i32, %c1_i32_77 : i32
    %353 = tpu.concatenate %351, %319 in 1 : vector<8x128xf32>, vector<8x128xf32> -> vector<8x256xf32>
    %cst_78 = arith.constant dense<0.000000e+00> : vector<8x512xf32>
    %354 = tpu.matmul %353, %13, %cst_78 {dimension_numbers = #tpu.dot_dimension_numbers<[1], [0], [0], [1], [0, 0, 1, 1], [], []>} : vector<8x256xf32>, vector<256x512xf32>, vector<8x512xf32> -> vector<8x512xf32>
    %355 = vector.broadcast %14 : vector<1x512xf32> to vector<8x512xf32>
    %356 = arith.addf %354, %355 : vector<8x512xf32>
    %357 = vector.extract_strided_slice %356 {offsets = [0, 0], sizes = [8, 384], strides = [1, 1]} : vector<8x512xf32> to vector<8x384xf32>
    %358 = arith.negf %357 : vector<8x384xf32>
    %359 = math.exp %358 : vector<8x384xf32>
    %cst_79 = arith.constant 1.000000e+00 : f32
    %360 = vector.broadcast %cst_79 : f32 to vector<8x384xf32>
    %361 = arith.addf %360, %359 : vector<8x384xf32>
    %362 = arith.divf %360, %361 : vector<8x384xf32>
    %363 = vector.extract_strided_slice %356 {offsets = [0, 384], sizes = [8, 128], strides = [1, 1]} : vector<8x512xf32> to vector<8x128xf32>
    %364 = math.tanh %363 : vector<8x128xf32>
    %365 = vector.extract_strided_slice %362 {offsets = [0, 0], sizes = [8, 128], strides = [1, 1]} : vector<8x384xf32> to vector<8x128xf32>
    %366 = vector.extract_strided_slice %362 {offsets = [0, 128], sizes = [8, 128], strides = [1, 1]} : vector<8x384xf32> to vector<8x128xf32>
    %367 = vector.extract_strided_slice %362 {offsets = [0, 256], sizes = [8, 128], strides = [1, 1]} : vector<8x384xf32> to vector<8x128xf32>
    %368 = arith.mulf %366, %317 : vector<8x128xf32>
    %369 = arith.mulf %365, %364 : vector<8x128xf32>
    %370 = arith.addf %368, %369 : vector<8x128xf32>
    %371 = math.tanh %370 : vector<8x128xf32>
    %372 = arith.mulf %367, %371 : vector<8x128xf32>
    %373 = vector.broadcast %352 : i32 to vector<8x1xi32>
    %374 = arith.cmpi sgt, %15, %373 : vector<8x1xi32>
    %375 = arith.extui %374 : vector<8x1xi1> to vector<8x1xi32>
    %376 = arith.sitofp %375 : vector<8x1xi32> to vector<8x1xf32>
    %377 = vector.broadcast %376 : vector<8x1xf32> to vector<8x128xf32>
    %378 = arith.mulf %372, %377 : vector<8x128xf32>
    %c8_i32_80 = arith.constant 8 : i32
    %379 = arith.muli %352, %c8_i32_80 : i32
    %380 = tpu.assume_multiple %379, 8 : i32
    %381 = arith.index_cast %380 : i32 to index
    %c0_81 = arith.constant 0 : index
    %382 = vector.load %arg9[%381, %c0_81] : memref<64x128xf32, #tpu.memory_space<vmem>>, vector<8x128xf32>
    tpu.vector_store %arg9[%381, %c0_81], %378 {strides = array<i32>} : memref<64x128xf32, #tpu.memory_space<vmem>>, vector<8x128xf32>,
    %c8_i32_82 = arith.constant 8 : i32
    %383 = arith.muli %c7_i32, %c8_i32_82 : i32
    %384 = tpu.assume_multiple %383, 8 : i32
    %385 = arith.index_cast %384 : i32 to index
    %c0_83 = arith.constant 0 : index
    %386 = vector.load %arg10[%385, %c0_83] : memref<64x512xf32, #tpu.memory_space<vmem>>, vector<8x512xf32>
    %cst_84 = arith.constant dense<0.000000e+00> : vector<8x512xf32>
    %387 = tpu.matmul %351, %12, %cst_84 {dimension_numbers = #tpu.dot_dimension_numbers<[1], [0], [0], [1], [0, 0, 1, 1], [], []>} : vector<8x128xf32>, vector<128x512xf32>, vector<8x512xf32> -> vector<8x512xf32>
    %388 = arith.addf %386, %387 : vector<8x512xf32>
    %389 = vector.extract_strided_slice %388 {offsets = [0, 0], sizes = [8, 384], strides = [1, 1]} : vector<8x512xf32> to vector<8x384xf32>
    %390 = arith.negf %389 : vector<8x384xf32>
    %391 = math.exp %390 : vector<8x384xf32>
    %cst_85 = arith.constant 1.000000e+00 : f32
    %392 = vector.broadcast %cst_85 : f32 to vector<8x384xf32>
    %393 = arith.addf %392, %391 : vector<8x384xf32>
    %394 = arith.divf %392, %393 : vector<8x384xf32>
    %395 = vector.extract_strided_slice %388 {offsets = [0, 384], sizes = [8, 128], strides = [1, 1]} : vector<8x512xf32> to vector<8x128xf32>
    %396 = math.tanh %395 : vector<8x128xf32>
    %397 = vector.extract_strided_slice %394 {offsets = [0, 0], sizes = [8, 128], strides = [1, 1]} : vector<8x384xf32> to vector<8x128xf32>
    %398 = vector.extract_strided_slice %394 {offsets = [0, 128], sizes = [8, 128], strides = [1, 1]} : vector<8x384xf32> to vector<8x128xf32>
    %399 = vector.extract_strided_slice %394 {offsets = [0, 256], sizes = [8, 128], strides = [1, 1]} : vector<8x384xf32> to vector<8x128xf32>
    %400 = arith.mulf %398, %349 : vector<8x128xf32>
    %401 = arith.mulf %397, %396 : vector<8x128xf32>
    %402 = arith.addf %400, %401 : vector<8x128xf32>
    %403 = math.tanh %402 : vector<8x128xf32>
    %404 = arith.mulf %399, %403 : vector<8x128xf32>
    %c7_i32_86 = arith.constant 7 : i32
    %405 = tpu.concatenate %404, %372 in 1 : vector<8x128xf32>, vector<8x128xf32> -> vector<8x256xf32>
    %cst_87 = arith.constant dense<0.000000e+00> : vector<8x512xf32>
    %406 = tpu.matmul %405, %13, %cst_87 {dimension_numbers = #tpu.dot_dimension_numbers<[1], [0], [0], [1], [0, 0, 1, 1], [], []>} : vector<8x256xf32>, vector<256x512xf32>, vector<8x512xf32> -> vector<8x512xf32>
    %407 = vector.broadcast %14 : vector<1x512xf32> to vector<8x512xf32>
    %408 = arith.addf %406, %407 : vector<8x512xf32>
    %409 = vector.extract_strided_slice %408 {offsets = [0, 0], sizes = [8, 384], strides = [1, 1]} : vector<8x512xf32> to vector<8x384xf32>
    %410 = arith.negf %409 : vector<8x384xf32>
    %411 = math.exp %410 : vector<8x384xf32>
    %cst_88 = arith.constant 1.000000e+00 : f32
    %412 = vector.broadcast %cst_88 : f32 to vector<8x384xf32>
    %413 = arith.addf %412, %411 : vector<8x384xf32>
    %414 = arith.divf %412, %413 : vector<8x384xf32>
    %415 = vector.extract_strided_slice %408 {offsets = [0, 384], sizes = [8, 128], strides = [1, 1]} : vector<8x512xf32> to vector<8x128xf32>
    %416 = math.tanh %415 : vector<8x128xf32>
    %417 = vector.extract_strided_slice %414 {offsets = [0, 0], sizes = [8, 128], strides = [1, 1]} : vector<8x384xf32> to vector<8x128xf32>
    %418 = vector.extract_strided_slice %414 {offsets = [0, 128], sizes = [8, 128], strides = [1, 1]} : vector<8x384xf32> to vector<8x128xf32>
    %419 = vector.extract_strided_slice %414 {offsets = [0, 256], sizes = [8, 128], strides = [1, 1]} : vector<8x384xf32> to vector<8x128xf32>
    %420 = arith.mulf %418, %370 : vector<8x128xf32>
    %421 = arith.mulf %417, %416 : vector<8x128xf32>
    %422 = arith.addf %420, %421 : vector<8x128xf32>
    %423 = math.tanh %422 : vector<8x128xf32>
    %424 = arith.mulf %419, %423 : vector<8x128xf32>
    %c7_i32_89 = arith.constant 7 : i32
    %425 = vector.broadcast %c7_i32_89 : i32 to vector<8x1xi32>
    %426 = arith.cmpi sgt, %15, %425 : vector<8x1xi32>
    %427 = arith.extui %426 : vector<8x1xi1> to vector<8x1xi32>
    %428 = arith.sitofp %427 : vector<8x1xi32> to vector<8x1xf32>
    %429 = vector.broadcast %428 : vector<8x1xf32> to vector<8x128xf32>
    %430 = arith.mulf %424, %429 : vector<8x128xf32>
    %c56 = arith.constant 56 : index
    %c0_90 = arith.constant 0 : index
    %431 = vector.load %arg9[%c56, %c0_90] : memref<64x128xf32, #tpu.memory_space<vmem>>, vector<8x128xf32>
    tpu.vector_store %arg9[%c56, %c0_90], %430 {strides = array<i32>} : memref<64x128xf32, #tpu.memory_space<vmem>>, vector<8x128xf32>,
    return
  }
}

</mosaic_0001>

<bundles_post_ra>
// kernel: tpu_custom_call.1
= control target key start
LH: loop header
LB: loop body
LE: loop exit
PB: predicated region body
PF: predicated region fallthrough
CT: control target
= control target key end

     0   :  { %14 = vsyncpa [#allocation4], 0  ;;  %s6823_s0 = inlined_call_operand.vmem [shape: bf16[64,16], index: 0, kind: input, shape index: {}]   ;;  %s6824_s1 = inlined_call_operand.hbm [shape: f32[8,16], index: 1, kind: input, shape index: {}]   ;;  %s6825_s2 = inlined_call_operand.vmem [shape: s32[8,1], index: 2, kind: input, shape index: {}]   ;;  %s6826_s3 = inlined_call_operand.hbm [shape: bf16[16,512], index: 3, kind: input, shape index: {}]   ;;  %s6827_s4 = inlined_call_operand.vmem [shape: f32[16,512], index: 4, kind: input, shape index: {}]   ;;  %s6828_s5 = inlined_call_operand.hbm [shape: f32[128,512], index: 5, kind: input, shape index: {}]   ;;  %s6829_s6 = inlined_call_operand.vmem [shape: f32[1,512], index: 6, kind: input, shape index: {}]   ;;  %s6830_s7 = inlined_call_operand.hbm [shape: f32[256,512], index: 7, kind: input, shape index: {}]   ;;  %s6831_s8 = inlined_call_operand.vmem [shape: f32[1,512], index: 8, kind: input, shape index: {}]   ;;  %s6832_s9 = inlined_call_operand.hbm [shape: f32[64,128], index: 9, kind: output, shape index: {}]  }
   0x1   :  { %15 = vsyncpa [#allocation7], 0 }
   0x2   :  { %16 = vsyncpa [#allocation10], 0 }
   0x3   :  { %17 = vsyncpa [#allocation5], 0  ;;  %s5402_s30 = smov [#allocation6]   ;;  %s5284_s13 = scalar_lea.hbm %s6826_s3, 512 }
   0x4   :  { %s37_s10 = sshll.u32 %s5402_s30, 4  ;;  %p5285_p0 = scmp.ne.s32.totalorder %s6826_s3, %s5284_s13  ;;  %s38_s10 = int_to_ptr.vmem [resolvable:$true] %s37_s10 }
   0x5   :  { %p5288_p1 = scmp.lt.u32.totalorder %s5284_s13, %s6826_s3 }
   0x7   :  { %p5290_p2 = pnand %p5288_p1, %p5285_p0 }
   0x9   :  { %5293 = shalt.err (!%p5290_p2)
}
   0xa   :  { %s5294_s18 = scalar_lea.vmem %s38_s10, 512  ;;  %p5299_p4 = scmp.lt.s32.totalorder %s38_s10, %s38_s10 }
   0xb   :  { %p5295_p3 = scmp.ne.s32.totalorder %s38_s10, %s5294_s18  ;;  %p5300_p5 = scmp.lt.s32.totalorder %s5294_s18, %s5294_s18 }
   0xd   :  { %p5301_p6 = por %p5300_p5, %p5299_p4 }
   0xf   :  { %p5302_p7 = pnand %p5301_p6, %p5295_p3 }
  0x11   :  { %5305 = shalt.err (!%p5302_p7)
}
  0x12   :  { %s5403_s19 = smov 256   ;;  %s5404_s20 = smov 16  }
  0x13   :  { %43 = dma.hbm_to_vmem [thread:$0]  %s6826_s3, 512, %s38_s10, [#allocation7], %s5403_s19, %s5403_s19, %s5404_s20  }
  0x14   :  { %s5405_s23 = smov [#allocation3]   ;;  %s5406_s25 = smov [#allocation8]  }
  0x15   :  { %s26_s24 = sshll.u32 %s5405_s23, 4  ;;  %s51_s26 = sshll.u32 %s5406_s25, 4  ;;  %s27_s24 = int_to_ptr.vmem [resolvable:$true] %s26_s24  ;;  %s52_s26 = int_to_ptr.vmem [resolvable:$true] %s51_s26 }
  0x16   :  { %s5306_s29 = scalar_lea.hbm %s6824_s1, 128 }
  0x17   :  { %p5307_p8 = scmp.ne.s32.totalorder %s6824_s1, %s5306_s29  ;;  %p5310_p9 = scmp.lt.u32.totalorder %s5306_s29, %s6824_s1 }
  0x19   :  { %p5312_p10 = pnand %p5310_p9, %p5307_p8 }
  0x1b   :  { %5315 = shalt.err (!%p5312_p10)
}
  0x1c   :  { %s5316_s3 = scalar_lea.vmem %s27_s24, 128  ;;  %p5321_p12 = scmp.lt.s32.totalorder %s27_s24, %s27_s24 }
  0x1d   :  { %p5317_p11 = scmp.ne.s32.totalorder %s27_s24, %s5316_s3  ;;  %p5322_p13 = scmp.lt.s32.totalorder %s5316_s3, %s5316_s3 }
  0x1f   :  { %p5323_p0 = por %p5322_p13, %p5321_p12 }
  0x21   :  { %p5324_p1 = pnand %p5323_p0, %p5317_p11 }
  0x23   :  { %5327 = shalt.err (!%p5324_p1)
}
  0x24   :  { %29 = dma.hbm_to_vmem [thread:$0]  %s6824_s1, 128, %s27_s24, [#allocation4]  }
  0x25   :  { %s5328_s17 = scalar_lea.hbm %s6828_s5, 8192 }
  0x26   :  { %p5329_p2 = scmp.ne.s32.totalorder %s6828_s5, %s5328_s17  ;;  %p5332_p3 = scmp.lt.u32.totalorder %s5328_s17, %s6828_s5 }
  0x28   :  { %p5334_p4 = pnand %p5332_p3, %p5329_p2 }
  0x2a   :  { %5337 = shalt.err (!%p5334_p4)
}
  0x2b   :  { %s5338_s22 = scalar_lea.vmem %s52_s26, 8192  ;;  %p5343_p6 = scmp.lt.s32.totalorder %s52_s26, %s52_s26 }
  0x2c   :  { %p5339_p5 = scmp.ne.s32.totalorder %s52_s26, %s5338_s22  ;;  %p5344_p7 = scmp.lt.s32.totalorder %s5338_s22, %s5338_s22 }
  0x2e   :  { %p5345_p8 = por %p5344_p7, %p5343_p6 }
  0x30   :  { %p5346_p9 = pnand %p5345_p8, %p5339_p5 }
  0x32   :  { %5349 = shalt.err (!%p5346_p9)
}
  0x33   :  { %s5407_s1 = smov 512   ;;  %s5408_s23 = smov 32  }
  0x34   :  { %57 = dma.hbm_to_vmem [thread:$0]  %s6828_s5, 8192, %s52_s26, [#allocation7], %s5407_s1, %s5407_s1, %s5408_s23  }
  0x35   :  { %s5409_s27 = smov [#allocation9]   ;;  %s5350_s11 = scalar_lea.hbm %s6830_s7, 16384 }
  0x36   :  { %s65_s28 = sshll.u32 %s5409_s27, 4  ;;  %p5351_p10 = scmp.ne.s32.totalorder %s6830_s7, %s5350_s11  ;;  %s66_s28 = int_to_ptr.vmem [resolvable:$true] %s65_s28 }
  0x37   :  { %p5354_p11 = scmp.lt.u32.totalorder %s5350_s11, %s6830_s7 }
  0x39   :  { %p5356_p12 = pnand %p5354_p11, %p5351_p10 }
  0x3b   :  { %5359 = shalt.err (!%p5356_p12)
}
  0x3c   :  { %s5360_s14 = scalar_lea.vmem %s66_s28, 16384  ;;  %p5365_p0 = scmp.lt.s32.totalorder %s66_s28, %s66_s28 }
  0x3d   :  { %p5361_p13 = scmp.ne.s32.totalorder %s66_s28, %s5360_s14  ;;  %p5366_p1 = scmp.lt.s32.totalorder %s5360_s14, %s5360_s14 }
  0x3f   :  { %p5367_p2 = por %p5366_p1, %p5365_p0 }
  0x41   :  { %p5368_p3 = pnand %p5367_p2, %p5361_p13 }
  0x43   :  { %5371 = shalt.err (!%p5368_p3)
}
  0x44   :  { %71 = dma.hbm_to_vmem [thread:$0]  %s6830_s7, 16384, %s66_s28, [#allocation10], %s5407_s1, %s5407_s1, %s5408_s23  }
  0x45   :  { %5394 = dma.done.wait [#allocation4], 128  }
  0x46   :  { %5395 = vsyncadd [#allocation4], 4294967168 }
  0x47   :  { %5396 = dma.done.wait [#allocation7], 8704  }
  0x48   :  { %5397 = vsyncadd [#allocation7], 4294958592 }
  0x49   :  { %5398 = dma.done.wait [#allocation10], 16384  }
  0x4a   :  { %5399 = vsyncadd [#allocation10], 4294950912  ;;  %v6833_v0 = vmov 0.0   ;;  %v5411_v1 = vmov 0   ;;  %v89_v2 = vld [vmem:[%s6827_s4 + $0x8] sm:$0xff]  ;;  %v91_v4 = vld [vmem:[%s6827_s4 + $0x18] sm:$0xff] }
  0x4b   :  { %186 = vmatprep.mubr.f32.mxu0 %v6833_v0  ;;  %257 = vmatprep.mubr.f32.mxu1 %v6833_v0  ;;  %v93_v3 = vld [vmem:[%s6827_s4 + $0x28] sm:$0xff]  ;;  %v95_v6 = vld [vmem:[%s6827_s4 + $0x38] sm:$0xff]  ;;  %v88_v7 = vld [vmem:[%s6827_s4] sm:$0xff]  ;;  %vm118_vm0 = vcmask 130048  }
  0x4c   :  { %4995 = vset.pattern.permute.xlu0 %v5411_v1  ;;  %5006 = vset.pattern.permute.xlu1 %v5411_v1  ;;  %v3502_v5 = vpack.c.bf16 %v93_v3, %v89_v2  ;;  %v92_v8 = vld [vmem:[%s6827_s4 + $0x20] sm:$0xff]  ;;  %v3506_v9 = vpack.c.bf16 %v95_v6, %v91_v4  ;;  %v90_v11 = vld [vmem:[%s6827_s4 + $0x10] sm:$0xff]  ;;  %v5017_v15 = vld [vmem:[#allocation6] ss:$16 sps:$4 sm:$0xff]  }
  0x4d   :  { %v3504_v10 = vpack.c.bf16 %v92_v8, %v88_v7  ;;  %v94_v12 = vld [vmem:[%s6827_s4 + $0x30] sm:$0xff]  ;;  %v87_v13 = vld [vmem:[#allocation3] sm:$0xff]  ;;  %v5019_v16 = vld [vmem:[#allocation6 + $0x4] ss:$16 sps:$4 sm:$0xff]  }
  0x4e   :  { %3503 = vmatprep.subr.bf16.mxu0 %v3502_v5  ;;  %v3508_v14 = vpack.c.bf16 %v94_v12, %v90_v11  ;;  %3507 = vmatprep.subr.bf16.mxu1 %v3506_v9  ;;  %v5020_v17 = vld [vmem:[#allocation6 + $0x8] ss:$16 sps:$4 sm:$0xff]   ;;  %v5022_v18 = vld [vmem:[#allocation6 + $0xc] ss:$16 sps:$4 sm:$0xff]   ;;  %v570_v26 = vld [vmem:[#allocation9] sm:$0xff] }
  0x4f   :  { %3505 = vmatpush1.bf16.msra.mxu0 %v3504_v10  ;;  %v5023_v19 = vld [vmem:[%s6823_s0] sm:$0xff]   ;;  %v571_v20 = vld [vmem:[#allocation9 + $0x8] sm:$0xff]  ;;  %v574_v27 = vld [vmem:[#allocation9 + $0x20] sm:$0xff] }
  0x50   :  { %3509 = vmatpush1.bf16.msra.mxu1 %v3508_v14  ;;  %328 = vmatprep.subr.bf16.mxu0 %v5019_v16  ;;  %v575_v21 = vld [vmem:[#allocation9 + $0x28] sm:$0xff]  ;;  %v573_v22 = vld [vmem:[#allocation9 + $0x18] sm:$0xff]  ;;  %v572_v28 = vld [vmem:[#allocation9 + $0x10] sm:$0xff]  ;;  %v5555_v29 = vpack.c.bf16 %v574_v27, %v570_v26 }
  0x51   :  { %401 = vmatprep.subr.bf16.mxu1 %v5022_v18  ;;  %v577_v23 = vld [vmem:[#allocation9 + $0x38] sm:$0xff]  ;;  %v5549_v24 = vpack.c.bf16 %v575_v21, %v571_v20  ;;  %v576_v30 = vld [vmem:[#allocation9 + $0x30] sm:$0xff]  ;;  %v579_v31 = vld [vmem:[#allocation9 + $0x48] sm:$0xff] }
  0x52   :  { %3428 = vmatmul.mubr.msk.f32.vlgmr.msra.gmra.mrb[0].mxu0 %vm118_vm0, %v87_v13  ;;  %v5551_v25 = vpack.c.bf16 %v577_v23, %v573_v22  ;;  %v583_v32 = vld [vmem:[#allocation9 + $0x68] sm:$0xff]  ;;  %v5024_v33 = vld [vmem:[%s6823_s0 + $0x8] sm:$0xff]   ;;  %v5562_v34 = vpack.c.bf16 %v576_v30, %v572_v28  ;;  %v581_v36 = vld [vmem:[#allocation9 + $0x58] sm:$0xff] }
  0x53   :  { %3429 = vmatmul.mubr.msk.f32.vlgmr.msra.gmra.mrb[0].mxu1 %vm118_vm0, %v87_v13  ;;  %329 = vmatpush1.bf16.msra.mxu0 %v5017_v15  ;;  %v5564_v35 = vpack.c.bf16 %v583_v32, %v579_v31  ;;  %v585_v37 = vld [vmem:[#allocation9 + $0x78] sm:$0xff]  ;;  %v578_v38 = vld [vmem:[#allocation9 + $0x40] sm:$0xff]  ;;  %v580_v41 = vld [vmem:[#allocation9 + $0x50] sm:$0xff] }
  0x54   :  { %402 = vmatpush1.bf16.msra.mxu1 %v5020_v17  ;;  %360 = vmatprep.mubr.bf16.mxu0 %v5411_v1  ;;  %v5568_v39 = vpack.c.bf16 %v585_v37, %v581_v36  ;;  %v582_v40 = vld [vmem:[#allocation9 + $0x60] sm:$0xff]  ;;  %v584_v42 = vld [vmem:[#allocation9 + $0x70] sm:$0xff]  ;;  %v587_v45 = vld [vmem:[#allocation9 + $0x88] sm:$0xff] }
  0x55   :  { %433 = vmatprep.mubr.bf16.mxu1 %v5411_v1  ;;  %3511 = vmatprep.subr.bf16.mxu0 %v5549_v24  ;;  %v5572_v43 = vpack.c.bf16 %v582_v40, %v578_v38  ;;  %v5574_v44 = vpack.c.bf16 %v584_v42, %v580_v41  ;;  %v591_v46 = vld [vmem:[#allocation9 + $0xa8] sm:$0xff]  ;;  %v589_v47 = vld [vmem:[#allocation9 + $0x98] sm:$0xff]  ;;  %v586_v49 = vld [vmem:[#allocation9 + $0x80] sm:$0xff] }
  0x56   :  { %3438 = vmatmul.mubr.msk.bf16.vlgmr.msra.gmra.mrb[4].mxu0 %vm118_vm0, %v5023_v19  ;;  %3575 = vmatprep.subr.bf16.mxu1 %v5551_v25  ;;  %v593_v48 = vld [vmem:[#allocation9 + $0xb8] sm:$0xff]  ;;  %v590_v50 = vld [vmem:[#allocation9 + $0xa0] sm:$0xff]  ;;  %v5577_v51 = vpack.c.bf16 %v591_v46, %v587_v45  ;;  %v588_v52 = vld [vmem:[#allocation9 + $0x90] sm:$0xff] }
  0x57   :  { %3442 = vmatmul.mubr.msk.bf16.vlgmr.msra.gmra.mrb[4].mxu1 %vm118_vm0, %v5023_v19  ;;  %370 = vmatprep.mubr.bf16.mxu0 %v5411_v1  ;;  %v592_v53 = vld [vmem:[#allocation9 + $0xb0] sm:$0xff]  ;;  %v595_v54 = vld [vmem:[#allocation9 + $0xc8] sm:$0xff]  ;;  %v5580_v55 = vpack.c.bf16 %v593_v48, %v589_v47  ;;  %v5582_v56 = vpack.c.bf16 %v590_v50, %v586_v49  ;;  %v597_v58 = vld [vmem:[#allocation9 + $0xd8] sm:$0xff] }
  0x58   :  { %443 = vmatprep.mubr.bf16.mxu1 %v5411_v1  ;;  %3513 = vmatpush1.bf16.msra.mxu0 %v5555_v29  ;;  %v599_v57 = vld [vmem:[#allocation9 + $0xe8] sm:$0xff]  ;;  %v601_v59 = vld [vmem:[#allocation9 + $0xf8] sm:$0xff]  ;;  %v5586_v60 = vpack.c.bf16 %v592_v53, %v588_v52  ;;  %v594_v62 = vld [vmem:[#allocation9 + $0xc0] sm:$0xff] }
  0x59   :  { %3577 = vmatpush1.bf16.msra.mxu1 %v5562_v34  ;;  %3515 = vmatprep.subr.bf16.mxu0 %v5564_v35  ;;  %7002 = vst [vmem:[#allocation16_spill] sm:$0xff] %v5582_v56  ;;  %v5588_v61 = vpack.c.bf16 %v599_v57, %v595_v54  ;;  %v598_v63 = vld [vmem:[#allocation9 + $0xe0] sm:$0xff]  ;;  %v5592_v2 = vpack.c.bf16 %v601_v59, %v597_v58  ;;  %v596_v3 = vld [vmem:[#allocation9 + $0xd0] sm:$0xff]  ;;  %v5025_v6 = vld [vmem:[%s6823_s0 + $0x10] sm:$0xff]  }
  0x5a   :  { %3579 = vmatprep.subr.bf16.mxu1 %v5568_v39  ;;  %7003 = vst [vmem:[#allocation17_spill] sm:$0xff] %v5586_v60  ;;  %v600_v4 = vld [vmem:[#allocation9 + $0xf0] sm:$0xff]  ;;  %v5598_v5 = vpack.c.bf16 %v598_v63, %v594_v62  ;;  %v603_v9 = vld [vmem:[#allocation9 + $0x108] sm:$0xff]  ;;  %v605_v11 = vld [vmem:[#allocation9 + $0x118] sm:$0xff] }
  0x5b   :  { %7004 = vst [vmem:[#allocation18_spill] sm:$0xff] %v5588_v61  ;;  %7005 = vst [vmem:[#allocation19_spill] sm:$0xff] %v5592_v2  ;;  %v5605_v7 = vpack.c.bf16 %v600_v4, %v596_v3  ;;  %v5026_v8 = vld [vmem:[%s6823_s0 + $0x18] sm:$0xff]   ;;  %v607_v10 = vld [vmem:[#allocation9 + $0x128] sm:$0xff] }
  0x5c   :  { %3517 = vmatpush1.bf16.msra.mxu0 %v5572_v43  ;;  %7006 = vst [vmem:[#allocation20_spill] sm:$0xff] %v5598_v5  ;;  %v5621_v12 = vpack.c.bf16 %v607_v10, %v603_v9  ;;  %v609_v13 = vld [vmem:[#allocation9 + $0x138] sm:$0xff]  ;;  %v602_v14 = vld [vmem:[#allocation9 + $0x100] sm:$0xff]  ;;  %v604_v16 = vld [vmem:[#allocation9 + $0x110] sm:$0xff] }
  0x5d   :  { %3581 = vmatpush1.bf16.msra.mxu1 %v5574_v44  ;;  %3519 = vmatprep.subr.bf16.mxu0 %v5577_v51  ;;  %7007 = vst [vmem:[#allocation21_spill] sm:$0xff] %v5605_v7  ;;  %v606_v15 = vld [vmem:[#allocation9 + $0x120] sm:$0xff]  ;;  %v608_v17 = vld [vmem:[#allocation9 + $0x130] sm:$0xff]  ;;  %v611_v20 = vld [vmem:[#allocation9 + $0x148] sm:$0xff] }
  0x5e   :  { %3439 = vmatmul.mubr.msk.bf16.gmra.mrb[8].mxu0 %vm118_vm0, %v5024_v33  ;;  %3583 = vmatprep.subr.bf16.mxu1 %v5580_v55  ;;  %7008 = vst [vmem:[#allocation22_spill] sm:$0xff] %v5621_v12  ;;  %v5626_v18 = vpack.c.bf16 %v606_v15, %v602_v14  ;;  %v5628_v19 = vpack.c.bf16 %v608_v17, %v604_v16  ;;  %v615_v21 = vld [vmem:[#allocation9 + $0x168] sm:$0xff]  ;;  %v613_v22 = vld [vmem:[#allocation9 + $0x158] sm:$0xff]  ;;  %v610_v27 = vld [vmem:[#allocation9 + $0x140] sm:$0xff] }
  0x5f   :  { %3443 = vmatmul.mubr.msk.bf16.gmra.mrb[8].mxu1 %vm118_vm0, %v5024_v33  ;;  %380 = vmatprep.mubr.bf16.mxu0 %v5411_v1  ;;  %v5633_v23 = vpack.c.bf16 %v615_v21, %v611_v20  ;;  %v617_v26 = vld [vmem:[#allocation9 + $0x178] sm:$0xff]  ;;  %v614_v28 = vld [vmem:[#allocation9 + $0x160] sm:$0xff]  ;;  %v612_v32 = vld [vmem:[#allocation9 + $0x150] sm:$0xff] }
  0x60   :  { %453 = vmatprep.mubr.bf16.mxu1 %v5411_v1  ;;  %3521 = vmatpush1.bf16.msra.mxu0 %v5582_v56  ;;  %7010 = vst [vmem:[#allocation24_spill] sm:$0xff] %v5626_v18  ;;  %7011 = vst [vmem:[#allocation25_spill] sm:$0xff] %v5628_v19  ;;  %v5635_v30 = vpack.c.bf16 %v617_v26, %v613_v22  ;;  %v5637_v31 = vpack.c.bf16 %v614_v28, %v610_v27  ;;  %v616_v33 = vld [vmem:[#allocation9 + $0x170] sm:$0xff]  ;;  %v619_v37 = vld [vmem:[#allocation9 + $0x188] sm:$0xff] }
  0x61   :  { %3585 = vmatpush1.bf16.msra.mxu1 %v5586_v60  ;;  %3523 = vmatprep.subr.bf16.mxu0 %v5588_v61  ;;  %7012 = vst [vmem:[#allocation26_spill] sm:$0xff] %v5633_v23  ;;  %v5640_v36 = vpack.c.bf16 %v616_v33, %v612_v32  ;;  %v623_v38 = vld [vmem:[#allocation9 + $0x1a8] sm:$0xff]  ;;  %v621_v40 = vld [vmem:[#allocation9 + $0x198] sm:$0xff]  ;;  %v618_v45 = vld [vmem:[#allocation9 + $0x180] sm:$0xff] }
  0x62   :  { %3587 = vmatprep.subr.bf16.mxu1 %v5592_v2  ;;  %7013 = vst [vmem:[#allocation27_spill] sm:$0xff] %v5635_v30  ;;  %7014 = vst [vmem:[#allocation28_spill] sm:$0xff] %v5637_v31  ;;  %v5645_v41 = vpack.c.bf16 %v623_v38, %v619_v37  ;;  %v625_v42 = vld [vmem:[#allocation9 + $0x1b8] sm:$0xff]  ;;  %v622_v46 = vld [vmem:[#allocation9 + $0x1a0] sm:$0xff] }
  0x63   :  { %7015 = vst [vmem:[#allocation29_spill] sm:$0xff] %v5640_v36  ;;  %v5647_v47 = vpack.c.bf16 %v625_v42, %v621_v40  ;;  %v5649_v48 = vpack.c.bf16 %v622_v46, %v618_v45  ;;  %v620_v49 = vld [vmem:[#allocation9 + $0x190] sm:$0xff]  ;;  %v627_v53 = vld [vmem:[#allocation9 + $0x1c8] sm:$0xff]  ;;  %v629_v57 = vld [vmem:[#allocation9 + $0x1d8] sm:$0xff] }
  0x64   :  { %3525 = vmatpush1.bf16.msra.mxu0 %v5598_v5  ;;  %7016 = vst [vmem:[#allocation30_spill] sm:$0xff] %v5645_v41  ;;  %v624_v50 = vld [vmem:[#allocation9 + $0x1b0] sm:$0xff]  ;;  %v631_v54 = vld [vmem:[#allocation9 + $0x1e8] sm:$0xff]  ;;  %v633_v59 = vld [vmem:[#allocation9 + $0x1f8] sm:$0xff] }
  0x65   :  { %3589 = vmatpush1.bf16.msra.mxu1 %v5605_v7  ;;  %3527 = vmatprep.subr.bf16.mxu0 %v5621_v12  ;;  %7017 = vst [vmem:[#allocation31_spill] sm:$0xff] %v5647_v47  ;;  %7018 = vst [vmem:[#allocation32_spill] sm:$0xff] %v5649_v48  ;;  %v5652_v52 = vpack.c.bf16 %v624_v50, %v620_v49  ;;  %v5657_v58 = vpack.c.bf16 %v631_v54, %v627_v53  ;;  %v626_v62 = vld [vmem:[#allocation9 + $0x1c0] sm:$0xff]  ;;  %v635_v10 = vld [vmem:[#allocation9 + $0x208] sm:$0xff] }
  0x66   :  { %3440 = vmatmul.mubr.msk.bf16.gmra.mrb[12].mxu0 %vm118_vm0, %v5025_v6  ;;  %v630_v63 = vld [vmem:[#allocation9 + $0x1e0] sm:$0xff]  ;;  %v5659_v3 = vpack.c.bf16 %v633_v59, %v629_v57  ;;  %v641_v15 = vld [vmem:[#allocation9 + $0x238] sm:$0xff]  ;;  %v636_v22 = vld [vmem:[#allocation9 + $0x210] sm:$0xff] }
  0x67   :  { %3444 = vmatmul.mubr.msk.bf16.gmra.mrb[12].mxu1 %vm118_vm0, %v5025_v6  ;;  %390 = vmatprep.mubr.bf16.mxu0 %v5411_v1  ;;  %7019 = vst [vmem:[#allocation33_spill] sm:$0xff] %v5652_v52  ;;  %7020 = vst [vmem:[#allocation34_spill] sm:$0xff] %v5657_v58  ;;  %v5661_v4 = vpack.c.bf16 %v630_v63, %v626_v62  ;;  %v628_v6 = vld [vmem:[#allocation9 + $0x1d0] sm:$0xff]  ;;  %v634_v16 = vld [vmem:[#allocation9 + $0x200] sm:$0xff] }
  0x68   :  { %463 = vmatprep.mubr.bf16.mxu1 %v5411_v1  ;;  %v5623_v1 = vpack.c.bf16 %v609_v13, %v605_v11  ;;  %3529 = vmatpush1.bf16.msra.mxu0 %v5626_v18  ;;  %7021 = vst [vmem:[#allocation35_spill] sm:$0xff] %v5659_v3  ;;  %v639_v11 = vld [vmem:[#allocation9 + $0x228] sm:$0xff]  ;;  %v637_v13 = vld [vmem:[#allocation9 + $0x218] sm:$0xff]  ;;  %v638_v17 = vld [vmem:[#allocation9 + $0x220] sm:$0xff] }
  0x69   :  { %3531 = vmatprep.subr.bf16.mxu0 %v5633_v23  ;;  %7022 = vst [vmem:[#allocation36_spill] sm:$0xff] %v5661_v4  ;;  %v5669_v14 = vpack.c.bf16 %v639_v11, %v635_v10  ;;  %v5671_v20 = vpack.c.bf16 %v641_v15, %v637_v13  ;;  %v5673_v21 = vpack.c.bf16 %v638_v17, %v634_v16  ;;  %v640_v26 = vld [vmem:[#allocation9 + $0x230] sm:$0xff]  ;;  %v643_v28 = vld [vmem:[#allocation9 + $0x248] sm:$0xff]  ;;  %v645_v33 = vld [vmem:[#allocation9 + $0x258] sm:$0xff] }
  0x6a   :  { %7009 = vst [vmem:[#allocation23_spill] sm:$0xff] %v5623_v1  ;;  %3591 = vmatprep.subr.bf16.mxu1 %v5623_v1  ;;  %v5676_v27 = vpack.c.bf16 %v640_v26, %v636_v22  ;;  %v647_v32 = vld [vmem:[#allocation9 + $0x268] sm:$0xff]  ;;  %v649_v38 = vld [vmem:[#allocation9 + $0x278] sm:$0xff]  ;;  %v642_v40 = vld [vmem:[#allocation9 + $0x240] sm:$0xff] }
  0x6b   :  { %3593 = vmatpush1.bf16.msra.mxu1 %v5628_v19  ;;  %7024 = vst [vmem:[#allocation38_spill] sm:$0xff] %v5669_v14  ;;  %7025 = vst [vmem:[#allocation39_spill] sm:$0xff] %v5671_v20  ;;  %v5681_v37 = vpack.c.bf16 %v647_v32, %v643_v28  ;;  %v646_v42 = vld [vmem:[#allocation9 + $0x260] sm:$0xff]  ;;  %v5683_v45 = vpack.c.bf16 %v649_v38, %v645_v33  ;;  %v644_v49 = vld [vmem:[#allocation9 + $0x250] sm:$0xff] }
  0x6c   :  { %3595 = vmatprep.subr.bf16.mxu1 %v5635_v30  ;;  %3533 = vmatpush1.bf16.msra.mxu0 %v5637_v31  ;;  %7026 = vst [vmem:[#allocation40_spill] sm:$0xff] %v5673_v21  ;;  %7027 = vst [vmem:[#allocation41_spill] sm:$0xff] %v5676_v27  ;;  %v5685_v46 = vpack.c.bf16 %v646_v42, %v642_v40  ;;  %v648_v50 = vld [vmem:[#allocation9 + $0x270] sm:$0xff]  ;;  %v651_v54 = vld [vmem:[#allocation9 + $0x288] sm:$0xff] }
  0x6d   :  { %3535 = vmatprep.subr.bf16.mxu0 %v5645_v41  ;;  %7028 = vst [vmem:[#allocation42_spill] sm:$0xff] %v5681_v37  ;;  %7029 = vst [vmem:[#allocation43_spill] sm:$0xff] %v5683_v45  ;;  %v5688_v53 = vpack.c.bf16 %v648_v50, %v644_v49  ;;  %v655_v57 = vld [vmem:[#allocation9 + $0x2a8] sm:$0xff]  ;;  %v653_v59 = vld [vmem:[#allocation9 + $0x298] sm:$0xff] }
  0x6e   :  { %3441 = vmatmul.mubr.msk.bf16.gmra.mrb[16].mxu0 %vm118_vm0, %v5026_v8  ;;  %7030 = vst [vmem:[#allocation44_spill] sm:$0xff] %v5685_v46  ;;  %v5693_v62 = vpack.c.bf16 %v655_v57, %v651_v54  ;;  %v657_v63 = vld [vmem:[#allocation9 + $0x2b8] sm:$0xff]  ;;  %v652_v13 = vld [vmem:[#allocation9 + $0x290] sm:$0xff]  ;;  %v659_v17 = vld [vmem:[#allocation9 + $0x2c8] sm:$0xff] }
  0x6f   :  { %3445 = vmatmul.mubr.msk.bf16.gmra.mrb[16].mxu1 %vm118_vm0, %v5026_v8  ;;  %813 = vmatprep.mubr.f32.mxu0 %v6833_v0  ;;  %v632_v8 = vld [vmem:[#allocation9 + $0x1f0] sm:$0xff]  ;;  %7031 = vst [vmem:[#allocation45_spill] sm:$0xff] %v5688_v53  ;;  %v5695_v10 = vpack.c.bf16 %v657_v63, %v653_v59  ;;  %v663_v22 = vld [vmem:[#allocation9 + $0x2e8] sm:$0xff]  ;;  %v661_v26 = vld [vmem:[#allocation9 + $0x2d8] sm:$0xff] }
  0x70   :  { %884 = vmatprep.mubr.f32.mxu1 %v6833_v0  ;;  %3597 = vmatpush1.bf16.msra.mxu1 %v5640_v36  ;;  %v5664_v9 = vpack.c.bf16 %v632_v8, %v628_v6  ;;  %7032 = vst [vmem:[#allocation46_spill] sm:$0xff] %v5693_v62  ;;  %v650_v6 = vld [vmem:[#allocation9 + $0x280] sm:$0xff]  ;;  %v656_v15 = vld [vmem:[#allocation9 + $0x2b0] sm:$0xff]  ;;  %v5705_v28 = vpack.c.bf16 %v663_v22, %v659_v17  ;;  %v665_v32 = vld [vmem:[#allocation9 + $0x2f8] sm:$0xff] }
  0x71   :  { %3599 = vmatprep.subr.bf16.mxu1 %v5647_v47  ;;  %3537 = vmatpush1.bf16.msra.mxu0 %v5649_v48  ;;  %v654_v8 = vld [vmem:[#allocation9 + $0x2a0] sm:$0xff]  ;;  %7033 = vst [vmem:[#allocation47_spill] sm:$0xff] %v5695_v10  ;;  %v5700_v16 = vpack.c.bf16 %v656_v15, %v652_v13  ;;  %v5707_v40 = vpack.c.bf16 %v665_v32, %v661_v26  ;;  %v660_v49 = vld [vmem:[#allocation9 + $0x2d0] sm:$0xff]  ;;  %v667_v57 = vld [vmem:[#allocation9 + $0x308] sm:$0xff] }
  0x72   :  { %3539 = vmatprep.subr.bf16.mxu0 %v5657_v58  ;;  %7023 = vst [vmem:[#allocation37_spill] sm:$0xff] %v5664_v9  ;;  %v5697_v11 = vpack.c.bf16 %v654_v8, %v650_v6  ;;  %7036 = vst [vmem:[#allocation50_spill] sm:$0xff] %v5705_v28  ;;  %v658_v33 = vld [vmem:[#allocation9 + $0x2c0] sm:$0xff]  ;;  %v664_v50 = vld [vmem:[#allocation9 + $0x2f0] sm:$0xff] }
  0x73   :  { %7035 = vst [vmem:[#allocation49_spill] sm:$0xff] %v5700_v16  ;;  %v662_v38 = vld [vmem:[#allocation9 + $0x2e0] sm:$0xff]  ;;  %7037 = vst [vmem:[#allocation51_spill] sm:$0xff] %v5707_v40  ;;  %v5712_v54 = vpack.c.bf16 %v664_v50, %v660_v49  ;;  %v671_v59 = vld [vmem:[#allocation9 + $0x328] sm:$0xff] }
  0x74   :  { %3601 = vmatpush1.bf16.msra.mxu1 %v5652_v52  ;;  %7034 = vst [vmem:[#allocation48_spill] sm:$0xff] %v5697_v11  ;;  %v5709_v42 = vpack.c.bf16 %v662_v38, %v658_v33  ;;  %v669_v63 = vld [vmem:[#allocation9 + $0x318] sm:$0xff]  ;;  %v5717_v6 = vpack.c.bf16 %v671_v59, %v667_v57  ;;  %v666_v13 = vld [vmem:[#allocation9 + $0x300] sm:$0xff]  ;;  %v668_v26 = vld [vmem:[#allocation9 + $0x310] sm:$0xff] }
  0x75   :  { %3603 = vmatprep.subr.bf16.mxu1 %v5659_v3  ;;  %3541 = vmatpush1.bf16.msra.mxu0 %v5661_v4  ;;  %7039 = vst [vmem:[#allocation53_spill] sm:$0xff] %v5712_v54  ;;  %v673_v8 = vld [vmem:[#allocation9 + $0x338] sm:$0xff]  ;;  %v670_v15 = vld [vmem:[#allocation9 + $0x320] sm:$0xff]  ;;  %v672_v32 = vld [vmem:[#allocation9 + $0x330] sm:$0xff] }
  0x76   :  { %3543 = vmatprep.subr.bf16.mxu0 %v5669_v14  ;;  %7038 = vst [vmem:[#allocation52_spill] sm:$0xff] %v5709_v42  ;;  %7040 = vst [vmem:[#allocation54_spill] sm:$0xff] %v5717_v6  ;;  %v5719_v17 = vpack.c.bf16 %v673_v8, %v669_v63  ;;  %v5721_v22 = vpack.c.bf16 %v670_v15, %v666_v13  ;;  %v5724_v33 = vpack.c.bf16 %v672_v32, %v668_v26  ;;  %v675_v38 = vld [vmem:[#allocation9 + $0x348] sm:$0xff]  ;;  %v677_v50 = vld [vmem:[#allocation9 + $0x358] sm:$0xff] }
  0x77   :  { %v679_v49 = vld [vmem:[#allocation9 + $0x368] sm:$0xff]  ;;  %v681_v59 = vld [vmem:[#allocation9 + $0x378] sm:$0xff]  ;;  %v674_v63 = vld [vmem:[#allocation9 + $0x340] sm:$0xff] }
  0x78   :  { %3605 = vmatpush1.bf16.msra.mxu1 %v5664_v9  ;;  %7041 = vst [vmem:[#allocation55_spill] sm:$0xff] %v5719_v17  ;;  %7042 = vst [vmem:[#allocation56_spill] sm:$0xff] %v5721_v22  ;;  %v5729_v57 = vpack.c.bf16 %v679_v49, %v675_v38  ;;  %v678_v8 = vld [vmem:[#allocation9 + $0x360] sm:$0xff]  ;;  %v5731_v13 = vpack.c.bf16 %v681_v59, %v677_v50  ;;  %v676_v26 = vld [vmem:[#allocation9 + $0x350] sm:$0xff] }
  0x79   :  { %3607 = vmatprep.subr.bf16.mxu1 %v5671_v20  ;;  %3545 = vmatpush1.bf16.msra.mxu0 %v5673_v21  ;;  %7043 = vst [vmem:[#allocation57_spill] sm:$0xff] %v5724_v33  ;;  %v5733_v15 = vpack.c.bf16 %v678_v8, %v674_v63  ;;  %v680_v32 = vld [vmem:[#allocation9 + $0x370] sm:$0xff]  ;;  %v683_v0 = vld [vmem:[#allocation9 + $0x388] sm:$0xff]  ;;  %v682_v50 = vld [vmem:[#allocation9 + $0x380] sm:$0xff] }
  0x7a   :  { %3547 = vmatprep.subr.bf16.mxu0 %v5681_v37  ;;  %7044 = vst [vmem:[#allocation58_spill] sm:$0xff] %v5729_v57  ;;  %7045 = vst [vmem:[#allocation59_spill] sm:$0xff] %v5731_v13  ;;  %v686_v59 = vld [vmem:[#allocation9 + $0x3a0] sm:$0xff]  ;;  %v684_v63 = vld [vmem:[#allocation9 + $0x390] sm:$0xff] }
  0x7b   :  { %7046 = vst [vmem:[#allocation60_spill] sm:$0xff] %v5733_v15  ;;  %v5745_v8 = vpack.c.bf16 %v686_v59, %v682_v50  ;;  %v696_v50 = vld [vmem:[#allocation9 + $0x3f0] sm:$0xff]  ;;  %v507_v59 = vld [vmem:[#allocation8 + $0x8] sm:$0xff] }
  0x7c   :  { %3609 = vmatpush1.bf16.msra.mxu1 %v5676_v27 }
  0x7d   :  { %3611 = vmatprep.subr.bf16.mxu1 %v5683_v45  ;;  %3549 = vmatpush1.bf16.msra.mxu0 %v5685_v46  ;;  %7050 = vst [vmem:[#allocation64_spill] sm:$0xff] %v5745_v8 }
  0x7e   :  { %3551 = vmatprep.subr.bf16.mxu0 %v5693_v62  ;;  %v529_v62 = vld [vmem:[#allocation8 + $0xb8] sm:$0xff] }
  0x80   :  { %3613 = vmatpush1.bf16.msra.mxu1 %v5688_v53 }
  0x81   :  { %3615 = vmatprep.subr.bf16.mxu1 %v5695_v10  ;;  %3553 = vmatpush1.bf16.msra.mxu0 %v5697_v11  ;;  %v527_v11 = vld [vmem:[#allocation8 + $0xa8] sm:$0xff]  ;;  %v525_v10 = vld [vmem:[#allocation8 + $0x98] sm:$0xff] }
  0x82   :  { %3555 = vmatprep.subr.bf16.mxu0 %v5705_v28 }
  0x84   :  { %3617 = vmatpush1.bf16.msra.mxu1 %v5700_v16 }
  0x85   :  { %3619 = vmatprep.subr.bf16.mxu1 %v5707_v40  ;;  %3557 = vmatpush1.bf16.msra.mxu0 %v5709_v42  ;;  %v511_v42 = vld [vmem:[#allocation8 + $0x28] sm:$0xff]  ;;  %v509_v40 = vld [vmem:[#allocation8 + $0x18] sm:$0xff] }
  0x86   :  { %3559 = vmatprep.subr.bf16.mxu0 %v5717_v6  ;;  %v687_v6 = vld [vmem:[#allocation9 + $0x3a8] sm:$0xff] }
  0x87   :  { %v5739_v38 = vpack.c.bf16 %v687_v6, %v683_v0  ;;  %v693_v6 = vld [vmem:[#allocation9 + $0x3d8] sm:$0xff] }
  0x88   :  { %3621 = vmatpush1.bf16.msra.mxu1 %v5712_v54  ;;  %v689_v54 = vld [vmem:[#allocation9 + $0x3b8] sm:$0xff] }
  0x89   :  { %3623 = vmatprep.subr.bf16.mxu1 %v5719_v17  ;;  %3561 = vmatpush1.bf16.msra.mxu0 %v5721_v22  ;;  %v5736_v17 = vpack.c.bf16 %v680_v32, %v676_v26  ;;  %v685_v22 = vld [vmem:[#allocation9 + $0x398] sm:$0xff]  ;;  %7048 = vst [vmem:[#allocation62_spill] sm:$0xff] %v5739_v38  ;;  %v688_v26 = vld [vmem:[#allocation9 + $0x3b0] sm:$0xff]  ;;  %v691_v32 = vld [vmem:[#allocation9 + $0x3c8] sm:$0xff] }
  0x8a   :  { %3563 = vmatprep.subr.bf16.mxu0 %v5729_v57  ;;  %v5741_v49 = vpack.c.bf16 %v689_v54, %v685_v22  ;;  %v695_v57 = vld [vmem:[#allocation9 + $0x3e8] sm:$0xff]  ;;  %v5749_v0 = vpack.c.bf16 %v688_v26, %v684_v63  ;;  %v697_v22 = vld [vmem:[#allocation9 + $0x3f8] sm:$0xff]  ;;  %v5763_v26 = vpack.c.bf16 %v511_v42, %v507_v59  ;;  %v7059_v42 = vmov 0.0  }
  0x8b   :  { %7047 = vst [vmem:[#allocation61_spill] sm:$0xff] %v5736_v17  ;;  %v5751_v54 = vpack.c.bf16 %v695_v57, %v691_v32  ;;  %v513_v57 = vld [vmem:[#allocation8 + $0x38] sm:$0xff] }
  0x8c   :  { %3625 = vmatpush1.bf16.msra.mxu1 %v5724_v33  ;;  %7049 = vst [vmem:[#allocation63_spill] sm:$0xff] %v5741_v49  ;;  %7051 = vst [vmem:[#allocation65_spill] sm:$0xff] %v5749_v0  ;;  %v5753_v33 = vpack.c.bf16 %v697_v22, %v693_v6  ;;  %v5765_v32 = vpack.c.bf16 %v513_v57, %v509_v40  ;;  %v98_v6 = vlaneseq }
  0x8d   :  { %3627 = vmatprep.subr.bf16.mxu1 %v5731_v13  ;;  %3565 = vmatpush1.bf16.msra.mxu0 %v5733_v15  ;;  %7052 = vst [vmem:[#allocation66_spill] sm:$0xff] %v5751_v54  ;;  %v690_v13 = vld [vmem:[#allocation9 + $0x3c0] sm:$0xff]  ;;  %7056 = vst [vmem:[#allocation70_spill] sm:$0xff] %v5763_v26 }
  0x8e   :  { %3567 = vmatprep.subr.bf16.mxu0 %v5739_v38  ;;  %7053 = vst [vmem:[#allocation67_spill] sm:$0xff] %v5753_v33  ;;  %v694_v15 = vld [vmem:[#allocation9 + $0x3e0] sm:$0xff]  ;;  %7057 = vst [vmem:[#allocation71_spill] sm:$0xff] %v5765_v32  ;;  %v5780_v22 = vshrl.u32 %v98_v6, 7 }
  0x90   :  { %3629 = vmatpush1.bf16.msra.mxu1 %v5736_v17  ;;  %v692_v17 = vld [vmem:[#allocation9 + $0x3d0] sm:$0xff]  ;;  %7060 = vst [vmem:[#allocation73_spill] sm:$0xff] %v5780_v22  ;;  %v6880_v59 = vsub.s32 0, %v5780_v22  ;;  %v6883_v57 = vsub.s32 3, %v5780_v22 }
  0x91   :  { %3631 = vmatprep.subr.bf16.mxu1 %v5741_v49  ;;  %3569 = vmatpush1.bf16.msra.mxu0 %v5745_v8  ;;  %v5757_v49 = vpack.c.bf16 %v694_v15, %v690_v13  ;;  %v5759_v63 = vpack.c.bf16 %v696_v50, %v692_v17  ;;  %v5774_v17 = vld [vmem:[%s6825_s2] sm:$0xff]  ;;  %v6877_v50 = vsub.s32 2, %v5780_v22 }
  0x92   :  { %3571 = vmatprep.subr.bf16.mxu0 %v5751_v54  ;;  %7058 = vst [vmem:[#allocation72_spill] sm:$0xff] %v5774_v17  ;;  %vm915_vm1 = vcmp.gt.s32.totalorder %v5774_v17, 0  ;;  %vm1268_vm2 = vcmp.gt.s32.totalorder %v5774_v17, 1  ;;  %v6888_v17 = vsub.s32 1, %v5780_v22 }
  0x93   :  { %7054 = vst [vmem:[#allocation68_spill] sm:$0xff] %v5757_v49  ;;  %7055 = vst [vmem:[#allocation69_spill] sm:$0xff] %v5759_v63  ;;  %v3452_v40 = vsel %vm915_vm1, 1.0, %v7059_v42  ;;  %v3459_v13 = vsel %vm1268_vm2, 1.0, %v7059_v42 }
  0x94   :  { %3633 = vmatpush1.bf16.msra.mxu1 %v5749_v0  ;;  %v4996_v15 = vpack.i.bf16 %v3459_v13, %v3452_v40 }
  0x95   :  { %3635 = vmatprep.subr.bf16.mxu1 %v5753_v33  ;;  %3573 = vmatpush1.bf16.msra.mxu0 %v5757_v49 }
  0x96   :  { %3639 = vmatprep.subr.bf16.mxu0 %v5763_v26  ;;  %4997 = vperm.xlu0 %4995, %v4996_v15  }
  0x98   :  { %3637 = vmatpush1.bf16.msra.mxu1 %v5759_v63 }
  0x99   :  { %3671 = vmatprep.subr.bf16.mxu1 %v5765_v32  ;;  %v96_v32 = vld [vmem:[%s6829_s6] sm:$0xf] }
  0x9a   :  { %v109_v26 = vrot.slane %v96_v32, %v6877_v50  ;;  %v101_v40 = vrot.slane %v96_v32, %v6880_v59  ;;  %v113_v13 = vrot.slane %v96_v32, %v6883_v57  ;;  %v105_v6 = vrot.slane %v96_v32, %v6888_v17 }
 0x125   :  { %v188_v15 = vpop.f32.mrb[0].mxu0 }
 0x126   :  { %v190_v63 = vpop.f32.mrb[1].mxu0  ;;  %v259_v49 = vpop.f32.mrb[0].mxu1  ;;  %v5799_v0 = vadd.f32 %v188_v15, %v101_v40 }
 0x127   :  { %v5797_v33 = vadd.f32 %v259_v49, %v109_v26  ;;  %v261_v54 = vpop.f32.mrb[1].mxu1  ;;  %v5803_v50 = vadd.f32 %v190_v63, %v105_v6 }
 0x128   :  { %v5801_v8 = vadd.f32 %v261_v54, %v113_v13 }
 0x129   :  { %v362_v38 = vpop.f32.mrb[4].mxu0 }
 0x12a   :  { %v363_v59 = vadd.f32 %v362_v38, %v5799_v0  ;;  %v364_v28 = vpop.f32.mrb[5].mxu0  ;;  %v435_v57 = vpop.f32.mrb[4].mxu1 }
 0x12b   :  { %v365_v16 = vadd.f32 %v364_v28, %v5803_v50  ;;  %v366_v22 = vpop.f32.mrb[6].mxu0  ;;  %v436_v32 = vadd.f32 %v435_v57, %v5797_v33  ;;  %v437_v17 = vpop.f32.mrb[5].mxu1 }
 0x12c   :  { %v3446_v49 = vmul.f32 -1.442695, %v363_v59  ;;  %v5809_v26 = vadd.f32 %v366_v22, %v5799_v0  ;;  %v368_v40 = vpop.f32.mrb[7].mxu0  ;;  %v438_v54 = vadd.f32 %v437_v17, %v5801_v8  ;;  %v439_v63 = vpop.f32.mrb[6].mxu1 }
 0x12d   :  { %v3447_v13 = vmul.f32 -1.442695, %v365_v16  ;;  %v5813_v15 = vadd.f32 %v368_v40, %v5803_v50  ;;  %v5816_v38 = vadd.f32 %v439_v63, %v5797_v33  ;;  %v441_v28 = vpop.f32.mrb[7].mxu1 }
 0x12e   :  { %7061 = vst [vmem:[#allocation74_spill] sm:$0xff] %v5809_v26  ;;  %5027 = vpow2.f32 %v3446_v49  ;;  %v5819_v57 = vadd.f32 %v441_v28, %v5801_v8 }
 0x12f   :  { %7062 = vst [vmem:[#allocation75_spill] sm:$0xff] %v5813_v15  ;;  %7063 = vst [vmem:[#allocation76_spill] sm:$0xff] %v5816_v38  ;;  %5029 = vpow2.f32 %v3447_v13 }
 0x130   :  { %7064 = vst [vmem:[#allocation77_spill] sm:$0xff] %v5819_v57 }
 0x131   :  { %v372_v59 = vpop.f32.mrb[8].mxu0 }
 0x132   :  { %v5822_v22 = vadd.f32 %v372_v59, %v5799_v0  ;;  %v374_v6 = vpop.f32.mrb[9].mxu0  ;;  %v445_v17 = vpop.f32.mrb[8].mxu1  ;;  %v3448_v59 = vmul.f32 -1.442695, %v436_v32 }
 0x133   :  { %v5825_v16 = vadd.f32 %v374_v6, %v5803_v50  ;;  %v376_v40 = vpop.f32.mrb[10].mxu0  ;;  %v5828_v15 = vadd.f32 %v445_v17, %v5797_v33  ;;  %v447_v63 = vpop.f32.mrb[9].mxu1 }
 0x134   :  { %7065 = vst [vmem:[#allocation78_spill] sm:$0xff] %v5822_v22  ;;  %v5831_v49 = vadd.f32 %v376_v40, %v5799_v0  ;;  %v378_v28 = vpop.f32.mrb[11].mxu0  ;;  %v5834_v13 = vadd.f32 %v447_v63, %v5801_v8  ;;  %v449_v57 = vpop.f32.mrb[10].mxu1  ;;  %5031 = vpow2.f32 %v3448_v59 }
 0x135   :  { %7066 = vst [vmem:[#allocation79_spill] sm:$0xff] %v5825_v16  ;;  %7067 = vst [vmem:[#allocation80_spill] sm:$0xff] %v5828_v15  ;;  %v5837_v22 = vadd.f32 %v378_v28, %v5803_v50  ;;  %v5840_v6 = vadd.f32 %v449_v57, %v5797_v33  ;;  %v451_v16 = vpop.f32.mrb[11].mxu1  ;;  %5033 = vtanh.f32 %v438_v54 }
 0x136   :  { %7068 = vst [vmem:[#allocation81_spill] sm:$0xff] %v5831_v49  ;;  %7069 = vst [vmem:[#allocation82_spill] sm:$0xff] %v5834_v13  ;;  %v5843_v17 = vadd.f32 %v451_v16, %v5801_v8 }
 0x137   :  { %7070 = vst [vmem:[#allocation83_spill] sm:$0xff] %v5837_v22  ;;  %7071 = vst [vmem:[#allocation84_spill] sm:$0xff] %v5840_v6 }
 0x138   :  { %7072 = vst [vmem:[#allocation85_spill] sm:$0xff] %v5843_v17  ;;  %v5028_v15 = vpop.eup %5027 }
 0x139   :  { %v5030_v38 = vpop.eup %5029  ;;  %v713_v40 = vadd.f32 1.0, %v5028_v15  ;;  %v382_v49 = vpop.f32.mrb[12].mxu0 }
 0x13a   :  { %v714_v26 = vadd.f32 1.0, %v5030_v38  ;;  %v5846_v63 = vadd.f32 %v382_v49, %v5799_v0  ;;  %v455_v32 = vpop.f32.mrb[12].mxu1  ;;  %v384_v28 = vpop.f32.mrb[13].mxu0 }
 0x13b   :  { %5035 = vrcp.f32 %v713_v40  ;;  %v5849_v57 = vadd.f32 %v455_v32, %v5797_v33  ;;  %v5852_v22 = vadd.f32 %v384_v28, %v5803_v50  ;;  %v457_v16 = vpop.f32.mrb[13].mxu1  ;;  %v386_v17 = vpop.f32.mrb[14].mxu0 }
 0x13c   :  { %7073 = vst [vmem:[#allocation86_spill] sm:$0xff] %v5846_v63  ;;  %5037 = vrcp.f32 %v714_v26  ;;  %v5855_v15 = vadd.f32 %v457_v16, %v5801_v8  ;;  %v5858_v54 = vadd.f32 %v386_v17, %v5799_v0  ;;  %v459_v38 = vpop.f32.mrb[14].mxu1  ;;  %v388_v49 = vpop.f32.mrb[15].mxu0 }
 0x13d   :  { %7074 = vst [vmem:[#allocation87_spill] sm:$0xff] %v5849_v57  ;;  %7075 = vst [vmem:[#allocation88_spill] sm:$0xff] %v5852_v22  ;;  %v5861_v59 = vadd.f32 %v459_v38, %v5797_v33  ;;  %v5864_v40 = vadd.f32 %v388_v49, %v5803_v50  ;;  %v461_v32 = vpop.f32.mrb[15].mxu1 }
 0x13e   :  { %7076 = vst [vmem:[#allocation89_spill] sm:$0xff] %v5855_v15  ;;  %7077 = vst [vmem:[#allocation90_spill] sm:$0xff] %v5858_v54  ;;  %v5867_v28 = vadd.f32 %v461_v32, %v5801_v8  ;;  %v5032_v17 = vpop.eup %5031 }
 0x13f   :  { %7078 = vst [vmem:[#allocation91_spill] sm:$0xff] %v5861_v59  ;;  %7079 = vst [vmem:[#allocation92_spill] sm:$0xff] %v5864_v40  ;;  %v5034_v40 = vpop.eup %5033 }
 0x140   :  { %7080 = vst [vmem:[#allocation93_spill] sm:$0xff] %v5867_v28 }
 0x141   :  { %v392_v22 = vpop.f32.mrb[16].mxu0 }
 0x142   :  { %v5870_v26 = vadd.f32 %v392_v22, %v5799_v0  ;;  %v465_v16 = vpop.f32.mrb[16].mxu1  ;;  %v394_v15 = vpop.f32.mrb[17].mxu0 }
 0x143   :  { %v5873_v54 = vadd.f32 %v465_v16, %v5797_v33  ;;  %v5876_v38 = vadd.f32 %v394_v15, %v5803_v50  ;;  %v467_v59 = vpop.f32.mrb[17].mxu1  ;;  %v396_v49 = vpop.f32.mrb[18].mxu0 }
 0x144   :  { %7081 = vst [vmem:[#allocation94_spill] sm:$0xff] %v5870_v26  ;;  %v5879_v57 = vadd.f32 %v467_v59, %v5801_v8  ;;  %v5882_v32 = vadd.f32 %v396_v49, %v5799_v0  ;;  %v469_v22 = vpop.f32.mrb[18].mxu1  ;;  %v398_v26 = vpop.f32.mrb[19].mxu0  ;;  %v506_v0 = vld [vmem:[#allocation8] sm:$0xff] }
 0x145   :  { %7082 = vst [vmem:[#allocation95_spill] sm:$0xff] %v5873_v54  ;;  %7083 = vst [vmem:[#allocation96_spill] sm:$0xff] %v5876_v38  ;;  %v5036_v28 = vpop.eup %5035  ;;  %v5885_v63 = vadd.f32 %v469_v22, %v5797_v33  ;;  %v5888_v16 = vadd.f32 %v398_v26, %v5803_v50  ;;  %v471_v15 = vpop.f32.mrb[19].mxu1  ;;  %v715_v54 = vadd.f32 1.0, %v5032_v17  ;;  %v510_v49 = vld [vmem:[#allocation8 + $0x20] sm:$0xff]  ;;  %v508_v33 = vld [vmem:[#allocation8 + $0x10] sm:$0xff] }
 0x146   :  { %7084 = vst [vmem:[#allocation97_spill] sm:$0xff] %v5879_v57  ;;  %7085 = vst [vmem:[#allocation98_spill] sm:$0xff] %v5882_v32  ;;  %v5038_v38 = vpop.eup %5037  ;;  %v724_v6 = vmul.f32 %v5036_v28, %v5034_v40  ;;  %v5891_v13 = vadd.f32 %v471_v15, %v5801_v8  ;;  %v512_v22 = vld [vmem:[#allocation8 + $0x30] sm:$0xff]  ;;  %v519_v50 = vld [vmem:[#allocation8 + $0x68] sm:$0xff]  ;;  %v5896_v40 = vpack.c.bf16 %v510_v49, %v506_v0 }
 0x147   :  { %7086 = vst [vmem:[#allocation99_spill] sm:$0xff] %v5885_v63  ;;  %7087 = vst [vmem:[#allocation100_spill] sm:$0xff] %v5888_v16  ;;  %v723_v59 = vmul.f32 0.0, %v5038_v38  ;;  %5039 = vrcp.f32 %v715_v54  ;;  %v515_v63 = vld [vmem:[#allocation8 + $0x48] sm:$0xff]  ;;  %v517_v26 = vld [vmem:[#allocation8 + $0x58] sm:$0xff]  ;;  %v5898_v8 = vpack.c.bf16 %v512_v22, %v508_v33  ;;  %v5918_v33 = vpack.c.bf16 %v529_v62, %v525_v10 }
 0x148   :  { %7088 = vst [vmem:[#allocation101_spill] sm:$0xff] %v5891_v13  ;;  %v521_v16 = vld [vmem:[#allocation8 + $0x78] sm:$0xff]  ;;  %7090 = vst [vmem:[#allocation103_spill] sm:$0xff] %v5896_v40  ;;  %v514_v28 = vld [vmem:[#allocation8 + $0x40] sm:$0xff]  ;;  %v5902_v54 = vpack.c.bf16 %v519_v50, %v515_v63 }
 0x149   :  { %v5893_v57 = vadd.f32 %v724_v6, %v723_v59  ;;  %7091 = vst [vmem:[#allocation104_spill] sm:$0xff] %v5898_v8  ;;  %v518_v6 = vld [vmem:[#allocation8 + $0x60] sm:$0xff]  ;;  %v5904_v15 = vpack.c.bf16 %v521_v16, %v517_v26  ;;  %v516_v59 = vld [vmem:[#allocation8 + $0x50] sm:$0xff]  ;;  %7096 = vst [vmem:[#allocation109_spill] sm:$0xff] %v5918_v33 }
 0x14a   :  { %v520_v13 = vld [vmem:[#allocation8 + $0x70] sm:$0xff]  ;;  %v522_v16 = vld [vmem:[#allocation8 + $0x80] sm:$0xff]  ;;  %v531_v26 = vld [vmem:[#allocation8 + $0xc8] sm:$0xff] }
 0x14b   :  { %7089 = vst [vmem:[#allocation102_spill] sm:$0xff] %v5893_v57  ;;  %5041 = vtanh.f32 %v5893_v57  ;;  %7092 = vst [vmem:[#allocation105_spill] sm:$0xff] %v5904_v15  ;;  %v523_v57 = vld [vmem:[#allocation8 + $0x88] sm:$0xff]  ;;  %v5912_v63 = vpack.c.bf16 %v520_v13, %v516_v59  ;;  %v526_v0 = vld [vmem:[#allocation8 + $0xa0] sm:$0xff] }
 0x14c   :  { %v5916_v49 = vpack.c.bf16 %v527_v11, %v523_v57  ;;  %v524_v22 = vld [vmem:[#allocation8 + $0x90] sm:$0xff]  ;;  %v5924_v13 = vpack.c.bf16 %v526_v0, %v522_v16  ;;  %v530_v62 = vld [vmem:[#allocation8 + $0xc0] sm:$0xff] }
 0x14d   :  { %7094 = vst [vmem:[#allocation107_spill] sm:$0xff] %v5912_v63  ;;  %v528_v50 = vld [vmem:[#allocation8 + $0xb0] sm:$0xff]  ;;  %v534_v10 = vld [vmem:[#allocation8 + $0xe0] sm:$0xff] }
 0x14e   :  { %7095 = vst [vmem:[#allocation108_spill] sm:$0xff] %v5916_v49  ;;  %7097 = vst [vmem:[#allocation110_spill] sm:$0xff] %v5924_v13  ;;  %v5926_v11 = vpack.c.bf16 %v528_v50, %v524_v22  ;;  %v536_v59 = vld [vmem:[#allocation8 + $0xf0] sm:$0xff]  ;;  %v5936_v16 = vpack.c.bf16 %v534_v10, %v530_v62  ;;  %v538_v22 = vld [vmem:[#allocation8 + $0x100] sm:$0xff] }
 0x14f   :  { %v542_v50 = vld [vmem:[#allocation8 + $0x120] sm:$0xff] }
 0x150   :  { %7098 = vst [vmem:[#allocation111_spill] sm:$0xff] %v5926_v11  ;;  %7101 = vst [vmem:[#allocation114_spill] sm:$0xff] %v5936_v16  ;;  %v5948_v62 = vpack.c.bf16 %v542_v50, %v538_v22 }
 0x151   :  { %v5040_v32 = vpop.eup %5039 }
 0x152   :  { %7105 = vst [vmem:[#allocation118_spill] sm:$0xff] %v5948_v62 }
 0x155   :  { %v5042_v17 = vpop.eup %5041 }
 0x156   :  { %v5900_v38 = vmul.f32 %v5042_v17, %v5040_v32  ;;  %v5910_v32 = vpack.c.bf16 %v518_v6, %v514_v28  ;;  %v535_v17 = vld [vmem:[#allocation8 + $0xe8] sm:$0xff]  ;;  %v532_v6 = vld [vmem:[#allocation8 + $0xd0] sm:$0xff] }
 0x157   :  { %v5930_v57 = vpack.c.bf16 %v535_v17, %v531_v26  ;;  %v5938_v0 = vpack.c.bf16 %v536_v59, %v532_v6  ;;  %v540_v26 = vld [vmem:[#allocation8 + $0x110] sm:$0xff]  ;;  %v546_v6 = vld [vmem:[#allocation8 + $0x140] sm:$0xff] }
 0x158   :  { %814 = vmatmul.mubr.f32.vlgmr.msra.gmra.mrb[2].mxu0 %v5900_v38  ;;  %885 = vmatmul.mubr.f32.vlgmr.msra.gmra.mrb[2].mxu1 %v5900_v38  ;;  %7093 = vst [vmem:[#allocation106_spill] sm:$0xff] %v5910_v32  ;;  %v544_v17 = vld [vmem:[#allocation8 + $0x130] sm:$0xff]  ;;  %v550_v59 = vld [vmem:[#allocation8 + $0x160] sm:$0xff] }
 0x159   :  { %3641 = vmatpush1.bf16.msra.mxu0 %v5896_v40  ;;  %3673 = vmatpush1.bf16.msra.mxu1 %v5898_v8  ;;  %v533_v40 = vld [vmem:[#allocation8 + $0xd8] sm:$0xff]  ;;  %7099 = vst [vmem:[#allocation112_spill] sm:$0xff] %v5930_v57  ;;  %7102 = vst [vmem:[#allocation115_spill] sm:$0xff] %v5938_v0  ;;  %v5950_v10 = vpack.c.bf16 %v544_v17, %v540_v26  ;;  %v5960_v22 = vpack.c.bf16 %v550_v59, %v546_v6  ;;  %v554_v26 = vld [vmem:[#allocation8 + $0x180] sm:$0xff] }
 0x15a   :  { %3643 = vmatprep.subr.bf16.mxu0 %v5902_v54  ;;  %3675 = vmatprep.subr.bf16.mxu1 %v5904_v15  ;;  %v537_v8 = vld [vmem:[#allocation8 + $0xf8] sm:$0xff]  ;;  %v558_v17 = vld [vmem:[#allocation8 + $0x1a0] sm:$0xff] }
 0x15b   :  { %996 = vmatprep.mubr.f32.mxu0 %v7059_v42  ;;  %1067 = vmatprep.mubr.f32.mxu1 %v7059_v42  ;;  %v5932_v28 = vpack.c.bf16 %v537_v8, %v533_v40  ;;  %v539_v42 = vld [vmem:[#allocation8 + $0x108] sm:$0xff]  ;;  %v541_v15 = vld [vmem:[#allocation8 + $0x118] sm:$0xff]  ;;  %7106 = vst [vmem:[#allocation119_spill] sm:$0xff] %v5950_v10  ;;  %v5972_v6 = vpack.c.bf16 %v558_v17, %v554_v26 }
 0x15d   :  { %3645 = vmatpush1.bf16.msra.mxu0 %v5910_v32  ;;  %3677 = vmatpush1.bf16.msra.mxu1 %v5912_v63  ;;  %7100 = vst [vmem:[#allocation113_spill] sm:$0xff] %v5932_v28  ;;  %v543_v32 = vld [vmem:[#allocation8 + $0x128] sm:$0xff]  ;;  %v545_v63 = vld [vmem:[#allocation8 + $0x138] sm:$0xff] }
 0x15e   :  { %3647 = vmatprep.subr.bf16.mxu0 %v5916_v49  ;;  %3679 = vmatprep.subr.bf16.mxu1 %v5918_v33  ;;  %v5942_v40 = vpack.c.bf16 %v543_v32, %v539_v42  ;;  %v5944_v8 = vpack.c.bf16 %v545_v63, %v541_v15  ;;  %v547_v33 = vld [vmem:[#allocation8 + $0x148] sm:$0xff]  ;;  %v549_v49 = vld [vmem:[#allocation8 + $0x158] sm:$0xff]  ;;  %v548_v32 = vld [vmem:[#allocation8 + $0x150] sm:$0xff] }
 0x15f   :  { %v552_v63 = vld [vmem:[#allocation8 + $0x170] sm:$0xff] }
 0x160   :  { %7103 = vst [vmem:[#allocation116_spill] sm:$0xff] %v5942_v40  ;;  %7104 = vst [vmem:[#allocation117_spill] sm:$0xff] %v5944_v8  ;;  %v5962_v50 = vpack.c.bf16 %v552_v63, %v548_v32  ;;  %v562_v32 = vld [vmem:[#allocation8 + $0x1c0] sm:$0xff]  ;;  %v568_v63 = vld [vmem:[#allocation8 + $0x1f0] sm:$0xff] }
 0x161   :  { %3649 = vmatpush1.bf16.msra.mxu0 %v5924_v13  ;;  %3681 = vmatpush1.bf16.msra.mxu1 %v5926_v11  ;;  %v551_v13 = vld [vmem:[#allocation8 + $0x168] sm:$0xff]  ;;  %v553_v11 = vld [vmem:[#allocation8 + $0x178] sm:$0xff] }
 0x162   :  { %3651 = vmatprep.subr.bf16.mxu0 %v5930_v57  ;;  %3683 = vmatprep.subr.bf16.mxu1 %v5932_v28  ;;  %v5954_v42 = vpack.c.bf16 %v551_v13, %v547_v33  ;;  %v5956_v15 = vpack.c.bf16 %v553_v11, %v549_v49  ;;  %v555_v28 = vld [vmem:[#allocation8 + $0x188] sm:$0xff]  ;;  %v557_v57 = vld [vmem:[#allocation8 + $0x198] sm:$0xff]  ;;  %v556_v13 = vld [vmem:[#allocation8 + $0x190] sm:$0xff] }
 0x163   :  { %v560_v11 = vld [vmem:[#allocation8 + $0x1b0] sm:$0xff] }
 0x164   :  { %v5974_v59 = vpack.c.bf16 %v560_v11, %v556_v13  ;;  %v7112_v13 = vld [vmem:[#allocation51_spill] sm:$0xff]  ;;  %v7113_v11 = vld [vmem:[#allocation52_spill] sm:$0xff] }
 0x165   :  { %3653 = vmatpush1.bf16.msra.mxu0 %v5936_v16  ;;  %3685 = vmatpush1.bf16.msra.mxu1 %v5938_v0  ;;  %v559_v16 = vld [vmem:[#allocation8 + $0x1a8] sm:$0xff]  ;;  %v561_v0 = vld [vmem:[#allocation8 + $0x1b8] sm:$0xff] }
 0x166   :  { %3655 = vmatprep.subr.bf16.mxu0 %v5942_v40  ;;  %3687 = vmatprep.subr.bf16.mxu1 %v5944_v8  ;;  %v5966_v49 = vpack.c.bf16 %v559_v16, %v555_v28  ;;  %v5968_v33 = vpack.c.bf16 %v561_v0, %v557_v57  ;;  %v563_v8 = vld [vmem:[#allocation8 + $0x1c8] sm:$0xff]  ;;  %v565_v40 = vld [vmem:[#allocation8 + $0x1d8] sm:$0xff]  ;;  %v566_v16 = vld [vmem:[#allocation8 + $0x1e0] sm:$0xff] }
 0x167   :  { %v564_v0 = vld [vmem:[#allocation8 + $0x1d0] sm:$0xff]  ;;  %v5984_v26 = vpack.c.bf16 %v566_v16, %v562_v32  ;;  %v7114_v32 = vld [vmem:[#allocation53_spill] sm:$0xff] }
 0x168   :  { %v5986_v17 = vpack.c.bf16 %v568_v63, %v564_v0  ;;  %v7115_v16 = vld [vmem:[#allocation54_spill] sm:$0xff]  ;;  %v7116_v0 = vld [vmem:[#allocation55_spill] sm:$0xff]  ;;  %v7117_v63 = vld [vmem:[#allocation56_spill] sm:$0xff] }
 0x169   :  { %3657 = vmatpush1.bf16.msra.mxu0 %v5948_v62  ;;  %3689 = vmatpush1.bf16.msra.mxu1 %v5950_v10  ;;  %v567_v62 = vld [vmem:[#allocation8 + $0x1e8] sm:$0xff]  ;;  %v569_v10 = vld [vmem:[#allocation8 + $0x1f8] sm:$0xff] }
 0x16a   :  { %3659 = vmatprep.subr.bf16.mxu0 %v5954_v42  ;;  %3691 = vmatprep.subr.bf16.mxu1 %v5956_v15  ;;  %v5978_v57 = vpack.c.bf16 %v567_v62, %v563_v8  ;;  %v5980_v28 = vpack.c.bf16 %v569_v10, %v565_v40  ;;  %v7108_v40 = vld [vmem:[#allocation47_spill] sm:$0xff]  ;;  %v7109_v8 = vld [vmem:[#allocation48_spill] sm:$0xff]  ;;  %v7110_v62 = vld [vmem:[#allocation49_spill] sm:$0xff] }
 0x16b   :  { %v7111_v10 = vld [vmem:[#allocation50_spill] sm:$0xff] }
 0x16d   :  { %3661 = vmatpush1.bf16.msra.mxu0 %v5960_v22  ;;  %3693 = vmatpush1.bf16.msra.mxu1 %v5962_v50 }
 0x16e   :  { %3663 = vmatprep.subr.bf16.mxu0 %v5966_v49  ;;  %3695 = vmatprep.subr.bf16.mxu1 %v5968_v33 }
 0x171   :  { %3665 = vmatpush1.bf16.msra.mxu0 %v5972_v6  ;;  %3697 = vmatpush1.bf16.msra.mxu1 %v5974_v59 }
 0x172   :  { %3667 = vmatprep.subr.bf16.mxu0 %v5978_v57  ;;  %3699 = vmatprep.subr.bf16.mxu1 %v5980_v28 }
 0x175   :  { %3669 = vmatpush1.bf16.msra.mxu0 %v5984_v26  ;;  %3701 = vmatpush1.bf16.msra.mxu1 %v5986_v17 }
 0x176   :  { %3703 = vmatprep.subr.bf16.mxu0 %v5549_v24  ;;  %3767 = vmatprep.subr.bf16.mxu1 %v5551_v25 }
 0x178   :  { %997 = vmatmul.mubr.f32.vlgmr.msra.gmra.mrb[20].mxu0 %v5900_v38  ;;  %1068 = vmatmul.mubr.f32.vlgmr.msra.gmra.mrb[20].mxu1 %v5900_v38  ;;  %v7107_v38 = vld [vmem:[#allocation46_spill] sm:$0xff] }
 0x179   :  { %3705 = vmatpush1.bf16.msra.mxu0 %v5555_v29  ;;  %3769 = vmatpush1.bf16.msra.mxu1 %v5562_v34 }
 0x17a   :  { %3707 = vmatprep.subr.bf16.mxu0 %v5564_v35  ;;  %3771 = vmatprep.subr.bf16.mxu1 %v5568_v39 }
 0x17d   :  { %3709 = vmatpush1.bf16.msra.mxu0 %v5572_v43  ;;  %3773 = vmatpush1.bf16.msra.mxu1 %v5574_v44 }
 0x17e   :  { %3711 = vmatprep.subr.bf16.mxu0 %v5577_v51  ;;  %3775 = vmatprep.subr.bf16.mxu1 %v5580_v55 }
 0x181   :  { %3713 = vmatpush1.bf16.msra.mxu0 %v5582_v56  ;;  %3777 = vmatpush1.bf16.msra.mxu1 %v5586_v60 }
 0x182   :  { %3715 = vmatprep.subr.bf16.mxu0 %v5588_v61  ;;  %3779 = vmatprep.subr.bf16.mxu1 %v5592_v2 }
 0x185   :  { %3717 = vmatpush1.bf16.msra.mxu0 %v5598_v5  ;;  %3781 = vmatpush1.bf16.msra.mxu1 %v5605_v7 }
 0x186   :  { %3719 = vmatprep.subr.bf16.mxu0 %v5621_v12  ;;  %3783 = vmatprep.subr.bf16.mxu1 %v5623_v1 }
 0x189   :  { %3721 = vmatpush1.bf16.msra.mxu0 %v5626_v18  ;;  %3785 = vmatpush1.bf16.msra.mxu1 %v5628_v19 }
 0x18a   :  { %3723 = vmatprep.subr.bf16.mxu0 %v5633_v23  ;;  %3787 = vmatprep.subr.bf16.mxu1 %v5635_v30 }
 0x18d   :  { %3725 = vmatpush1.bf16.msra.mxu0 %v5637_v31  ;;  %3789 = vmatpush1.bf16.msra.mxu1 %v5640_v36 }
 0x18e   :  { %3727 = vmatprep.subr.bf16.mxu0 %v5645_v41  ;;  %3791 = vmatprep.subr.bf16.mxu1 %v5647_v47 }
 0x191   :  { %3729 = vmatpush1.bf16.msra.mxu0 %v5649_v48  ;;  %3793 = vmatpush1.bf16.msra.mxu1 %v5652_v52 }
 0x192   :  { %3731 = vmatprep.subr.bf16.mxu0 %v5657_v58  ;;  %3795 = vmatprep.subr.bf16.mxu1 %v5659_v3 }
 0x195   :  { %3733 = vmatpush1.bf16.msra.mxu0 %v5661_v4  ;;  %3797 = vmatpush1.bf16.msra.mxu1 %v5664_v9 }
 0x196   :  { %3735 = vmatprep.subr.bf16.mxu0 %v5669_v14  ;;  %3799 = vmatprep.subr.bf16.mxu1 %v5671_v20 }
 0x199   :  { %3737 = vmatpush1.bf16.msra.mxu0 %v5673_v21  ;;  %3801 = vmatpush1.bf16.msra.mxu1 %v5676_v27 }
 0x19a   :  { %3739 = vmatprep.subr.bf16.mxu0 %v5681_v37  ;;  %3803 = vmatprep.subr.bf16.mxu1 %v5683_v45 }
 0x19d   :  { %3741 = vmatpush1.bf16.msra.mxu0 %v5685_v46  ;;  %3805 = vmatpush1.bf16.msra.mxu1 %v5688_v53 }
 0x19e   :  { %3743 = vmatprep.subr.bf16.mxu0 %v7107_v38  ;;  %3807 = vmatprep.subr.bf16.mxu1 %v7108_v40  ;;  %v7118_v38 = vld [vmem:[#allocation57_spill] sm:$0xff]  ;;  %v7119_v40 = vld [vmem:[#allocation58_spill] sm:$0xff] }
 0x1a1   :  { %3745 = vmatpush1.bf16.msra.mxu0 %v7109_v8  ;;  %3809 = vmatpush1.bf16.msra.mxu1 %v7110_v62  ;;  %v7120_v8 = vld [vmem:[#allocation59_spill] sm:$0xff]  ;;  %v7121_v62 = vld [vmem:[#allocation60_spill] sm:$0xff] }
 0x1a2   :  { %3747 = vmatprep.subr.bf16.mxu0 %v7111_v10  ;;  %3811 = vmatprep.subr.bf16.mxu1 %v7112_v13  ;;  %v7122_v10 = vld [vmem:[#allocation61_spill] sm:$0xff]  ;;  %v7123_v13 = vld [vmem:[#allocation62_spill] sm:$0xff] }
 0x1a5   :  { %3749 = vmatpush1.bf16.msra.mxu0 %v7113_v11  ;;  %3813 = vmatpush1.bf16.msra.mxu1 %v7114_v32  ;;  %v7124_v11 = vld [vmem:[#allocation63_spill] sm:$0xff]  ;;  %v7125_v32 = vld [vmem:[#allocation64_spill] sm:$0xff] }
 0x1a6   :  { %3751 = vmatprep.subr.bf16.mxu0 %v7115_v16  ;;  %3815 = vmatprep.subr.bf16.mxu1 %v7116_v0  ;;  %v7126_v16 = vld [vmem:[#allocation65_spill] sm:$0xff]  ;;  %v7127_v0 = vld [vmem:[#allocation66_spill] sm:$0xff] }
 0x1a9   :  { %3753 = vmatpush1.bf16.msra.mxu0 %v7117_v63  ;;  %3817 = vmatpush1.bf16.msra.mxu1 %v7118_v38  ;;  %v7128_v63 = vld [vmem:[#allocation67_spill] sm:$0xff]  ;;  %v7129_v38 = vld [vmem:[#allocation68_spill] sm:$0xff] }
 0x1aa   :  { %3755 = vmatprep.subr.bf16.mxu0 %v7119_v40  ;;  %3819 = vmatprep.subr.bf16.mxu1 %v7120_v8  ;;  %v7130_v40 = vld [vmem:[#allocation69_spill] sm:$0xff]  ;;  %v7131_v8 = vld [vmem:[#allocation70_spill] sm:$0xff] }
 0x1ad   :  { %3757 = vmatpush1.bf16.msra.mxu0 %v7121_v62  ;;  %3821 = vmatpush1.bf16.msra.mxu1 %v7122_v10  ;;  %v7132_v62 = vld [vmem:[#allocation71_spill] sm:$0xff] }
 0x1ae   :  { %3759 = vmatprep.subr.bf16.mxu0 %v7123_v13  ;;  %3823 = vmatprep.subr.bf16.mxu1 %v7124_v11  ;;  %v698_v11 = vld [vmem:[%s6831_s8] sm:$0xf]  ;;  %v7133_v13 = vld [vmem:[#allocation73_spill] sm:$0xff] }
 0x1af   :  { %v7138_v37 = vsub.s32 2, %v7133_v13 }
 0x1b1   :  { %3761 = vmatpush1.bf16.msra.mxu0 %v7125_v32  ;;  %3825 = vmatpush1.bf16.msra.mxu1 %v7126_v16  ;;  %v7134_v32 = vsub.s32 0, %v7133_v13  ;;  %v6075_v27 = vrot.slane %v698_v11, %v7138_v37 }
 0x1b2   :  { %3763 = vmatprep.subr.bf16.mxu0 %v7127_v0  ;;  %3827 = vmatprep.subr.bf16.mxu1 %v7128_v63  ;;  %v7136_v0 = vsub.s32 1, %v7133_v13 }
 0x1b3   :  { %v6065_v10 = vrot.slane %v698_v11, %v7134_v32  ;;  %7139 = vst [vmem:[#allocation121_spill] sm:$0xff] %v6075_v27  ;;  %v7140_v32 = vsub.s32 3, %v7133_v13 }
 0x1b4   :  { %v6069_v16 = vrot.slane %v698_v11, %v7136_v0 }
 0x1b5   :  { %3765 = vmatpush1.bf16.msra.mxu0 %v7129_v38  ;;  %3829 = vmatpush1.bf16.msra.mxu1 %v7130_v40  ;;  %7135 = vst [vmem:[#allocation73_spill] sm:$0xff] %v6065_v10  ;;  %v6079_v0 = vrot.slane %v698_v11, %v7140_v32 }
 0x1b6   :  { %3831 = vmatprep.subr.bf16.mxu0 %v7131_v8  ;;  %3863 = vmatprep.subr.bf16.mxu1 %v7132_v62  ;;  %7137 = vst [vmem:[#allocation120_spill] sm:$0xff] %v6069_v16 }
 0x1b7   :  { %7141 = vst [vmem:[#allocation122_spill] sm:$0xff] %v6079_v0 }
 0x22b   :  { %v815_v63 = vpop.f32.mrb[2].mxu0  ;;  %v886_v38 = vpop.f32.mrb[2].mxu1 }
 0x22c   :  { %v816_v40 = vadd.f32 %v815_v63, %v6065_v10  ;;  %v817_v53 = vpop.f32.mrb[3].mxu0  ;;  %v888_v8 = vpop.f32.mrb[3].mxu1  ;;  %v887_v21 = vadd.f32 %v886_v38, %v6075_v27 }
 0x22d   :  { %v818_v62 = vadd.f32 %v817_v53, %v6069_v16  ;;  %v889_v63 = vadd.f32 %v888_v8, %v6079_v0 }
 0x22e   :  { %v3449_v46 = vmul.f32 -1.442695, %v816_v40  ;;  %v3451_v10 = vmul.f32 -1.442695, %v887_v21  ;;  %v7142_v21 = vld [vmem:[#allocation74_spill] sm:$0xff] }
 0x22f   :  { %v3450_v45 = vmul.f32 -1.442695, %v818_v62 }
 0x230   :  { %5043 = vpow2.f32 %v3449_v46 }
 0x231   :  { %5045 = vpow2.f32 %v3450_v45 }
 0x232   :  { %5047 = vtanh.f32 %v889_v63 }
 0x233   :  { %5049 = vpow2.f32 %v3451_v10 }
 0x23a   :  { %v5044_v20 = vpop.eup %5043 }
 0x23b   :  { %v900_v14 = vadd.f32 1.0, %v5044_v20  ;;  %v5046_v53 = vpop.eup %5045  ;;  %v7143_v20 = vld [vmem:[#allocation76_spill] sm:$0xff] }
 0x23c   :  { %v901_v40 = vadd.f32 1.0, %v5046_v53  ;;  %v5048_v37 = vpop.eup %5047 }
 0x23d   :  { %5051 = vrcp.f32 %v900_v14  ;;  %v5050_v46 = vpop.eup %5049  ;;  %v7144_v14 = vld [vmem:[#allocation75_spill] sm:$0xff] }
 0x23e   :  { %5053 = vrcp.f32 %v901_v40  ;;  %v902_v11 = vadd.f32 1.0, %v5050_v46  ;;  %v7145_v40 = vld [vmem:[#allocation77_spill] sm:$0xff] }
 0x240   :  { %5055 = vrcp.f32 %v902_v11 }
 0x247   :  { %v5052_v45 = vpop.eup %5051 }
 0x248   :  { %v911_v62 = vmul.f32 %v5052_v45, %v5048_v37  ;;  %v5054_v13 = vpop.eup %5053  ;;  %v6090_v45 = vpop.permute.xlu0 %4997 }
 0x249   :  { %v910_v32 = vmul.f32 0.0, %v5054_v13 }
 0x24b   :  { %v998_v16 = vpop.f32.mrb[20].mxu0  ;;  %v1069_v38 = vpop.f32.mrb[20].mxu1  ;;  %v6083_v27 = vadd.f32 %v911_v62, %v910_v32 }
 0x24c   :  { %v1074_v8 = vadd.f32 %v998_v16, %v7142_v21  ;;  %v1076_v63 = vadd.f32 %v1069_v38, %v7143_v20  ;;  %v1000_v0 = vpop.f32.mrb[21].mxu0  ;;  %v1071_v10 = vpop.f32.mrb[21].mxu1  ;;  %v4999_v16 = vunpack.i.l.bf16 %v6090_v45 }
 0x24d   :  { %v1075_v53 = vadd.f32 %v1000_v0, %v7144_v14  ;;  %v1077_v9 = vadd.f32 %v1071_v10, %v7145_v40  ;;  %5057 = vtanh.f32 %v6083_v27  ;;  %v5056_v62 = vpop.eup %5055 }
 0x24e   :  { %v3453_v37 = vmul.f32 -1.442695, %v1074_v8  ;;  %v3455_v32 = vmul.f32 -1.442695, %v1076_v63  ;;  %v7146_v63 = vld [vmem:[#allocation102_spill] sm:$0xff] }
 0x24f   :  { %v3454_v46 = vmul.f32 -1.442695, %v1075_v53 }
 0x250   :  { %5059 = vpow2.f32 %v3453_v37 }
 0x251   :  { %5061 = vpow2.f32 %v3454_v46 }
 0x252   :  { %5063 = vtanh.f32 %v1077_v9 }
 0x253   :  { %5065 = vpow2.f32 %v3455_v32 }
 0x257   :  { %v5058_v13 = vpop.eup %5057 }
 0x258   :  { %v914_v38 = vmul.f32 %v5058_v13, %v5056_v62 }
 0x25a   :  { %v5060_v21 = vpop.eup %5059  ;;  %v923_v0 = vmul.f32 %v4999_v16, %v914_v38  ;;  %1166 = vmatprep.mubr.f32.mxu0 %v914_v38  ;;  %1237 = vmatprep.mubr.f32.mxu1 %v914_v38  ;;  %v7147_v38 = vld [vmem:[#allocation103_spill] sm:$0xff] }
 0x25b   :  { %v1087_v11 = vadd.f32 1.0, %v5060_v21  ;;  %v5062_v20 = vpop.eup %5061  ;;  %v7148_v21 = vld [vmem:[#allocation104_spill] sm:$0xff] }
 0x25c   :  { %v1088_v8 = vadd.f32 1.0, %v5062_v20  ;;  %924 = vst [vmem:[#allocation11] sm:$0xff] %v923_v0  ;;  %v5064_v10 = vpop.eup %5063  ;;  %v7150_v0 = vmov 0.0   ;;  %v7151_v20 = vld [vmem:[#allocation106_spill] sm:$0xff] }
 0x25d   :  { %5067 = vrcp.f32 %v1087_v11  ;;  %v5066_v14 = vpop.eup %5065  ;;  %v7149_v11 = vld [vmem:[#allocation105_spill] sm:$0xff] }
 0x25e   :  { %5069 = vrcp.f32 %v1088_v8  ;;  %v1089_v46 = vadd.f32 1.0, %v5066_v14  ;;  %v7152_v8 = vld [vmem:[#allocation107_spill] sm:$0xff]  ;;  %v7154_v14 = vld [vmem:[#allocation109_spill] sm:$0xff] }
 0x260   :  { %5071 = vrcp.f32 %v1089_v46  ;;  %v7158_v46 = vld [vmem:[#allocation113_spill] sm:$0xff] }
 0x267   :  { %v5068_v53 = vpop.eup %5067 }
 0x268   :  { %v1098_v40 = vmul.f32 %v5068_v53, %v5064_v10  ;;  %v5070_v37 = vpop.eup %5069  ;;  %v7153_v10 = vld [vmem:[#allocation108_spill] sm:$0xff]  ;;  %v7155_v53 = vld [vmem:[#allocation110_spill] sm:$0xff] }
 0x269   :  { %v1097_v62 = vmul.f32 %v5070_v37, %v7146_v63  ;;  %v7157_v37 = vld [vmem:[#allocation112_spill] sm:$0xff]  ;;  %v7159_v63 = vld [vmem:[#allocation114_spill] sm:$0xff] }
 0x26a   :  { %v5072_v9 = vpop.eup %5071 }
 0x26b   :  { %v6094_v13 = vadd.f32 %v1098_v40, %v1097_v62  ;;  %v7156_v40 = vld [vmem:[#allocation111_spill] sm:$0xff] }
 0x26c   :  { %v7160_v62 = vld [vmem:[#allocation115_spill] sm:$0xff] }
 0x26d   :  { %5073 = vtanh.f32 %v6094_v13 }
 0x277   :  { %v5074_v16 = vpop.eup %5073 }
 0x278   :  { %v1101_v32 = vmul.f32 %v5074_v16, %v5072_v9  ;;  %v7161_v9 = vld [vmem:[#allocation116_spill] sm:$0xff]  ;;  %v7162_v16 = vld [vmem:[#allocation117_spill] sm:$0xff] }
 0x27a   :  { %1167 = vmatmul.mubr.f32.vlgmr.msra.gmra.mrb[22].mxu0 %v1101_v32  ;;  %1238 = vmatmul.mubr.f32.vlgmr.msra.gmra.mrb[22].mxu1 %v1101_v32 }
 0x27b   :  { %3833 = vmatpush1.bf16.msra.mxu0 %v7147_v38  ;;  %3865 = vmatpush1.bf16.msra.mxu1 %v7148_v21 }
 0x27c   :  { %3835 = vmatprep.subr.bf16.mxu0 %v5902_v54  ;;  %3867 = vmatprep.subr.bf16.mxu1 %v7149_v11 }
 0x27d   :  { %1350 = vmatprep.mubr.f32.mxu0 %v7150_v0  ;;  %1421 = vmatprep.mubr.f32.mxu1 %v7150_v0 }
 0x27f   :  { %3837 = vmatpush1.bf16.msra.mxu0 %v7151_v20  ;;  %3869 = vmatpush1.bf16.msra.mxu1 %v7152_v8  ;;  %v7163_v8 = vld [vmem:[#allocation118_spill] sm:$0xff] }
 0x280   :  { %3839 = vmatprep.subr.bf16.mxu0 %v7153_v10  ;;  %3871 = vmatprep.subr.bf16.mxu1 %v7154_v14  ;;  %v7164_v10 = vld [vmem:[#allocation119_spill] sm:$0xff] }
 0x283   :  { %3841 = vmatpush1.bf16.msra.mxu0 %v7155_v53  ;;  %3873 = vmatpush1.bf16.msra.mxu1 %v7156_v40 }
 0x284   :  { %3843 = vmatprep.subr.bf16.mxu0 %v7157_v37  ;;  %3875 = vmatprep.subr.bf16.mxu1 %v7158_v46 }
 0x287   :  { %3845 = vmatpush1.bf16.msra.mxu0 %v7159_v63  ;;  %3877 = vmatpush1.bf16.msra.mxu1 %v7160_v62 }
 0x288   :  { %3847 = vmatprep.subr.bf16.mxu0 %v7161_v9  ;;  %3879 = vmatprep.subr.bf16.mxu1 %v7162_v16 }
 0x28b   :  { %3849 = vmatpush1.bf16.msra.mxu0 %v7163_v8  ;;  %3881 = vmatpush1.bf16.msra.mxu1 %v7164_v10 }
 0x28c   :  { %3851 = vmatprep.subr.bf16.mxu0 %v5954_v42  ;;  %3883 = vmatprep.subr.bf16.mxu1 %v5956_v15 }
 0x28f   :  { %3853 = vmatpush1.bf16.msra.mxu0 %v5960_v22  ;;  %3885 = vmatpush1.bf16.msra.mxu1 %v5962_v50 }
 0x290   :  { %3855 = vmatprep.subr.bf16.mxu0 %v5966_v49  ;;  %3887 = vmatprep.subr.bf16.mxu1 %v5968_v33 }
 0x293   :  { %3857 = vmatpush1.bf16.msra.mxu0 %v5972_v6  ;;  %3889 = vmatpush1.bf16.msra.mxu1 %v5974_v59 }
 0x294   :  { %3859 = vmatprep.subr.bf16.mxu0 %v5978_v57  ;;  %3891 = vmatprep.subr.bf16.mxu1 %v5980_v28 }
 0x297   :  { %3861 = vmatpush1.bf16.msra.mxu0 %v5984_v26  ;;  %3893 = vmatpush1.bf16.msra.mxu1 %v5986_v17 }
 0x298   :  { %3895 = vmatprep.subr.bf16.mxu0 %v5549_v24  ;;  %3959 = vmatprep.subr.bf16.mxu1 %v5551_v25 }
 0x29a   :  { %1351 = vmatmul.mubr.f32.vlgmr.msra.gmra.mrb[24].mxu0 %v1101_v32  ;;  %1422 = vmatmul.mubr.f32.vlgmr.msra.gmra.mrb[24].mxu1 %v1101_v32  ;;  %v7165_v32 = vld [vmem:[#allocation37_spill] sm:$0xff] }
 0x29b   :  { %3897 = vmatpush1.bf16.msra.mxu0 %v5555_v29  ;;  %3961 = vmatpush1.bf16.msra.mxu1 %v5562_v34 }
 0x29c   :  { %3899 = vmatprep.subr.bf16.mxu0 %v5564_v35  ;;  %3963 = vmatprep.subr.bf16.mxu1 %v5568_v39 }
 0x29f   :  { %3901 = vmatpush1.bf16.msra.mxu0 %v5572_v43  ;;  %3965 = vmatpush1.bf16.msra.mxu1 %v5574_v44 }
 0x2a0   :  { %3903 = vmatprep.subr.bf16.mxu0 %v5577_v51  ;;  %3967 = vmatprep.subr.bf16.mxu1 %v5580_v55 }
 0x2a3   :  { %3905 = vmatpush1.bf16.msra.mxu0 %v5582_v56  ;;  %3969 = vmatpush1.bf16.msra.mxu1 %v5586_v60 }
 0x2a4   :  { %3907 = vmatprep.subr.bf16.mxu0 %v5588_v61  ;;  %3971 = vmatprep.subr.bf16.mxu1 %v5592_v2 }
 0x2a7   :  { %3909 = vmatpush1.bf16.msra.mxu0 %v5598_v5  ;;  %3973 = vmatpush1.bf16.msra.mxu1 %v5605_v7 }
 0x2a8   :  { %3911 = vmatprep.subr.bf16.mxu0 %v5621_v12  ;;  %3975 = vmatprep.subr.bf16.mxu1 %v5623_v1  ;;  %v7203_v1 = vld [vmem:[#allocation121_spill] sm:$0xff]  ;;  %v7204_v12 = vld [vmem:[#allocation122_spill] sm:$0xff] }
 0x2ab   :  { %3913 = vmatpush1.bf16.msra.mxu0 %v5626_v18  ;;  %3977 = vmatpush1.bf16.msra.mxu1 %v5628_v19  ;;  %v7202_v19 = vld [vmem:[#allocation120_spill] sm:$0xff] }
 0x2ac   :  { %3915 = vmatprep.subr.bf16.mxu0 %v5633_v23  ;;  %3979 = vmatprep.subr.bf16.mxu1 %v5635_v30  ;;  %v7166_v30 = vld [vmem:[#allocation38_spill] sm:$0xff] }
 0x2af   :  { %3917 = vmatpush1.bf16.msra.mxu0 %v5637_v31  ;;  %3981 = vmatpush1.bf16.msra.mxu1 %v5640_v36  ;;  %v7167_v31 = vld [vmem:[#allocation39_spill] sm:$0xff]  ;;  %v7168_v36 = vld [vmem:[#allocation40_spill] sm:$0xff] }
 0x2b0   :  { %3919 = vmatprep.subr.bf16.mxu0 %v5645_v41  ;;  %3983 = vmatprep.subr.bf16.mxu1 %v5647_v47  ;;  %v7169_v41 = vld [vmem:[#allocation41_spill] sm:$0xff]  ;;  %v7170_v47 = vld [vmem:[#allocation42_spill] sm:$0xff] }
 0x2b3   :  { %3921 = vmatpush1.bf16.msra.mxu0 %v5649_v48  ;;  %3985 = vmatpush1.bf16.msra.mxu1 %v5652_v52  ;;  %v7171_v48 = vld [vmem:[#allocation43_spill] sm:$0xff]  ;;  %v7172_v52 = vld [vmem:[#allocation44_spill] sm:$0xff] }
 0x2b4   :  { %3923 = vmatprep.subr.bf16.mxu0 %v5657_v58  ;;  %3987 = vmatprep.subr.bf16.mxu1 %v5659_v3  ;;  %v7173_v58 = vld [vmem:[#allocation45_spill] sm:$0xff]  ;;  %v7174_v3 = vld [vmem:[#allocation46_spill] sm:$0xff] }
 0x2b7   :  { %3925 = vmatpush1.bf16.msra.mxu0 %v5661_v4  ;;  %3989 = vmatpush1.bf16.msra.mxu1 %v7165_v32  ;;  %v7175_v4 = vld [vmem:[#allocation47_spill] sm:$0xff]  ;;  %v7176_v32 = vld [vmem:[#allocation48_spill] sm:$0xff] }
 0x2b8   :  { %3927 = vmatprep.subr.bf16.mxu0 %v7166_v30  ;;  %3991 = vmatprep.subr.bf16.mxu1 %v7167_v31  ;;  %v7177_v30 = vld [vmem:[#allocation49_spill] sm:$0xff]  ;;  %v7178_v31 = vld [vmem:[#allocation50_spill] sm:$0xff] }
 0x2bb   :  { %3929 = vmatpush1.bf16.msra.mxu0 %v7168_v36  ;;  %3993 = vmatpush1.bf16.msra.mxu1 %v7169_v41  ;;  %v7179_v36 = vld [vmem:[#allocation51_spill] sm:$0xff]  ;;  %v7180_v41 = vld [vmem:[#allocation52_spill] sm:$0xff] }
 0x2bc   :  { %3931 = vmatprep.subr.bf16.mxu0 %v7170_v47  ;;  %3995 = vmatprep.subr.bf16.mxu1 %v7171_v48  ;;  %v7181_v47 = vld [vmem:[#allocation53_spill] sm:$0xff]  ;;  %v7182_v48 = vld [vmem:[#allocation54_spill] sm:$0xff] }
 0x2bf   :  { %3933 = vmatpush1.bf16.msra.mxu0 %v7172_v52  ;;  %3997 = vmatpush1.bf16.msra.mxu1 %v7173_v58  ;;  %v7183_v52 = vld [vmem:[#allocation55_spill] sm:$0xff]  ;;  %v7184_v58 = vld [vmem:[#allocation56_spill] sm:$0xff] }
 0x2c0   :  { %3935 = vmatprep.subr.bf16.mxu0 %v7174_v3  ;;  %3999 = vmatprep.subr.bf16.mxu1 %v7175_v4  ;;  %v7185_v3 = vld [vmem:[#allocation57_spill] sm:$0xff]  ;;  %v7186_v4 = vld [vmem:[#allocation58_spill] sm:$0xff] }
 0x2c3   :  { %3937 = vmatpush1.bf16.msra.mxu0 %v7176_v32  ;;  %4001 = vmatpush1.bf16.msra.mxu1 %v7177_v30  ;;  %v7187_v32 = vld [vmem:[#allocation59_spill] sm:$0xff]  ;;  %v7188_v30 = vld [vmem:[#allocation60_spill] sm:$0xff] }
 0x2c4   :  { %3939 = vmatprep.subr.bf16.mxu0 %v7178_v31  ;;  %4003 = vmatprep.subr.bf16.mxu1 %v7179_v36  ;;  %v7189_v31 = vld [vmem:[#allocation61_spill] sm:$0xff]  ;;  %v7190_v36 = vld [vmem:[#allocation62_spill] sm:$0xff] }
 0x2c7   :  { %3941 = vmatpush1.bf16.msra.mxu0 %v7180_v41  ;;  %4005 = vmatpush1.bf16.msra.mxu1 %v7181_v47  ;;  %v7191_v41 = vld [vmem:[#allocation63_spill] sm:$0xff]  ;;  %v7192_v47 = vld [vmem:[#allocation64_spill] sm:$0xff] }
 0x2c8   :  { %3943 = vmatprep.subr.bf16.mxu0 %v7182_v48  ;;  %4007 = vmatprep.subr.bf16.mxu1 %v7183_v52  ;;  %v7193_v48 = vld [vmem:[#allocation65_spill] sm:$0xff]  ;;  %v7194_v52 = vld [vmem:[#allocation66_spill] sm:$0xff] }
 0x2cb   :  { %3945 = vmatpush1.bf16.msra.mxu0 %v7184_v58  ;;  %4009 = vmatpush1.bf16.msra.mxu1 %v7185_v3  ;;  %v7195_v58 = vld [vmem:[#allocation67_spill] sm:$0xff]  ;;  %v7196_v3 = vld [vmem:[#allocation68_spill] sm:$0xff] }
 0x2cc   :  { %3947 = vmatprep.subr.bf16.mxu0 %v7186_v4  ;;  %4011 = vmatprep.subr.bf16.mxu1 %v7187_v32  ;;  %v7197_v4 = vld [vmem:[#allocation69_spill] sm:$0xff]  ;;  %v7198_v32 = vld [vmem:[#allocation70_spill] sm:$0xff] }
 0x2cf   :  { %3949 = vmatpush1.bf16.msra.mxu0 %v7188_v30  ;;  %4013 = vmatpush1.bf16.msra.mxu1 %v7189_v31  ;;  %v7199_v30 = vld [vmem:[#allocation71_spill] sm:$0xff]  ;;  %v7200_v31 = vld [vmem:[#allocation72_spill] sm:$0xff] }
 0x2d0   :  { %3951 = vmatprep.subr.bf16.mxu0 %v7190_v36  ;;  %4015 = vmatprep.subr.bf16.mxu1 %v7191_v41  ;;  %vm1622_vm3 = vcmp.gt.s32.totalorder %v7200_v31, 2  ;;  %vm1976_vm4 = vcmp.gt.s32.totalorder %v7200_v31, 3  ;;  %v7201_v36 = vld [vmem:[#allocation73_spill] sm:$0xff] }
 0x2d3   :  { %3953 = vmatpush1.bf16.msra.mxu0 %v7192_v47  ;;  %4017 = vmatpush1.bf16.msra.mxu1 %v7193_v48  ;;  %v3466_v47 = vsel %vm1622_vm3, 1.0, %v7150_v0  ;;  %v3473_v48 = vsel %vm1976_vm4, 1.0, %v7150_v0 }
 0x2d4   :  { %3955 = vmatprep.subr.bf16.mxu0 %v7194_v52  ;;  %4019 = vmatprep.subr.bf16.mxu1 %v7195_v58  ;;  %v5001_v41 = vpack.i.bf16 %v3473_v48, %v3466_v47 }
 0x2d6   :  { %5002 = vperm.xlu0 %4995, %v5001_v41  }
 0x2d7   :  { %3957 = vmatpush1.bf16.msra.mxu0 %v7196_v3  ;;  %4021 = vmatpush1.bf16.msra.mxu1 %v7197_v4 }
 0x2d8   :  { %4023 = vmatprep.subr.bf16.mxu0 %v7198_v32  ;;  %4055 = vmatprep.subr.bf16.mxu1 %v7199_v30 }
 0x34d   :  { %v1168_v52 = vpop.f32.mrb[22].mxu0  ;;  %v1239_v58 = vpop.f32.mrb[22].mxu1 }
 0x34e   :  { %v1169_v3 = vadd.f32 %v1168_v52, %v7201_v36  ;;  %v1170_v23 = vpop.f32.mrb[23].mxu0  ;;  %v1241_v4 = vpop.f32.mrb[23].mxu1  ;;  %v1240_v31 = vadd.f32 %v1239_v58, %v7203_v1 }
 0x34f   :  { %v1171_v32 = vadd.f32 %v1170_v23, %v7202_v19  ;;  %v1242_v7 = vadd.f32 %v1241_v4, %v7204_v12  ;;  %v7208_v19 = vld [vmem:[#allocation82_spill] sm:$0xff] }
 0x350   :  { %v3456_v18 = vmul.f32 -1.442695, %v1169_v3  ;;  %v3458_v5 = vmul.f32 -1.442695, %v1240_v31  ;;  %v7205_v31 = vld [vmem:[#allocation78_spill] sm:$0xff] }
 0x351   :  { %v3457_v30 = vmul.f32 -1.442695, %v1171_v32 }
 0x352   :  { %5075 = vpow2.f32 %v3456_v18 }
 0x353   :  { %5077 = vpow2.f32 %v3457_v30 }
 0x354   :  { %5079 = vtanh.f32 %v1242_v7  ;;  %v7206_v7 = vld [vmem:[#allocation80_spill] sm:$0xff] }
 0x355   :  { %5081 = vpow2.f32 %v3458_v5 }
 0x35c   :  { %v5076_v2 = vpop.eup %5075 }
 0x35d   :  { %v1253_v47 = vadd.f32 1.0, %v5076_v2  ;;  %v5078_v41 = vpop.eup %5077 }
 0x35e   :  { %v1254_v48 = vadd.f32 1.0, %v5078_v41  ;;  %v5080_v52 = vpop.eup %5079  ;;  %v7207_v41 = vld [vmem:[#allocation79_spill] sm:$0xff] }
 0x35f   :  { %5083 = vrcp.f32 %v1253_v47  ;;  %v5082_v36 = vpop.eup %5081 }
 0x360   :  { %5085 = vrcp.f32 %v1254_v48  ;;  %v1255_v18 = vadd.f32 1.0, %v5082_v36 }
 0x362   :  { %5087 = vrcp.f32 %v1255_v18 }
 0x369   :  { %v5084_v23 = vpop.eup %5083 }
 0x36a   :  { %v1264_v3 = vmul.f32 %v5084_v23, %v5080_v52  ;;  %v5086_v32 = vpop.eup %5085  ;;  %v5000_v23 = vunpack.i.h.bf16 %v6090_v45 }
 0x36b   :  { %v1263_v30 = vmul.f32 %v5086_v32, %v6083_v27 }
 0x36c   :  { %v5088_v27 = vpop.eup %5087 }
 0x36d   :  { %v1352_v58 = vpop.f32.mrb[24].mxu0  ;;  %v1423_v1 = vpop.f32.mrb[24].mxu1  ;;  %v6204_v4 = vadd.f32 %v1264_v3, %v1263_v30 }
 0x36e   :  { %v1428_v2 = vadd.f32 %v1352_v58, %v7205_v31  ;;  %v1430_v12 = vadd.f32 %v1423_v1, %v7206_v7  ;;  %v1354_v5 = vpop.f32.mrb[25].mxu0  ;;  %v1425_v47 = vpop.f32.mrb[25].mxu1 }
 0x36f   :  { %v1429_v48 = vadd.f32 %v1354_v5, %v7207_v41  ;;  %v1431_v61 = vadd.f32 %v1425_v47, %v7208_v19  ;;  %5089 = vtanh.f32 %v6204_v4 }
 0x370   :  { %v3460_v52 = vmul.f32 -1.442695, %v1428_v2  ;;  %v3462_v32 = vmul.f32 -1.442695, %v1430_v12 }
 0x371   :  { %v3461_v36 = vmul.f32 -1.442695, %v1429_v48 }
 0x372   :  { %5091 = vpow2.f32 %v3460_v52 }
 0x373   :  { %5093 = vpow2.f32 %v3461_v36 }
 0x374   :  { %5095 = vtanh.f32 %v1431_v61 }
 0x375   :  { %5097 = vpow2.f32 %v3462_v32  ;;  %v7213_v32 = vld [vmem:[#allocation20_spill] sm:$0xff] }
 0x379   :  { %v5090_v3 = vpop.eup %5089 }
 0x37a   :  { %v1267_v30 = vmul.f32 %v5090_v3, %v5088_v27  ;;  %v7210_v27 = vld [vmem:[#allocation108_spill] sm:$0xff]  ;;  %v7212_v3 = vld [vmem:[#allocation19_spill] sm:$0xff] }
 0x37c   :  { %v5092_v1 = vpop.eup %5091  ;;  %v1276_v18 = vmul.f32 %v5000_v23, %v1267_v30  ;;  %1520 = vmatprep.mubr.f32.mxu0 %v1267_v30  ;;  %1591 = vmatprep.mubr.f32.mxu1 %v1267_v30  ;;  %v7211_v23 = vld [vmem:[#allocation18_spill] sm:$0xff]  ;;  %v7214_v30 = vld [vmem:[#allocation21_spill] sm:$0xff] }
 0x37d   :  { %v1441_v58 = vadd.f32 1.0, %v5092_v1  ;;  %v5094_v31 = vpop.eup %5093  ;;  %v7215_v1 = vld [vmem:[#allocation22_spill] sm:$0xff] }
 0x37e   :  { %v1442_v19 = vadd.f32 1.0, %v5094_v31  ;;  %1278 = vst [vmem:[#allocation11 + $0x8] sm:$0xff] %v1276_v18  ;;  %v5096_v2 = vpop.eup %5095  ;;  %v7217_v18 = vld [vmem:[#allocation24_spill] sm:$0xff]  ;;  %v7218_v31 = vld [vmem:[#allocation25_spill] sm:$0xff] }
 0x37f   :  { %5099 = vrcp.f32 %v1441_v58  ;;  %v5098_v7 = vpop.eup %5097  ;;  %v7216_v58 = vld [vmem:[#allocation23_spill] sm:$0xff] }
 0x380   :  { %5101 = vrcp.f32 %v1442_v19  ;;  %v1443_v41 = vadd.f32 1.0, %v5098_v7  ;;  %v7219_v19 = vld [vmem:[#allocation26_spill] sm:$0xff]  ;;  %v7221_v7 = vld [vmem:[#allocation28_spill] sm:$0xff] }
 0x382   :  { %5103 = vrcp.f32 %v1443_v41  ;;  %v7225_v41 = vld [vmem:[#allocation32_spill] sm:$0xff] }
 0x389   :  { %v5100_v5 = vpop.eup %5099 }
 0x38a   :  { %v1452_v47 = vmul.f32 %v5100_v5, %v5096_v2  ;;  %v5102_v45 = vpop.eup %5101  ;;  %v7220_v2 = vld [vmem:[#allocation27_spill] sm:$0xff]  ;;  %v7222_v5 = vld [vmem:[#allocation29_spill] sm:$0xff] }
 0x38b   :  { %v1451_v12 = vmul.f32 %v5102_v45, %v6094_v13  ;;  %v7209_v13 = vld [vmem:[#allocation107_spill] sm:$0xff] }
 0x38c   :  { %v5104_v61 = vpop.eup %5103  ;;  %v7224_v45 = vld [vmem:[#allocation31_spill] sm:$0xff] }
 0x38d   :  { %v6213_v48 = vadd.f32 %v1452_v47, %v1451_v12  ;;  %v7223_v47 = vld [vmem:[#allocation30_spill] sm:$0xff]  ;;  %v7226_v12 = vld [vmem:[#allocation33_spill] sm:$0xff] }
 0x38f   :  { %5105 = vtanh.f32 %v6213_v48 }
 0x399   :  { %v5106_v52 = vpop.eup %5105 }
 0x39a   :  { %v1455_v36 = vmul.f32 %v5106_v52, %v5104_v61  ;;  %v7227_v61 = vld [vmem:[#allocation34_spill] sm:$0xff]  ;;  %v7228_v52 = vld [vmem:[#allocation35_spill] sm:$0xff] }
 0x39c   :  { %1521 = vmatmul.mubr.f32.vlgmr.msra.gmra.mrb[26].mxu0 %v1455_v36  ;;  %1592 = vmatmul.mubr.f32.vlgmr.msra.gmra.mrb[26].mxu1 %v1455_v36 }
 0x39d   :  { %4025 = vmatpush1.bf16.msra.mxu0 %v7147_v38  ;;  %4057 = vmatpush1.bf16.msra.mxu1 %v7148_v21 }
 0x39e   :  { %4027 = vmatprep.subr.bf16.mxu0 %v5902_v54  ;;  %4059 = vmatprep.subr.bf16.mxu1 %v7149_v11 }
 0x39f   :  { %1704 = vmatprep.mubr.f32.mxu0 %v7150_v0  ;;  %1775 = vmatprep.mubr.f32.mxu1 %v7150_v0 }
 0x3a1   :  { %4029 = vmatpush1.bf16.msra.mxu0 %v7151_v20  ;;  %4061 = vmatpush1.bf16.msra.mxu1 %v7209_v13 }
 0x3a2   :  { %4031 = vmatprep.subr.bf16.mxu0 %v7210_v27  ;;  %4063 = vmatprep.subr.bf16.mxu1 %v7154_v14 }
 0x3a5   :  { %4033 = vmatpush1.bf16.msra.mxu0 %v7155_v53  ;;  %4065 = vmatpush1.bf16.msra.mxu1 %v7156_v40 }
 0x3a6   :  { %4035 = vmatprep.subr.bf16.mxu0 %v7157_v37  ;;  %4067 = vmatprep.subr.bf16.mxu1 %v7158_v46 }
 0x3a9   :  { %4037 = vmatpush1.bf16.msra.mxu0 %v7159_v63  ;;  %4069 = vmatpush1.bf16.msra.mxu1 %v7160_v62 }
 0x3aa   :  { %4039 = vmatprep.subr.bf16.mxu0 %v7161_v9  ;;  %4071 = vmatprep.subr.bf16.mxu1 %v7162_v16 }
 0x3ad   :  { %4041 = vmatpush1.bf16.msra.mxu0 %v7163_v8  ;;  %4073 = vmatpush1.bf16.msra.mxu1 %v7164_v10 }
 0x3ae   :  { %4043 = vmatprep.subr.bf16.mxu0 %v5954_v42  ;;  %4075 = vmatprep.subr.bf16.mxu1 %v5956_v15 }
 0x3b1   :  { %4045 = vmatpush1.bf16.msra.mxu0 %v5960_v22  ;;  %4077 = vmatpush1.bf16.msra.mxu1 %v5962_v50 }
 0x3b2   :  { %4047 = vmatprep.subr.bf16.mxu0 %v5966_v49  ;;  %4079 = vmatprep.subr.bf16.mxu1 %v5968_v33 }
 0x3b5   :  { %4049 = vmatpush1.bf16.msra.mxu0 %v5972_v6  ;;  %4081 = vmatpush1.bf16.msra.mxu1 %v5974_v59 }
 0x3b6   :  { %4051 = vmatprep.subr.bf16.mxu0 %v5978_v57  ;;  %4083 = vmatprep.subr.bf16.mxu1 %v5980_v28 }
 0x3b9   :  { %4053 = vmatpush1.bf16.msra.mxu0 %v5984_v26  ;;  %4085 = vmatpush1.bf16.msra.mxu1 %v5986_v17 }
 0x3ba   :  { %4087 = vmatprep.subr.bf16.mxu0 %v5549_v24  ;;  %4151 = vmatprep.subr.bf16.mxu1 %v5551_v25 }
 0x3bc   :  { %1705 = vmatmul.mubr.f32.vlgmr.msra.gmra.mrb[28].mxu0 %v1455_v36  ;;  %1776 = vmatmul.mubr.f32.vlgmr.msra.gmra.mrb[28].mxu1 %v1455_v36  ;;  %v7229_v36 = vld [vmem:[#allocation36_spill] sm:$0xff] }
 0x3bd   :  { %4089 = vmatpush1.bf16.msra.mxu0 %v5555_v29  ;;  %4153 = vmatpush1.bf16.msra.mxu1 %v5562_v34 }
 0x3be   :  { %4091 = vmatprep.subr.bf16.mxu0 %v5564_v35  ;;  %4155 = vmatprep.subr.bf16.mxu1 %v5568_v39 }
 0x3c1   :  { %4093 = vmatpush1.bf16.msra.mxu0 %v5572_v43  ;;  %4157 = vmatpush1.bf16.msra.mxu1 %v5574_v44 }
 0x3c2   :  { %4095 = vmatprep.subr.bf16.mxu0 %v5577_v51  ;;  %4159 = vmatprep.subr.bf16.mxu1 %v5580_v55 }
 0x3c5   :  { %4097 = vmatpush1.bf16.msra.mxu0 %v5582_v56  ;;  %4161 = vmatpush1.bf16.msra.mxu1 %v5586_v60 }
 0x3c6   :  { %4099 = vmatprep.subr.bf16.mxu0 %v7211_v23  ;;  %4163 = vmatprep.subr.bf16.mxu1 %v7212_v3 }
 0x3c9   :  { %4101 = vmatpush1.bf16.msra.mxu0 %v7213_v32  ;;  %4165 = vmatpush1.bf16.msra.mxu1 %v7214_v30  ;;  %v7268_v30 = vld [vmem:[#allocation122_spill] sm:$0xff] }
 0x3ca   :  { %4103 = vmatprep.subr.bf16.mxu0 %v7215_v1  ;;  %4167 = vmatprep.subr.bf16.mxu1 %v7216_v58  ;;  %v7266_v58 = vld [vmem:[#allocation120_spill] sm:$0xff] }
 0x3cd   :  { %4105 = vmatpush1.bf16.msra.mxu0 %v7217_v18  ;;  %4169 = vmatpush1.bf16.msra.mxu1 %v7218_v31  ;;  %v7265_v31 = vld [vmem:[#allocation73_spill] sm:$0xff] }
 0x3ce   :  { %4107 = vmatprep.subr.bf16.mxu0 %v7219_v19  ;;  %4171 = vmatprep.subr.bf16.mxu1 %v7220_v2  ;;  %v7230_v19 = vld [vmem:[#allocation37_spill] sm:$0xff]  ;;  %v7231_v2 = vld [vmem:[#allocation38_spill] sm:$0xff] }
 0x3d1   :  { %4109 = vmatpush1.bf16.msra.mxu0 %v7221_v7  ;;  %4173 = vmatpush1.bf16.msra.mxu1 %v7222_v5  ;;  %v7232_v7 = vld [vmem:[#allocation39_spill] sm:$0xff]  ;;  %v7233_v5 = vld [vmem:[#allocation40_spill] sm:$0xff] }
 0x3d2   :  { %4111 = vmatprep.subr.bf16.mxu0 %v7223_v47  ;;  %4175 = vmatprep.subr.bf16.mxu1 %v7224_v45  ;;  %v7234_v47 = vld [vmem:[#allocation41_spill] sm:$0xff]  ;;  %v7235_v45 = vld [vmem:[#allocation42_spill] sm:$0xff] }
 0x3d5   :  { %4113 = vmatpush1.bf16.msra.mxu0 %v7225_v41  ;;  %4177 = vmatpush1.bf16.msra.mxu1 %v7226_v12  ;;  %v7236_v41 = vld [vmem:[#allocation43_spill] sm:$0xff]  ;;  %v7237_v12 = vld [vmem:[#allocation44_spill] sm:$0xff] }
 0x3d6   :  { %4115 = vmatprep.subr.bf16.mxu0 %v7227_v61  ;;  %4179 = vmatprep.subr.bf16.mxu1 %v7228_v52  ;;  %v7238_v61 = vld [vmem:[#allocation45_spill] sm:$0xff]  ;;  %v7239_v52 = vld [vmem:[#allocation46_spill] sm:$0xff] }
 0x3d9   :  { %4117 = vmatpush1.bf16.msra.mxu0 %v7229_v36  ;;  %4181 = vmatpush1.bf16.msra.mxu1 %v7230_v19  ;;  %v7240_v36 = vld [vmem:[#allocation47_spill] sm:$0xff]  ;;  %v7241_v19 = vld [vmem:[#allocation48_spill] sm:$0xff] }
 0x3da   :  { %4119 = vmatprep.subr.bf16.mxu0 %v7231_v2  ;;  %4183 = vmatprep.subr.bf16.mxu1 %v7232_v7  ;;  %v7242_v2 = vld [vmem:[#allocation49_spill] sm:$0xff]  ;;  %v7243_v7 = vld [vmem:[#allocation50_spill] sm:$0xff] }
 0x3dd   :  { %4121 = vmatpush1.bf16.msra.mxu0 %v7233_v5  ;;  %4185 = vmatpush1.bf16.msra.mxu1 %v7234_v47  ;;  %v7244_v5 = vld [vmem:[#allocation51_spill] sm:$0xff]  ;;  %v7245_v47 = vld [vmem:[#allocation52_spill] sm:$0xff] }
 0x3de   :  { %4123 = vmatprep.subr.bf16.mxu0 %v7235_v45  ;;  %4187 = vmatprep.subr.bf16.mxu1 %v7236_v41  ;;  %v7246_v45 = vld [vmem:[#allocation53_spill] sm:$0xff]  ;;  %v7247_v41 = vld [vmem:[#allocation54_spill] sm:$0xff] }
 0x3e1   :  { %4125 = vmatpush1.bf16.msra.mxu0 %v7237_v12  ;;  %4189 = vmatpush1.bf16.msra.mxu1 %v7238_v61  ;;  %v7248_v12 = vld [vmem:[#allocation55_spill] sm:$0xff]  ;;  %v7249_v61 = vld [vmem:[#allocation56_spill] sm:$0xff] }
 0x3e2   :  { %4127 = vmatprep.subr.bf16.mxu0 %v7239_v52  ;;  %4191 = vmatprep.subr.bf16.mxu1 %v7240_v36  ;;  %v7250_v52 = vld [vmem:[#allocation57_spill] sm:$0xff]  ;;  %v7251_v36 = vld [vmem:[#allocation58_spill] sm:$0xff] }
 0x3e5   :  { %4129 = vmatpush1.bf16.msra.mxu0 %v7241_v19  ;;  %4193 = vmatpush1.bf16.msra.mxu1 %v7242_v2  ;;  %v7252_v19 = vld [vmem:[#allocation59_spill] sm:$0xff]  ;;  %v7253_v2 = vld [vmem:[#allocation60_spill] sm:$0xff] }
 0x3e6   :  { %4131 = vmatprep.subr.bf16.mxu0 %v7243_v7  ;;  %4195 = vmatprep.subr.bf16.mxu1 %v7244_v5  ;;  %v7254_v7 = vld [vmem:[#allocation61_spill] sm:$0xff]  ;;  %v7255_v5 = vld [vmem:[#allocation62_spill] sm:$0xff] }
 0x3e9   :  { %4133 = vmatpush1.bf16.msra.mxu0 %v7245_v47  ;;  %4197 = vmatpush1.bf16.msra.mxu1 %v7246_v45  ;;  %v7256_v47 = vld [vmem:[#allocation63_spill] sm:$0xff]  ;;  %v7257_v45 = vld [vmem:[#allocation64_spill] sm:$0xff] }
 0x3ea   :  { %4135 = vmatprep.subr.bf16.mxu0 %v7247_v41  ;;  %4199 = vmatprep.subr.bf16.mxu1 %v7248_v12  ;;  %v7258_v41 = vld [vmem:[#allocation65_spill] sm:$0xff]  ;;  %v7259_v12 = vld [vmem:[#allocation66_spill] sm:$0xff] }
 0x3ed   :  { %4137 = vmatpush1.bf16.msra.mxu0 %v7249_v61  ;;  %4201 = vmatpush1.bf16.msra.mxu1 %v7250_v52  ;;  %v7260_v61 = vld [vmem:[#allocation67_spill] sm:$0xff]  ;;  %v7261_v52 = vld [vmem:[#allocation68_spill] sm:$0xff] }
 0x3ee   :  { %4139 = vmatprep.subr.bf16.mxu0 %v7251_v36  ;;  %4203 = vmatprep.subr.bf16.mxu1 %v7252_v19  ;;  %v7262_v36 = vld [vmem:[#allocation69_spill] sm:$0xff]  ;;  %v7263_v19 = vld [vmem:[#allocation70_spill] sm:$0xff] }
 0x3f1   :  { %4141 = vmatpush1.bf16.msra.mxu0 %v7253_v2  ;;  %4205 = vmatpush1.bf16.msra.mxu1 %v7254_v7  ;;  %v7264_v2 = vld [vmem:[#allocation71_spill] sm:$0xff] }
 0x3f2   :  { %4143 = vmatprep.subr.bf16.mxu0 %v7255_v5  ;;  %4207 = vmatprep.subr.bf16.mxu1 %v7256_v47 }
 0x3f5   :  { %4145 = vmatpush1.bf16.msra.mxu0 %v7257_v45  ;;  %4209 = vmatpush1.bf16.msra.mxu1 %v7258_v41 }
 0x3f6   :  { %4147 = vmatprep.subr.bf16.mxu0 %v7259_v12  ;;  %4211 = vmatprep.subr.bf16.mxu1 %v7260_v61  ;;  %v7267_v61 = vld [vmem:[#allocation121_spill] sm:$0xff] }
 0x3f9   :  { %4149 = vmatpush1.bf16.msra.mxu0 %v7261_v52  ;;  %4213 = vmatpush1.bf16.msra.mxu1 %v7262_v36 }
 0x3fa   :  { %4215 = vmatprep.subr.bf16.mxu0 %v7263_v19  ;;  %4247 = vmatprep.subr.bf16.mxu1 %v7264_v2 }
 0x46f   :  { %v1522_v7 = vpop.f32.mrb[26].mxu0  ;;  %v1593_v5 = vpop.f32.mrb[26].mxu1 }
 0x470   :  { %v1523_v47 = vadd.f32 %v1522_v7, %v7265_v31  ;;  %v1524_v18 = vpop.f32.mrb[27].mxu0  ;;  %v1595_v45 = vpop.f32.mrb[27].mxu1  ;;  %v1594_v52 = vadd.f32 %v1593_v5, %v7267_v61 }
 0x471   :  { %v1525_v41 = vadd.f32 %v1524_v18, %v7266_v58  ;;  %v1596_v36 = vadd.f32 %v1595_v45, %v7268_v30  ;;  %v7272_v58 = vld [vmem:[#allocation85_spill] sm:$0xff] }
 0x472   :  { %v3463_v1 = vmul.f32 -1.442695, %v1523_v47  ;;  %v3465_v32 = vmul.f32 -1.442695, %v1594_v52  ;;  %v7269_v52 = vld [vmem:[#allocation81_spill] sm:$0xff] }
 0x473   :  { %v3464_v12 = vmul.f32 -1.442695, %v1525_v41 }
 0x474   :  { %5107 = vpow2.f32 %v3463_v1 }
 0x475   :  { %5109 = vpow2.f32 %v3464_v12 }
 0x476   :  { %5111 = vtanh.f32 %v1596_v36  ;;  %v7270_v36 = vld [vmem:[#allocation84_spill] sm:$0xff] }
 0x477   :  { %5113 = vpow2.f32 %v3465_v32 }
 0x47e   :  { %v5108_v19 = vpop.eup %5107 }
 0x47f   :  { %v1607_v3 = vadd.f32 1.0, %v5108_v19  ;;  %v5110_v2 = vpop.eup %5109 }
 0x480   :  { %v1608_v7 = vadd.f32 1.0, %v5110_v2  ;;  %v5112_v31 = vpop.eup %5111  ;;  %v7271_v2 = vld [vmem:[#allocation83_spill] sm:$0xff] }
 0x481   :  { %5115 = vrcp.f32 %v1607_v3  ;;  %v5114_v23 = vpop.eup %5113 }
 0x482   :  { %5117 = vrcp.f32 %v1608_v7  ;;  %v1609_v1 = vadd.f32 1.0, %v5114_v23 }
 0x484   :  { %5119 = vrcp.f32 %v1609_v1 }
 0x48b   :  { %v5116_v18 = vpop.eup %5115 }
 0x48c   :  { %v1618_v47 = vmul.f32 %v5116_v18, %v5112_v31  ;;  %v5118_v41 = vpop.eup %5117 }
 0x48d   :  { %v1617_v12 = vmul.f32 %v5118_v41, %v6204_v4  ;;  %v6326_v4 = vpop.permute.xlu0 %5002 }
 0x48e   :  { %v5120_v18 = vpop.eup %5119 }
 0x48f   :  { %v1706_v5 = vpop.f32.mrb[28].mxu0  ;;  %v1777_v61 = vpop.f32.mrb[28].mxu1  ;;  %v6319_v45 = vadd.f32 %v1618_v47, %v1617_v12  ;;  %v5004_v47 = vunpack.i.l.bf16 %v6326_v4 }
 0x490   :  { %v1782_v19 = vadd.f32 %v1706_v5, %v7269_v52  ;;  %v1784_v30 = vadd.f32 %v1777_v61, %v7270_v36  ;;  %v1708_v32 = vpop.f32.mrb[29].mxu0  ;;  %v1779_v3 = vpop.f32.mrb[29].mxu1 }
 0x491   :  { %v1783_v7 = vadd.f32 %v1708_v32, %v7271_v2  ;;  %v1785_v60 = vadd.f32 %v1779_v3, %v7272_v58  ;;  %5121 = vtanh.f32 %v6319_v45 }
 0x492   :  { %v3467_v23 = vmul.f32 -1.442695, %v1782_v19  ;;  %v3469_v61 = vmul.f32 -1.442695, %v1784_v30 }
 0x493   :  { %v3468_v31 = vmul.f32 -1.442695, %v1783_v7 }
 0x494   :  { %5123 = vpow2.f32 %v3467_v23 }
 0x495   :  { %5125 = vpow2.f32 %v3468_v31 }
 0x496   :  { %5127 = vtanh.f32 %v1785_v60 }
 0x497   :  { %5129 = vpow2.f32 %v3469_v61  ;;  %v7275_v61 = vld [vmem:[#allocation19_spill] sm:$0xff] }
 0x49b   :  { %v5122_v41 = vpop.eup %5121 }
 0x49c   :  { %v1621_v12 = vmul.f32 %v5122_v41, %v5120_v18  ;;  %v7274_v41 = vld [vmem:[#allocation18_spill] sm:$0xff] }
 0x49e   :  { %v5124_v5 = vpop.eup %5123  ;;  %v1630_v52 = vmul.f32 %v5004_v47, %v1621_v12  ;;  %1874 = vmatprep.mubr.f32.mxu0 %v1621_v12  ;;  %1945 = vmatprep.mubr.f32.mxu1 %v1621_v12  ;;  %v7276_v12 = vld [vmem:[#allocation20_spill] sm:$0xff] }
 0x49f   :  { %v1795_v1 = vadd.f32 1.0, %v5124_v5  ;;  %v5126_v58 = vpop.eup %5125  ;;  %v7277_v5 = vld [vmem:[#allocation21_spill] sm:$0xff] }
 0x4a0   :  { %v1796_v19 = vadd.f32 1.0, %v5126_v58  ;;  %1632 = vst [vmem:[#allocation11 + $0x10] sm:$0xff] %v1630_v52  ;;  %v5128_v36 = vpop.eup %5127  ;;  %v7279_v52 = vld [vmem:[#allocation23_spill] sm:$0xff]  ;;  %v7280_v58 = vld [vmem:[#allocation24_spill] sm:$0xff] }
 0x4a1   :  { %5131 = vrcp.f32 %v1795_v1  ;;  %v5130_v32 = vpop.eup %5129  ;;  %v7278_v1 = vld [vmem:[#allocation22_spill] sm:$0xff] }
 0x4a2   :  { %5133 = vrcp.f32 %v1796_v19  ;;  %v1797_v23 = vadd.f32 1.0, %v5130_v32  ;;  %v7281_v19 = vld [vmem:[#allocation25_spill] sm:$0xff]  ;;  %v7283_v32 = vld [vmem:[#allocation27_spill] sm:$0xff] }
 0x4a4   :  { %5135 = vrcp.f32 %v1797_v23  ;;  %v7287_v23 = vld [vmem:[#allocation31_spill] sm:$0xff] }
 0x4ab   :  { %v5132_v3 = vpop.eup %5131 }
 0x4ac   :  { %v1806_v2 = vmul.f32 %v5132_v3, %v5128_v36  ;;  %v5134_v7 = vpop.eup %5133  ;;  %v7282_v36 = vld [vmem:[#allocation26_spill] sm:$0xff]  ;;  %v7284_v3 = vld [vmem:[#allocation28_spill] sm:$0xff] }
 0x4ad   :  { %v1805_v30 = vmul.f32 %v5134_v7, %v6213_v48  ;;  %v7273_v48 = vld [vmem:[#allocation17_spill] sm:$0xff]  ;;  %v7286_v7 = vld [vmem:[#allocation30_spill] sm:$0xff] }
 0x4ae   :  { %v5136_v60 = vpop.eup %5135 }
 0x4af   :  { %v6330_v31 = vadd.f32 %v1806_v2, %v1805_v30  ;;  %v7285_v2 = vld [vmem:[#allocation29_spill] sm:$0xff]  ;;  %v7288_v30 = vld [vmem:[#allocation32_spill] sm:$0xff] }
 0x4b1   :  { %5137 = vtanh.f32 %v6330_v31 }
 0x4bb   :  { %v5138_v18 = vpop.eup %5137 }
 0x4bc   :  { %v1809_v47 = vmul.f32 %v5138_v18, %v5136_v60  ;;  %v7289_v60 = vld [vmem:[#allocation33_spill] sm:$0xff]  ;;  %v7290_v18 = vld [vmem:[#allocation34_spill] sm:$0xff] }
 0x4be   :  { %1875 = vmatmul.mubr.f32.vlgmr.msra.gmra.mrb[30].mxu0 %v1809_v47  ;;  %1946 = vmatmul.mubr.f32.vlgmr.msra.gmra.mrb[30].mxu1 %v1809_v47 }
 0x4bf   :  { %4217 = vmatpush1.bf16.msra.mxu0 %v7147_v38  ;;  %4249 = vmatpush1.bf16.msra.mxu1 %v7148_v21 }
 0x4c0   :  { %4219 = vmatprep.subr.bf16.mxu0 %v5902_v54  ;;  %4251 = vmatprep.subr.bf16.mxu1 %v7149_v11 }
 0x4c1   :  { %2058 = vmatprep.mubr.f32.mxu0 %v7150_v0  ;;  %2129 = vmatprep.mubr.f32.mxu1 %v7150_v0 }
 0x4c3   :  { %4221 = vmatpush1.bf16.msra.mxu0 %v7151_v20  ;;  %4253 = vmatpush1.bf16.msra.mxu1 %v7209_v13 }
 0x4c4   :  { %4223 = vmatprep.subr.bf16.mxu0 %v7210_v27  ;;  %4255 = vmatprep.subr.bf16.mxu1 %v7154_v14 }
 0x4c7   :  { %4225 = vmatpush1.bf16.msra.mxu0 %v7155_v53  ;;  %4257 = vmatpush1.bf16.msra.mxu1 %v7156_v40 }
 0x4c8   :  { %4227 = vmatprep.subr.bf16.mxu0 %v7157_v37  ;;  %4259 = vmatprep.subr.bf16.mxu1 %v7158_v46 }
 0x4cb   :  { %4229 = vmatpush1.bf16.msra.mxu0 %v7159_v63  ;;  %4261 = vmatpush1.bf16.msra.mxu1 %v7160_v62 }
 0x4cc   :  { %4231 = vmatprep.subr.bf16.mxu0 %v7161_v9  ;;  %4263 = vmatprep.subr.bf16.mxu1 %v7162_v16 }
 0x4cf   :  { %4233 = vmatpush1.bf16.msra.mxu0 %v7163_v8  ;;  %4265 = vmatpush1.bf16.msra.mxu1 %v7164_v10 }
 0x4d0   :  { %4235 = vmatprep.subr.bf16.mxu0 %v5954_v42  ;;  %4267 = vmatprep.subr.bf16.mxu1 %v5956_v15 }
 0x4d3   :  { %4237 = vmatpush1.bf16.msra.mxu0 %v5960_v22  ;;  %4269 = vmatpush1.bf16.msra.mxu1 %v5962_v50 }
 0x4d4   :  { %4239 = vmatprep.subr.bf16.mxu0 %v5966_v49  ;;  %4271 = vmatprep.subr.bf16.mxu1 %v5968_v33 }
 0x4d7   :  { %4241 = vmatpush1.bf16.msra.mxu0 %v5972_v6  ;;  %4273 = vmatpush1.bf16.msra.mxu1 %v5974_v59 }
 0x4d8   :  { %4243 = vmatprep.subr.bf16.mxu0 %v5978_v57  ;;  %4275 = vmatprep.subr.bf16.mxu1 %v5980_v28 }
 0x4db   :  { %4245 = vmatpush1.bf16.msra.mxu0 %v5984_v26  ;;  %4277 = vmatpush1.bf16.msra.mxu1 %v5986_v17 }
 0x4dc   :  { %4279 = vmatprep.subr.bf16.mxu0 %v5549_v24  ;;  %4343 = vmatprep.subr.bf16.mxu1 %v5551_v25 }
 0x4de   :  { %2059 = vmatmul.mubr.f32.vlgmr.msra.gmra.mrb[32].mxu0 %v1809_v47  ;;  %2130 = vmatmul.mubr.f32.vlgmr.msra.gmra.mrb[32].mxu1 %v1809_v47  ;;  %v7291_v47 = vld [vmem:[#allocation35_spill] sm:$0xff] }
 0x4df   :  { %4281 = vmatpush1.bf16.msra.mxu0 %v5555_v29  ;;  %4345 = vmatpush1.bf16.msra.mxu1 %v5562_v34 }
 0x4e0   :  { %4283 = vmatprep.subr.bf16.mxu0 %v5564_v35  ;;  %4347 = vmatprep.subr.bf16.mxu1 %v5568_v39 }
 0x4e3   :  { %4285 = vmatpush1.bf16.msra.mxu0 %v5572_v43  ;;  %4349 = vmatpush1.bf16.msra.mxu1 %v5574_v44 }
 0x4e4   :  { %4287 = vmatprep.subr.bf16.mxu0 %v5577_v51  ;;  %4351 = vmatprep.subr.bf16.mxu1 %v5580_v55 }
 0x4e7   :  { %4289 = vmatpush1.bf16.msra.mxu0 %v5582_v56  ;;  %4353 = vmatpush1.bf16.msra.mxu1 %v7273_v48 }
 0x4e8   :  { %4291 = vmatprep.subr.bf16.mxu0 %v7274_v41  ;;  %4355 = vmatprep.subr.bf16.mxu1 %v7275_v61 }
 0x4eb   :  { %4293 = vmatpush1.bf16.msra.mxu0 %v7276_v12  ;;  %4357 = vmatpush1.bf16.msra.mxu1 %v7277_v5  ;;  %v7331_v5 = vld [vmem:[#allocation121_spill] sm:$0xff]  ;;  %v7332_v12 = vld [vmem:[#allocation122_spill] sm:$0xff] }
 0x4ec   :  { %4295 = vmatprep.subr.bf16.mxu0 %v7278_v1  ;;  %4359 = vmatprep.subr.bf16.mxu1 %v7279_v52 }
 0x4ef   :  { %4297 = vmatpush1.bf16.msra.mxu0 %v7280_v58  ;;  %4361 = vmatpush1.bf16.msra.mxu1 %v7281_v19  ;;  %v7292_v19 = vld [vmem:[#allocation36_spill] sm:$0xff] }
 0x4f0   :  { %4299 = vmatprep.subr.bf16.mxu0 %v7282_v36  ;;  %4363 = vmatprep.subr.bf16.mxu1 %v7283_v32  ;;  %v7293_v36 = vld [vmem:[#allocation37_spill] sm:$0xff]  ;;  %v7294_v32 = vld [vmem:[#allocation38_spill] sm:$0xff] }
 0x4f3   :  { %4301 = vmatpush1.bf16.msra.mxu0 %v7284_v3  ;;  %4365 = vmatpush1.bf16.msra.mxu1 %v7285_v2  ;;  %v7295_v3 = vld [vmem:[#allocation39_spill] sm:$0xff]  ;;  %v7296_v2 = vld [vmem:[#allocation40_spill] sm:$0xff] }
 0x4f4   :  { %4303 = vmatprep.subr.bf16.mxu0 %v7286_v7  ;;  %4367 = vmatprep.subr.bf16.mxu1 %v7287_v23  ;;  %v7297_v7 = vld [vmem:[#allocation41_spill] sm:$0xff]  ;;  %v7298_v23 = vld [vmem:[#allocation42_spill] sm:$0xff] }
 0x4f7   :  { %4305 = vmatpush1.bf16.msra.mxu0 %v7288_v30  ;;  %4369 = vmatpush1.bf16.msra.mxu1 %v7289_v60  ;;  %v7299_v30 = vld [vmem:[#allocation43_spill] sm:$0xff]  ;;  %v7300_v60 = vld [vmem:[#allocation44_spill] sm:$0xff] }
 0x4f8   :  { %4307 = vmatprep.subr.bf16.mxu0 %v7290_v18  ;;  %4371 = vmatprep.subr.bf16.mxu1 %v7291_v47  ;;  %v7301_v18 = vld [vmem:[#allocation45_spill] sm:$0xff]  ;;  %v7302_v47 = vld [vmem:[#allocation46_spill] sm:$0xff] }
 0x4fb   :  { %4309 = vmatpush1.bf16.msra.mxu0 %v7292_v19  ;;  %4373 = vmatpush1.bf16.msra.mxu1 %v7293_v36  ;;  %v7303_v19 = vld [vmem:[#allocation47_spill] sm:$0xff]  ;;  %v7304_v36 = vld [vmem:[#allocation48_spill] sm:$0xff] }
 0x4fc   :  { %4311 = vmatprep.subr.bf16.mxu0 %v7294_v32  ;;  %4375 = vmatprep.subr.bf16.mxu1 %v7295_v3  ;;  %v7305_v32 = vld [vmem:[#allocation49_spill] sm:$0xff]  ;;  %v7306_v3 = vld [vmem:[#allocation50_spill] sm:$0xff] }
 0x4ff   :  { %4313 = vmatpush1.bf16.msra.mxu0 %v7296_v2  ;;  %4377 = vmatpush1.bf16.msra.mxu1 %v7297_v7  ;;  %v7307_v2 = vld [vmem:[#allocation51_spill] sm:$0xff]  ;;  %v7308_v7 = vld [vmem:[#allocation52_spill] sm:$0xff] }
 0x500   :  { %4315 = vmatprep.subr.bf16.mxu0 %v7298_v23  ;;  %4379 = vmatprep.subr.bf16.mxu1 %v7299_v30  ;;  %v7309_v23 = vld [vmem:[#allocation53_spill] sm:$0xff]  ;;  %v7310_v30 = vld [vmem:[#allocation54_spill] sm:$0xff] }
 0x503   :  { %4317 = vmatpush1.bf16.msra.mxu0 %v7300_v60  ;;  %4381 = vmatpush1.bf16.msra.mxu1 %v7301_v18  ;;  %v7311_v60 = vld [vmem:[#allocation55_spill] sm:$0xff]  ;;  %v7312_v18 = vld [vmem:[#allocation56_spill] sm:$0xff] }
 0x504   :  { %4319 = vmatprep.subr.bf16.mxu0 %v7302_v47  ;;  %4383 = vmatprep.subr.bf16.mxu1 %v7303_v19  ;;  %v7313_v47 = vld [vmem:[#allocation57_spill] sm:$0xff]  ;;  %v7314_v19 = vld [vmem:[#allocation58_spill] sm:$0xff] }
 0x507   :  { %4321 = vmatpush1.bf16.msra.mxu0 %v7304_v36  ;;  %4385 = vmatpush1.bf16.msra.mxu1 %v7305_v32  ;;  %v7315_v36 = vld [vmem:[#allocation59_spill] sm:$0xff]  ;;  %v7316_v32 = vld [vmem:[#allocation60_spill] sm:$0xff] }
 0x508   :  { %4323 = vmatprep.subr.bf16.mxu0 %v7306_v3  ;;  %4387 = vmatprep.subr.bf16.mxu1 %v7307_v2  ;;  %v7317_v3 = vld [vmem:[#allocation61_spill] sm:$0xff]  ;;  %v7318_v2 = vld [vmem:[#allocation62_spill] sm:$0xff] }
 0x50b   :  { %4325 = vmatpush1.bf16.msra.mxu0 %v7308_v7  ;;  %4389 = vmatpush1.bf16.msra.mxu1 %v7309_v23  ;;  %v7319_v7 = vld [vmem:[#allocation63_spill] sm:$0xff]  ;;  %v7320_v23 = vld [vmem:[#allocation64_spill] sm:$0xff] }
 0x50c   :  { %4327 = vmatprep.subr.bf16.mxu0 %v7310_v30  ;;  %4391 = vmatprep.subr.bf16.mxu1 %v7311_v60  ;;  %v7321_v30 = vld [vmem:[#allocation65_spill] sm:$0xff]  ;;  %v7322_v60 = vld [vmem:[#allocation66_spill] sm:$0xff] }
 0x50f   :  { %4329 = vmatpush1.bf16.msra.mxu0 %v7312_v18  ;;  %4393 = vmatpush1.bf16.msra.mxu1 %v7313_v47  ;;  %v7323_v18 = vld [vmem:[#allocation67_spill] sm:$0xff]  ;;  %v7324_v47 = vld [vmem:[#allocation68_spill] sm:$0xff] }
 0x510   :  { %4331 = vmatprep.subr.bf16.mxu0 %v7314_v19  ;;  %4395 = vmatprep.subr.bf16.mxu1 %v7315_v36  ;;  %v7325_v19 = vld [vmem:[#allocation69_spill] sm:$0xff]  ;;  %v7326_v36 = vld [vmem:[#allocation70_spill] sm:$0xff] }
 0x513   :  { %4333 = vmatpush1.bf16.msra.mxu0 %v7316_v32  ;;  %4397 = vmatpush1.bf16.msra.mxu1 %v7317_v3  ;;  %v7327_v32 = vld [vmem:[#allocation71_spill] sm:$0xff]  ;;  %v7330_v3 = vld [vmem:[#allocation120_spill] sm:$0xff] }
 0x514   :  { %4335 = vmatprep.subr.bf16.mxu0 %v7318_v2  ;;  %4399 = vmatprep.subr.bf16.mxu1 %v7319_v7  ;;  %v6434_v7 = vld [vmem:[%s6825_s2] sm:$0xff]  ;;  %s5412_s2 = smov [#allocation11]  }
 0x515   :  { %7328 = vst [vmem:[#allocation74_spill] sm:$0xff] %v6434_v7  ;;  %vm2330_vm5 = vcmp.gt.s32.totalorder %v6434_v7, 4  ;;  %vm2684_vm6 = vcmp.gt.s32.totalorder %v6434_v7, 5  ;;  %s3407_s17 = sshll.u32 %s5412_s2, 4  ;;  %s3408_s17 = int_to_ptr.vmem [resolvable:$true] %s3407_s17 }
 0x516   :  { %s5372_s18 = scalar_lea.vmem %s3408_s17, 1024  ;;  %p5377_p5 = scmp.lt.s32.totalorder %s3408_s17, %s3408_s17 }
 0x517   :  { %4337 = vmatpush1.bf16.msra.mxu0 %v7320_v23  ;;  %4401 = vmatpush1.bf16.msra.mxu1 %v7321_v30  ;;  %p5373_p4 = scmp.ne.s32.totalorder %s3408_s17, %s5372_s18  ;;  %p5378_p6 = scmp.lt.s32.totalorder %s5372_s18, %s5372_s18 }
 0x518   :  { %4339 = vmatprep.subr.bf16.mxu0 %v7322_v60  ;;  %4403 = vmatprep.subr.bf16.mxu1 %v7323_v18  ;;  %v3480_v60 = vsel %vm2330_vm5, 1.0, %v7150_v0  ;;  %v3487_v18 = vsel %vm2684_vm6, 1.0, %v7150_v0 }
 0x519   :  { %p5379_p7 = por %p5378_p6, %p5377_p5 }
 0x51b   :  { %4341 = vmatpush1.bf16.msra.mxu0 %v7324_v47  ;;  %4405 = vmatpush1.bf16.msra.mxu1 %v7325_v19  ;;  %v5007_v47 = vpack.i.bf16 %v3487_v18, %v3480_v60  ;;  %p5380_p8 = pnand %p5379_p7, %p5373_p4 }
 0x51c   :  { %4407 = vmatprep.subr.bf16.mxu0 %v7326_v36  ;;  %4439 = vmatprep.subr.bf16.mxu1 %v7327_v32  ;;  %v7329_v36 = vld [vmem:[#allocation73_spill] sm:$0xff] }
 0x51d   :  { %5008 = vperm.xlu1 %5006, %v5007_v47  }
 0x591   :  { %v1876_v19 = vpop.f32.mrb[30].mxu0  ;;  %v1947_v30 = vpop.f32.mrb[30].mxu1 }
 0x592   :  { %v1877_v23 = vadd.f32 %v1876_v19, %v7329_v36  ;;  %v1878_v32 = vpop.f32.mrb[31].mxu0  ;;  %v1949_v2 = vpop.f32.mrb[31].mxu1  ;;  %v1948_v7 = vadd.f32 %v1947_v30, %v7331_v5 }
 0x593   :  { %v1879_v58 = vadd.f32 %v1878_v32, %v7330_v3  ;;  %v1950_v61 = vadd.f32 %v1949_v2, %v7332_v12  ;;  %v7336_v3 = vld [vmem:[#allocation89_spill] sm:$0xff] }
 0x594   :  { %v3470_v52 = vmul.f32 -1.442695, %v1877_v23  ;;  %v3472_v41 = vmul.f32 -1.442695, %v1948_v7  ;;  %v7333_v7 = vld [vmem:[#allocation86_spill] sm:$0xff] }
 0x595   :  { %v3471_v1 = vmul.f32 -1.442695, %v1879_v58 }
 0x596   :  { %5139 = vpow2.f32 %v3470_v52 }
 0x597   :  { %5141 = vpow2.f32 %v3471_v1 }
 0x598   :  { %5143 = vtanh.f32 %v1950_v61  ;;  %v7334_v61 = vld [vmem:[#allocation87_spill] sm:$0xff] }
 0x599   :  { %5145 = vpow2.f32 %v3472_v41 }
 0x5a0   :  { %v5140_v48 = vpop.eup %5139 }
 0x5a1   :  { %v1961_v60 = vadd.f32 1.0, %v5140_v48  ;;  %v5142_v18 = vpop.eup %5141 }
 0x5a2   :  { %v1962_v19 = vadd.f32 1.0, %v5142_v18  ;;  %v5144_v47 = vpop.eup %5143  ;;  %v7335_v18 = vld [vmem:[#allocation88_spill] sm:$0xff] }
 0x5a3   :  { %5147 = vrcp.f32 %v1961_v60  ;;  %v5146_v36 = vpop.eup %5145 }
 0x5a4   :  { %5149 = vrcp.f32 %v1962_v19  ;;  %v1963_v52 = vadd.f32 1.0, %v5146_v36 }
 0x5a6   :  { %5151 = vrcp.f32 %v1963_v52 }
 0x5ad   :  { %v5148_v32 = vpop.eup %5147 }
 0x5ae   :  { %v1972_v23 = vmul.f32 %v5148_v32, %v5144_v47  ;;  %v5150_v58 = vpop.eup %5149  ;;  %v5005_v32 = vunpack.i.h.bf16 %v6326_v4 }
 0x5af   :  { %v1971_v1 = vmul.f32 %v5150_v58, %v6319_v45 }
 0x5b0   :  { %v5152_v45 = vpop.eup %5151 }
 0x5b1   :  { %v2060_v30 = vpop.f32.mrb[32].mxu0  ;;  %v2131_v5 = vpop.f32.mrb[32].mxu1  ;;  %v6445_v2 = vadd.f32 %v1972_v23, %v1971_v1 }
 0x5b2   :  { %v2136_v48 = vadd.f32 %v2060_v30, %v7333_v7  ;;  %v2138_v12 = vadd.f32 %v2131_v5, %v7334_v61  ;;  %v2062_v41 = vpop.f32.mrb[33].mxu0  ;;  %v2133_v60 = vpop.f32.mrb[33].mxu1 }
 0x5b3   :  { %v2137_v19 = vadd.f32 %v2062_v41, %v7335_v18  ;;  %v2139_v56 = vadd.f32 %v2133_v60, %v7336_v3  ;;  %5153 = vtanh.f32 %v6445_v2 }
 0x5b4   :  { %v3474_v47 = vmul.f32 -1.442695, %v2136_v48  ;;  %v3476_v58 = vmul.f32 -1.442695, %v2138_v12 }
 0x5b5   :  { %v3475_v36 = vmul.f32 -1.442695, %v2137_v19 }
 0x5b6   :  { %5155 = vpow2.f32 %v3474_v47 }
 0x5b7   :  { %5157 = vpow2.f32 %v3475_v36 }
 0x5b8   :  { %5159 = vtanh.f32 %v2139_v56 }
 0x5b9   :  { %5161 = vpow2.f32 %v3476_v58  ;;  %v7341_v58 = vld [vmem:[#allocation20_spill] sm:$0xff] }
 0x5bd   :  { %v5154_v23 = vpop.eup %5153 }
 0x5be   :  { %v1975_v1 = vmul.f32 %v5154_v23, %v5152_v45  ;;  %v7338_v45 = vld [vmem:[#allocation17_spill] sm:$0xff]  ;;  %v7340_v23 = vld [vmem:[#allocation19_spill] sm:$0xff] }
 0x5c0   :  { %v5156_v5 = vpop.eup %5155  ;;  %v1984_v52 = vmul.f32 %v5005_v32, %v1975_v1  ;;  %2228 = vmatprep.mubr.f32.mxu0 %v1975_v1  ;;  %2299 = vmatprep.mubr.f32.mxu1 %v1975_v1  ;;  %v7339_v32 = vld [vmem:[#allocation18_spill] sm:$0xff]  ;;  %v7342_v1 = vld [vmem:[#allocation21_spill] sm:$0xff] }
 0x5c1   :  { %v2149_v30 = vadd.f32 1.0, %v5156_v5  ;;  %v5158_v7 = vpop.eup %5157  ;;  %v7343_v5 = vld [vmem:[#allocation22_spill] sm:$0xff] }
 0x5c2   :  { %v2150_v3 = vadd.f32 1.0, %v5158_v7  ;;  %1986 = vst [vmem:[#allocation11 + $0x18] sm:$0xff] %v1984_v52  ;;  %v5160_v48 = vpop.eup %5159  ;;  %v7345_v52 = vld [vmem:[#allocation24_spill] sm:$0xff]  ;;  %v7346_v7 = vld [vmem:[#allocation25_spill] sm:$0xff] }
 0x5c3   :  { %5163 = vrcp.f32 %v2149_v30  ;;  %v5162_v61 = vpop.eup %5161  ;;  %v7344_v30 = vld [vmem:[#allocation23_spill] sm:$0xff] }
 0x5c4   :  { %5165 = vrcp.f32 %v2150_v3  ;;  %v2151_v18 = vadd.f32 1.0, %v5162_v61  ;;  %v7347_v3 = vld [vmem:[#allocation26_spill] sm:$0xff]  ;;  %v7349_v61 = vld [vmem:[#allocation28_spill] sm:$0xff] }
 0x5c6   :  { %5167 = vrcp.f32 %v2151_v18  ;;  %v7353_v18 = vld [vmem:[#allocation32_spill] sm:$0xff] }
 0x5cd   :  { %v5164_v41 = vpop.eup %5163 }
 0x5ce   :  { %v2160_v60 = vmul.f32 %v5164_v41, %v5160_v48  ;;  %v5166_v4 = vpop.eup %5165  ;;  %v7348_v48 = vld [vmem:[#allocation27_spill] sm:$0xff]  ;;  %v7350_v41 = vld [vmem:[#allocation29_spill] sm:$0xff] }
 0x5cf   :  { %v2159_v12 = vmul.f32 %v5166_v4, %v6330_v31  ;;  %v7337_v31 = vld [vmem:[#allocation16_spill] sm:$0xff]  ;;  %v7352_v4 = vld [vmem:[#allocation31_spill] sm:$0xff] }
 0x5d0   :  { %v5168_v56 = vpop.eup %5167 }
 0x5d1   :  { %v6454_v19 = vadd.f32 %v2160_v60, %v2159_v12  ;;  %v7351_v60 = vld [vmem:[#allocation30_spill] sm:$0xff]  ;;  %v7354_v12 = vld [vmem:[#allocation33_spill] sm:$0xff] }
 0x5d3   :  { %5169 = vtanh.f32 %v6454_v19 }
 0x5dd   :  { %v5170_v47 = vpop.eup %5169 }
 0x5de   :  { %v2163_v36 = vmul.f32 %v5170_v47, %v5168_v56  ;;  %v7355_v56 = vld [vmem:[#allocation34_spill] sm:$0xff]  ;;  %v7356_v47 = vld [vmem:[#allocation35_spill] sm:$0xff] }
 0x5e0   :  { %2229 = vmatmul.mubr.f32.vlgmr.msra.gmra.mrb[34].mxu0 %v2163_v36  ;;  %2300 = vmatmul.mubr.f32.vlgmr.msra.gmra.mrb[34].mxu1 %v2163_v36 }
 0x5e1   :  { %4409 = vmatpush1.bf16.msra.mxu0 %v7147_v38  ;;  %4441 = vmatpush1.bf16.msra.mxu1 %v7148_v21 }
 0x5e2   :  { %4411 = vmatprep.subr.bf16.mxu0 %v5902_v54  ;;  %4443 = vmatprep.subr.bf16.mxu1 %v7149_v11 }
 0x5e3   :  { %2412 = vmatprep.mubr.f32.mxu0 %v7150_v0  ;;  %2483 = vmatprep.mubr.f32.mxu1 %v7150_v0 }
 0x5e5   :  { %4413 = vmatpush1.bf16.msra.mxu0 %v7151_v20  ;;  %4445 = vmatpush1.bf16.msra.mxu1 %v7209_v13 }
 0x5e6   :  { %4415 = vmatprep.subr.bf16.mxu0 %v7210_v27  ;;  %4447 = vmatprep.subr.bf16.mxu1 %v7154_v14 }
 0x5e9   :  { %4417 = vmatpush1.bf16.msra.mxu0 %v7155_v53  ;;  %4449 = vmatpush1.bf16.msra.mxu1 %v7156_v40 }
 0x5ea   :  { %4419 = vmatprep.subr.bf16.mxu0 %v7157_v37  ;;  %4451 = vmatprep.subr.bf16.mxu1 %v7158_v46 }
 0x5ed   :  { %4421 = vmatpush1.bf16.msra.mxu0 %v7159_v63  ;;  %4453 = vmatpush1.bf16.msra.mxu1 %v7160_v62 }
 0x5ee   :  { %4423 = vmatprep.subr.bf16.mxu0 %v7161_v9  ;;  %4455 = vmatprep.subr.bf16.mxu1 %v7162_v16 }
 0x5f1   :  { %4425 = vmatpush1.bf16.msra.mxu0 %v7163_v8  ;;  %4457 = vmatpush1.bf16.msra.mxu1 %v7164_v10 }
 0x5f2   :  { %4427 = vmatprep.subr.bf16.mxu0 %v5954_v42  ;;  %4459 = vmatprep.subr.bf16.mxu1 %v5956_v15 }
 0x5f5   :  { %4429 = vmatpush1.bf16.msra.mxu0 %v5960_v22  ;;  %4461 = vmatpush1.bf16.msra.mxu1 %v5962_v50 }
 0x5f6   :  { %4431 = vmatprep.subr.bf16.mxu0 %v5966_v49  ;;  %4463 = vmatprep.subr.bf16.mxu1 %v5968_v33 }
 0x5f9   :  { %4433 = vmatpush1.bf16.msra.mxu0 %v5972_v6  ;;  %4465 = vmatpush1.bf16.msra.mxu1 %v5974_v59 }
 0x5fa   :  { %4435 = vmatprep.subr.bf16.mxu0 %v5978_v57  ;;  %4467 = vmatprep.subr.bf16.mxu1 %v5980_v28 }
 0x5fd   :  { %4437 = vmatpush1.bf16.msra.mxu0 %v5984_v26  ;;  %4469 = vmatpush1.bf16.msra.mxu1 %v5986_v17 }
 0x5fe   :  { %4471 = vmatprep.subr.bf16.mxu0 %v5549_v24  ;;  %4535 = vmatprep.subr.bf16.mxu1 %v5551_v25 }
 0x600   :  { %2413 = vmatmul.mubr.f32.vlgmr.msra.gmra.mrb[36].mxu0 %v2163_v36  ;;  %2484 = vmatmul.mubr.f32.vlgmr.msra.gmra.mrb[36].mxu1 %v2163_v36  ;;  %v7357_v36 = vld [vmem:[#allocation36_spill] sm:$0xff] }
 0x601   :  { %4473 = vmatpush1.bf16.msra.mxu0 %v5555_v29  ;;  %4537 = vmatpush1.bf16.msra.mxu1 %v5562_v34 }
 0x602   :  { %4475 = vmatprep.subr.bf16.mxu0 %v5564_v35  ;;  %4539 = vmatprep.subr.bf16.mxu1 %v5568_v39 }
 0x605   :  { %4477 = vmatpush1.bf16.msra.mxu0 %v5572_v43  ;;  %4541 = vmatpush1.bf16.msra.mxu1 %v5574_v44 }
 0x606   :  { %4479 = vmatprep.subr.bf16.mxu0 %v5577_v51  ;;  %4543 = vmatprep.subr.bf16.mxu1 %v5580_v55 }
 0x609   :  { %4481 = vmatpush1.bf16.msra.mxu0 %v7337_v31  ;;  %4545 = vmatpush1.bf16.msra.mxu1 %v7338_v45 }
 0x60a   :  { %4483 = vmatprep.subr.bf16.mxu0 %v7339_v32  ;;  %4547 = vmatprep.subr.bf16.mxu1 %v7340_v23 }
 0x60d   :  { %4485 = vmatpush1.bf16.msra.mxu0 %v7341_v58  ;;  %4549 = vmatpush1.bf16.msra.mxu1 %v7342_v1  ;;  %v7396_v1 = vld [vmem:[#allocation122_spill] sm:$0xff] }
 0x60e   :  { %4487 = vmatprep.subr.bf16.mxu0 %v7343_v5  ;;  %4551 = vmatprep.subr.bf16.mxu1 %v7344_v30  ;;  %v7394_v30 = vld [vmem:[#allocation120_spill] sm:$0xff] }
 0x611   :  { %4489 = vmatpush1.bf16.msra.mxu0 %v7345_v52  ;;  %4553 = vmatpush1.bf16.msra.mxu1 %v7346_v7  ;;  %v7393_v7 = vld [vmem:[#allocation73_spill] sm:$0xff] }
 0x612   :  { %4491 = vmatprep.subr.bf16.mxu0 %v7347_v3  ;;  %4555 = vmatprep.subr.bf16.mxu1 %v7348_v48  ;;  %v7358_v3 = vld [vmem:[#allocation37_spill] sm:$0xff]  ;;  %v7359_v48 = vld [vmem:[#allocation38_spill] sm:$0xff] }
 0x615   :  { %4493 = vmatpush1.bf16.msra.mxu0 %v7349_v61  ;;  %4557 = vmatpush1.bf16.msra.mxu1 %v7350_v41  ;;  %v7360_v61 = vld [vmem:[#allocation39_spill] sm:$0xff]  ;;  %v7361_v41 = vld [vmem:[#allocation40_spill] sm:$0xff] }
 0x616   :  { %4495 = vmatprep.subr.bf16.mxu0 %v7351_v60  ;;  %4559 = vmatprep.subr.bf16.mxu1 %v7352_v4  ;;  %v7362_v60 = vld [vmem:[#allocation41_spill] sm:$0xff]  ;;  %v7363_v4 = vld [vmem:[#allocation42_spill] sm:$0xff] }
 0x619   :  { %4497 = vmatpush1.bf16.msra.mxu0 %v7353_v18  ;;  %4561 = vmatpush1.bf16.msra.mxu1 %v7354_v12  ;;  %v7364_v18 = vld [vmem:[#allocation43_spill] sm:$0xff]  ;;  %v7365_v12 = vld [vmem:[#allocation44_spill] sm:$0xff] }
 0x61a   :  { %4499 = vmatprep.subr.bf16.mxu0 %v7355_v56  ;;  %4563 = vmatprep.subr.bf16.mxu1 %v7356_v47  ;;  %v7366_v56 = vld [vmem:[#allocation45_spill] sm:$0xff]  ;;  %v7367_v47 = vld [vmem:[#allocation46_spill] sm:$0xff] }
 0x61d   :  { %4501 = vmatpush1.bf16.msra.mxu0 %v7357_v36  ;;  %4565 = vmatpush1.bf16.msra.mxu1 %v7358_v3  ;;  %v7368_v36 = vld [vmem:[#allocation47_spill] sm:$0xff]  ;;  %v7369_v3 = vld [vmem:[#allocation48_spill] sm:$0xff] }
 0x61e   :  { %4503 = vmatprep.subr.bf16.mxu0 %v7359_v48  ;;  %4567 = vmatprep.subr.bf16.mxu1 %v7360_v61  ;;  %v7370_v48 = vld [vmem:[#allocation49_spill] sm:$0xff]  ;;  %v7371_v61 = vld [vmem:[#allocation50_spill] sm:$0xff] }
 0x621   :  { %4505 = vmatpush1.bf16.msra.mxu0 %v7361_v41  ;;  %4569 = vmatpush1.bf16.msra.mxu1 %v7362_v60  ;;  %v7372_v41 = vld [vmem:[#allocation51_spill] sm:$0xff]  ;;  %v7373_v60 = vld [vmem:[#allocation52_spill] sm:$0xff] }
 0x622   :  { %4507 = vmatprep.subr.bf16.mxu0 %v7363_v4  ;;  %4571 = vmatprep.subr.bf16.mxu1 %v7364_v18  ;;  %v7374_v4 = vld [vmem:[#allocation53_spill] sm:$0xff]  ;;  %v7375_v18 = vld [vmem:[#allocation54_spill] sm:$0xff] }
 0x625   :  { %4509 = vmatpush1.bf16.msra.mxu0 %v7365_v12  ;;  %4573 = vmatpush1.bf16.msra.mxu1 %v7366_v56  ;;  %v7376_v12 = vld [vmem:[#allocation55_spill] sm:$0xff]  ;;  %v7377_v56 = vld [vmem:[#allocation56_spill] sm:$0xff] }
 0x626   :  { %4511 = vmatprep.subr.bf16.mxu0 %v7367_v47  ;;  %4575 = vmatprep.subr.bf16.mxu1 %v7368_v36  ;;  %v7378_v47 = vld [vmem:[#allocation57_spill] sm:$0xff]  ;;  %v7379_v36 = vld [vmem:[#allocation58_spill] sm:$0xff] }
 0x629   :  { %4513 = vmatpush1.bf16.msra.mxu0 %v7369_v3  ;;  %4577 = vmatpush1.bf16.msra.mxu1 %v7370_v48  ;;  %v7380_v3 = vld [vmem:[#allocation59_spill] sm:$0xff]  ;;  %v7381_v48 = vld [vmem:[#allocation60_spill] sm:$0xff] }
 0x62a   :  { %4515 = vmatprep.subr.bf16.mxu0 %v7371_v61  ;;  %4579 = vmatprep.subr.bf16.mxu1 %v7372_v41  ;;  %v7382_v61 = vld [vmem:[#allocation61_spill] sm:$0xff]  ;;  %v7383_v41 = vld [vmem:[#allocation62_spill] sm:$0xff] }
 0x62d   :  { %4517 = vmatpush1.bf16.msra.mxu0 %v7373_v60  ;;  %4581 = vmatpush1.bf16.msra.mxu1 %v7374_v4  ;;  %v7384_v60 = vld [vmem:[#allocation63_spill] sm:$0xff]  ;;  %v7385_v4 = vld [vmem:[#allocation64_spill] sm:$0xff] }
 0x62e   :  { %4519 = vmatprep.subr.bf16.mxu0 %v7375_v18  ;;  %4583 = vmatprep.subr.bf16.mxu1 %v7376_v12  ;;  %v7386_v18 = vld [vmem:[#allocation65_spill] sm:$0xff]  ;;  %v7387_v12 = vld [vmem:[#allocation66_spill] sm:$0xff] }
 0x631   :  { %4521 = vmatpush1.bf16.msra.mxu0 %v7377_v56  ;;  %4585 = vmatpush1.bf16.msra.mxu1 %v7378_v47  ;;  %v7388_v56 = vld [vmem:[#allocation67_spill] sm:$0xff]  ;;  %v7389_v47 = vld [vmem:[#allocation68_spill] sm:$0xff] }
 0x632   :  { %4523 = vmatprep.subr.bf16.mxu0 %v7379_v36  ;;  %4587 = vmatprep.subr.bf16.mxu1 %v7380_v3  ;;  %v7390_v36 = vld [vmem:[#allocation69_spill] sm:$0xff]  ;;  %v7391_v3 = vld [vmem:[#allocation70_spill] sm:$0xff] }
 0x635   :  { %4525 = vmatpush1.bf16.msra.mxu0 %v7381_v48  ;;  %4589 = vmatpush1.bf16.msra.mxu1 %v7382_v61  ;;  %v7392_v48 = vld [vmem:[#allocation71_spill] sm:$0xff] }
 0x636   :  { %4527 = vmatprep.subr.bf16.mxu0 %v7383_v41  ;;  %4591 = vmatprep.subr.bf16.mxu1 %v7384_v60 }
 0x639   :  { %4529 = vmatpush1.bf16.msra.mxu0 %v7385_v4  ;;  %4593 = vmatpush1.bf16.msra.mxu1 %v7386_v18 }
 0x63a   :  { %4531 = vmatprep.subr.bf16.mxu0 %v7387_v12  ;;  %4595 = vmatprep.subr.bf16.mxu1 %v7388_v56  ;;  %v7395_v56 = vld [vmem:[#allocation121_spill] sm:$0xff] }
 0x63d   :  { %4533 = vmatpush1.bf16.msra.mxu0 %v7389_v47  ;;  %4597 = vmatpush1.bf16.msra.mxu1 %v7390_v36 }
 0x63e   :  { %4599 = vmatprep.subr.bf16.mxu0 %v7391_v3  ;;  %4631 = vmatprep.subr.bf16.mxu1 %v7392_v48 }
 0x6b3   :  { %v2230_v61 = vpop.f32.mrb[34].mxu0  ;;  %v2301_v41 = vpop.f32.mrb[34].mxu1 }
 0x6b4   :  { %v2231_v60 = vadd.f32 %v2230_v61, %v7393_v7  ;;  %v2232_v52 = vpop.f32.mrb[35].mxu0  ;;  %v2303_v4 = vpop.f32.mrb[35].mxu1  ;;  %v2302_v47 = vadd.f32 %v2301_v41, %v7395_v56 }
 0x6b5   :  { %v2233_v18 = vadd.f32 %v2232_v52, %v7394_v30  ;;  %v2304_v36 = vadd.f32 %v2303_v4, %v7396_v1  ;;  %v7400_v30 = vld [vmem:[#allocation93_spill] sm:$0xff] }
 0x6b6   :  { %v3477_v5 = vmul.f32 -1.442695, %v2231_v60  ;;  %v3479_v58 = vmul.f32 -1.442695, %v2302_v47  ;;  %v7397_v47 = vld [vmem:[#allocation90_spill] sm:$0xff] }
 0x6b7   :  { %v3478_v12 = vmul.f32 -1.442695, %v2233_v18 }
 0x6b8   :  { %5171 = vpow2.f32 %v3477_v5 }
 0x6b9   :  { %5173 = vpow2.f32 %v3478_v12 }
 0x6ba   :  { %5175 = vtanh.f32 %v2304_v36  ;;  %v7398_v36 = vld [vmem:[#allocation91_spill] sm:$0xff] }
 0x6bb   :  { %5177 = vpow2.f32 %v3479_v58 }
 0x6c2   :  { %v5172_v3 = vpop.eup %5171 }
 0x6c3   :  { %v2315_v23 = vadd.f32 1.0, %v5172_v3  ;;  %v5174_v48 = vpop.eup %5173 }
 0x6c4   :  { %v2316_v61 = vadd.f32 1.0, %v5174_v48  ;;  %v5176_v7 = vpop.eup %5175  ;;  %v7399_v48 = vld [vmem:[#allocation92_spill] sm:$0xff] }
 0x6c5   :  { %5179 = vrcp.f32 %v2315_v23  ;;  %v5178_v32 = vpop.eup %5177 }
 0x6c6   :  { %5181 = vrcp.f32 %v2316_v61  ;;  %v2317_v5 = vadd.f32 1.0, %v5178_v32 }
 0x6c8   :  { %5183 = vrcp.f32 %v2317_v5 }
 0x6cf   :  { %v5180_v52 = vpop.eup %5179 }
 0x6d0   :  { %v2326_v60 = vmul.f32 %v5180_v52, %v5176_v7  ;;  %v5182_v18 = vpop.eup %5181 }
 0x6d1   :  { %v2325_v12 = vmul.f32 %v5182_v18, %v6445_v2  ;;  %v6567_v2 = vpop.permute.xlu1 %5008 }
 0x6d2   :  { %v5184_v52 = vpop.eup %5183 }
 0x6d3   :  { %v2414_v41 = vpop.f32.mrb[36].mxu0  ;;  %v2485_v56 = vpop.f32.mrb[36].mxu1  ;;  %v6560_v4 = vadd.f32 %v2326_v60, %v2325_v12  ;;  %v5010_v60 = vunpack.i.l.bf16 %v6567_v2 }
 0x6d4   :  { %v2490_v3 = vadd.f32 %v2414_v41, %v7397_v47  ;;  %v2492_v1 = vadd.f32 %v2485_v56, %v7398_v36  ;;  %v2416_v58 = vpop.f32.mrb[37].mxu0  ;;  %v2487_v23 = vpop.f32.mrb[37].mxu1 }
 0x6d5   :  { %v2491_v61 = vadd.f32 %v2416_v58, %v7399_v48  ;;  %v2493_v45 = vadd.f32 %v2487_v23, %v7400_v30  ;;  %5185 = vtanh.f32 %v6560_v4 }
 0x6d6   :  { %v3481_v32 = vmul.f32 -1.442695, %v2490_v3  ;;  %v3483_v56 = vmul.f32 -1.442695, %v2492_v1 }
 0x6d7   :  { %v3482_v7 = vmul.f32 -1.442695, %v2491_v61 }
 0x6d8   :  { %5187 = vpow2.f32 %v3481_v32 }
 0x6d9   :  { %5189 = vpow2.f32 %v3482_v7 }
 0x6da   :  { %5191 = vtanh.f32 %v2493_v45 }
 0x6db   :  { %5193 = vpow2.f32 %v3483_v56  ;;  %v7403_v56 = vld [vmem:[#allocation19_spill] sm:$0xff] }
 0x6df   :  { %v5186_v18 = vpop.eup %5185 }
 0x6e0   :  { %v2329_v12 = vmul.f32 %v5186_v18, %v5184_v52  ;;  %v7402_v18 = vld [vmem:[#allocation18_spill] sm:$0xff] }
 0x6e2   :  { %v5188_v41 = vpop.eup %5187  ;;  %v2338_v47 = vmul.f32 %v5010_v60, %v2329_v12  ;;  %2582 = vmatprep.mubr.f32.mxu0 %v2329_v12  ;;  %2653 = vmatprep.mubr.f32.mxu1 %v2329_v12  ;;  %v7404_v12 = vld [vmem:[#allocation20_spill] sm:$0xff] }
 0x6e3   :  { %v2503_v5 = vadd.f32 1.0, %v5188_v41  ;;  %v5190_v30 = vpop.eup %5189  ;;  %v7405_v41 = vld [vmem:[#allocation21_spill] sm:$0xff] }
 0x6e4   :  { %v2504_v3 = vadd.f32 1.0, %v5190_v30  ;;  %2340 = vst [vmem:[#allocation11 + $0x20] sm:$0xff] %v2338_v47  ;;  %v5192_v36 = vpop.eup %5191  ;;  %v7407_v47 = vld [vmem:[#allocation23_spill] sm:$0xff]  ;;  %v7408_v30 = vld [vmem:[#allocation24_spill] sm:$0xff] }
 0x6e5   :  { %5195 = vrcp.f32 %v2503_v5  ;;  %v5194_v58 = vpop.eup %5193  ;;  %v7406_v5 = vld [vmem:[#allocation22_spill] sm:$0xff] }
 0x6e6   :  { %5197 = vrcp.f32 %v2504_v3  ;;  %v2505_v32 = vadd.f32 1.0, %v5194_v58  ;;  %v7409_v3 = vld [vmem:[#allocation25_spill] sm:$0xff]  ;;  %v7411_v58 = vld [vmem:[#allocation27_spill] sm:$0xff] }
 0x6e8   :  { %5199 = vrcp.f32 %v2505_v32  ;;  %v7415_v32 = vld [vmem:[#allocation31_spill] sm:$0xff] }
 0x6ef   :  { %v5196_v23 = vpop.eup %5195 }
 0x6f0   :  { %v2514_v48 = vmul.f32 %v5196_v23, %v5192_v36  ;;  %v5198_v61 = vpop.eup %5197  ;;  %v7410_v36 = vld [vmem:[#allocation26_spill] sm:$0xff]  ;;  %v7412_v23 = vld [vmem:[#allocation28_spill] sm:$0xff] }
 0x6f1   :  { %v2513_v1 = vmul.f32 %v5198_v61, %v6454_v19  ;;  %v7401_v19 = vld [vmem:[#allocation17_spill] sm:$0xff]  ;;  %v7414_v61 = vld [vmem:[#allocation30_spill] sm:$0xff] }
 0x6f2   :  { %v5200_v45 = vpop.eup %5199 }
 0x6f3   :  { %v6571_v7 = vadd.f32 %v2514_v48, %v2513_v1  ;;  %v7413_v48 = vld [vmem:[#allocation29_spill] sm:$0xff]  ;;  %v7416_v1 = vld [vmem:[#allocation32_spill] sm:$0xff] }
 0x6f5   :  { %5201 = vtanh.f32 %v6571_v7 }
 0x6ff   :  { %v5202_v52 = vpop.eup %5201 }
 0x700   :  { %v2517_v60 = vmul.f32 %v5202_v52, %v5200_v45  ;;  %v7417_v45 = vld [vmem:[#allocation33_spill] sm:$0xff]  ;;  %v7418_v52 = vld [vmem:[#allocation34_spill] sm:$0xff] }
 0x702   :  { %2583 = vmatmul.mubr.f32.vlgmr.msra.gmra.mrb[38].mxu0 %v2517_v60  ;;  %2654 = vmatmul.mubr.f32.vlgmr.msra.gmra.mrb[38].mxu1 %v2517_v60 }
 0x703   :  { %4601 = vmatpush1.bf16.msra.mxu0 %v7147_v38  ;;  %4633 = vmatpush1.bf16.msra.mxu1 %v7148_v21 }
 0x704   :  { %4603 = vmatprep.subr.bf16.mxu0 %v5902_v54  ;;  %4635 = vmatprep.subr.bf16.mxu1 %v7149_v11 }
 0x705   :  { %2766 = vmatprep.mubr.f32.mxu0 %v7150_v0  ;;  %2837 = vmatprep.mubr.f32.mxu1 %v7150_v0 }
 0x707   :  { %4605 = vmatpush1.bf16.msra.mxu0 %v7151_v20  ;;  %4637 = vmatpush1.bf16.msra.mxu1 %v7209_v13 }
 0x708   :  { %4607 = vmatprep.subr.bf16.mxu0 %v7210_v27  ;;  %4639 = vmatprep.subr.bf16.mxu1 %v7154_v14 }
 0x70b   :  { %4609 = vmatpush1.bf16.msra.mxu0 %v7155_v53  ;;  %4641 = vmatpush1.bf16.msra.mxu1 %v7156_v40 }
 0x70c   :  { %4611 = vmatprep.subr.bf16.mxu0 %v7157_v37  ;;  %4643 = vmatprep.subr.bf16.mxu1 %v7158_v46 }
 0x70f   :  { %4613 = vmatpush1.bf16.msra.mxu0 %v7159_v63  ;;  %4645 = vmatpush1.bf16.msra.mxu1 %v7160_v62 }
 0x710   :  { %4615 = vmatprep.subr.bf16.mxu0 %v7161_v9  ;;  %4647 = vmatprep.subr.bf16.mxu1 %v7162_v16 }
 0x713   :  { %4617 = vmatpush1.bf16.msra.mxu0 %v7163_v8  ;;  %4649 = vmatpush1.bf16.msra.mxu1 %v7164_v10 }
 0x714   :  { %4619 = vmatprep.subr.bf16.mxu0 %v5954_v42  ;;  %4651 = vmatprep.subr.bf16.mxu1 %v5956_v15 }
 0x717   :  { %4621 = vmatpush1.bf16.msra.mxu0 %v5960_v22  ;;  %4653 = vmatpush1.bf16.msra.mxu1 %v5962_v50 }
 0x718   :  { %4623 = vmatprep.subr.bf16.mxu0 %v5966_v49  ;;  %4655 = vmatprep.subr.bf16.mxu1 %v5968_v33 }
 0x71b   :  { %4625 = vmatpush1.bf16.msra.mxu0 %v5972_v6  ;;  %4657 = vmatpush1.bf16.msra.mxu1 %v5974_v59 }
 0x71c   :  { %4627 = vmatprep.subr.bf16.mxu0 %v5978_v57  ;;  %4659 = vmatprep.subr.bf16.mxu1 %v5980_v28 }
 0x71f   :  { %4629 = vmatpush1.bf16.msra.mxu0 %v5984_v26  ;;  %4661 = vmatpush1.bf16.msra.mxu1 %v5986_v17 }
 0x720   :  { %4663 = vmatprep.subr.bf16.mxu0 %v5549_v24  ;;  %4727 = vmatprep.subr.bf16.mxu1 %v5551_v25 }
 0x722   :  { %2767 = vmatmul.mubr.f32.vlgmr.msra.gmra.mrb[40].mxu0 %v2517_v60  ;;  %2838 = vmatmul.mubr.f32.vlgmr.msra.gmra.mrb[40].mxu1 %v2517_v60  ;;  %v7419_v60 = vld [vmem:[#allocation35_spill] sm:$0xff] }
 0x723   :  { %4665 = vmatpush1.bf16.msra.mxu0 %v5555_v29  ;;  %4729 = vmatpush1.bf16.msra.mxu1 %v5562_v34 }
 0x724   :  { %4667 = vmatprep.subr.bf16.mxu0 %v5564_v35  ;;  %4731 = vmatprep.subr.bf16.mxu1 %v5568_v39 }
 0x727   :  { %4669 = vmatpush1.bf16.msra.mxu0 %v5572_v43  ;;  %4733 = vmatpush1.bf16.msra.mxu1 %v5574_v44 }
 0x728   :  { %4671 = vmatprep.subr.bf16.mxu0 %v5577_v51  ;;  %4735 = vmatprep.subr.bf16.mxu1 %v5580_v55 }
 0x72b   :  { %4673 = vmatpush1.bf16.msra.mxu0 %v7337_v31  ;;  %4737 = vmatpush1.bf16.msra.mxu1 %v7401_v19 }
 0x72c   :  { %4675 = vmatprep.subr.bf16.mxu0 %v7402_v18  ;;  %4739 = vmatprep.subr.bf16.mxu1 %v7403_v56 }
 0x72f   :  { %4677 = vmatpush1.bf16.msra.mxu0 %v7404_v12  ;;  %4741 = vmatpush1.bf16.msra.mxu1 %v7405_v41  ;;  %v7459_v41 = vld [vmem:[#allocation121_spill] sm:$0xff]  ;;  %v7460_v12 = vld [vmem:[#allocation122_spill] sm:$0xff] }
 0x730   :  { %4679 = vmatprep.subr.bf16.mxu0 %v7406_v5  ;;  %4743 = vmatprep.subr.bf16.mxu1 %v7407_v47  ;;  %v7458_v47 = vld [vmem:[#allocation120_spill] sm:$0xff] }
 0x733   :  { %4681 = vmatpush1.bf16.msra.mxu0 %v7408_v30  ;;  %4745 = vmatpush1.bf16.msra.mxu1 %v7409_v3  ;;  %v7420_v3 = vld [vmem:[#allocation36_spill] sm:$0xff] }
 0x734   :  { %4683 = vmatprep.subr.bf16.mxu0 %v7410_v36  ;;  %4747 = vmatprep.subr.bf16.mxu1 %v7411_v58  ;;  %v7421_v36 = vld [vmem:[#allocation37_spill] sm:$0xff]  ;;  %v7422_v58 = vld [vmem:[#allocation38_spill] sm:$0xff] }
 0x737   :  { %4685 = vmatpush1.bf16.msra.mxu0 %v7412_v23  ;;  %4749 = vmatpush1.bf16.msra.mxu1 %v7413_v48  ;;  %v7423_v23 = vld [vmem:[#allocation39_spill] sm:$0xff]  ;;  %v7424_v48 = vld [vmem:[#allocation40_spill] sm:$0xff] }
 0x738   :  { %4687 = vmatprep.subr.bf16.mxu0 %v7414_v61  ;;  %4751 = vmatprep.subr.bf16.mxu1 %v7415_v32  ;;  %v7425_v61 = vld [vmem:[#allocation41_spill] sm:$0xff]  ;;  %v7426_v32 = vld [vmem:[#allocation42_spill] sm:$0xff] }
 0x73b   :  { %4689 = vmatpush1.bf16.msra.mxu0 %v7416_v1  ;;  %4753 = vmatpush1.bf16.msra.mxu1 %v7417_v45  ;;  %v7427_v1 = vld [vmem:[#allocation43_spill] sm:$0xff]  ;;  %v7428_v45 = vld [vmem:[#allocation44_spill] sm:$0xff] }
 0x73c   :  { %4691 = vmatprep.subr.bf16.mxu0 %v7418_v52  ;;  %4755 = vmatprep.subr.bf16.mxu1 %v7419_v60  ;;  %v7429_v52 = vld [vmem:[#allocation45_spill] sm:$0xff]  ;;  %v7430_v60 = vld [vmem:[#allocation46_spill] sm:$0xff] }
 0x73f   :  { %4693 = vmatpush1.bf16.msra.mxu0 %v7420_v3  ;;  %4757 = vmatpush1.bf16.msra.mxu1 %v7421_v36  ;;  %v7431_v3 = vld [vmem:[#allocation47_spill] sm:$0xff]  ;;  %v7432_v36 = vld [vmem:[#allocation48_spill] sm:$0xff] }
 0x740   :  { %4695 = vmatprep.subr.bf16.mxu0 %v7422_v58  ;;  %4759 = vmatprep.subr.bf16.mxu1 %v7423_v23  ;;  %v7433_v58 = vld [vmem:[#allocation49_spill] sm:$0xff]  ;;  %v7434_v23 = vld [vmem:[#allocation50_spill] sm:$0xff] }
 0x743   :  { %4697 = vmatpush1.bf16.msra.mxu0 %v7424_v48  ;;  %4761 = vmatpush1.bf16.msra.mxu1 %v7425_v61  ;;  %v7435_v48 = vld [vmem:[#allocation51_spill] sm:$0xff]  ;;  %v7436_v61 = vld [vmem:[#allocation52_spill] sm:$0xff] }
 0x744   :  { %4699 = vmatprep.subr.bf16.mxu0 %v7426_v32  ;;  %4763 = vmatprep.subr.bf16.mxu1 %v7427_v1  ;;  %v7437_v32 = vld [vmem:[#allocation53_spill] sm:$0xff]  ;;  %v7438_v1 = vld [vmem:[#allocation54_spill] sm:$0xff] }
 0x747   :  { %4701 = vmatpush1.bf16.msra.mxu0 %v7428_v45  ;;  %4765 = vmatpush1.bf16.msra.mxu1 %v7429_v52  ;;  %v7439_v45 = vld [vmem:[#allocation55_spill] sm:$0xff]  ;;  %v7440_v52 = vld [vmem:[#allocation56_spill] sm:$0xff] }
 0x748   :  { %4703 = vmatprep.subr.bf16.mxu0 %v7430_v60  ;;  %4767 = vmatprep.subr.bf16.mxu1 %v7431_v3  ;;  %v7441_v60 = vld [vmem:[#allocation57_spill] sm:$0xff]  ;;  %v7442_v3 = vld [vmem:[#allocation58_spill] sm:$0xff] }
 0x74b   :  { %4705 = vmatpush1.bf16.msra.mxu0 %v7432_v36  ;;  %4769 = vmatpush1.bf16.msra.mxu1 %v7433_v58  ;;  %v7443_v36 = vld [vmem:[#allocation59_spill] sm:$0xff]  ;;  %v7444_v58 = vld [vmem:[#allocation60_spill] sm:$0xff] }
 0x74c   :  { %4707 = vmatprep.subr.bf16.mxu0 %v7434_v23  ;;  %4771 = vmatprep.subr.bf16.mxu1 %v7435_v48  ;;  %v7445_v23 = vld [vmem:[#allocation61_spill] sm:$0xff]  ;;  %v7446_v48 = vld [vmem:[#allocation62_spill] sm:$0xff] }
 0x74f   :  { %4709 = vmatpush1.bf16.msra.mxu0 %v7436_v61  ;;  %4773 = vmatpush1.bf16.msra.mxu1 %v7437_v32  ;;  %v7447_v61 = vld [vmem:[#allocation63_spill] sm:$0xff]  ;;  %v7448_v32 = vld [vmem:[#allocation64_spill] sm:$0xff] }
 0x750   :  { %4711 = vmatprep.subr.bf16.mxu0 %v7438_v1  ;;  %4775 = vmatprep.subr.bf16.mxu1 %v7439_v45  ;;  %v7449_v1 = vld [vmem:[#allocation65_spill] sm:$0xff]  ;;  %v7450_v45 = vld [vmem:[#allocation66_spill] sm:$0xff] }
 0x753   :  { %4713 = vmatpush1.bf16.msra.mxu0 %v7440_v52  ;;  %4777 = vmatpush1.bf16.msra.mxu1 %v7441_v60  ;;  %v7451_v52 = vld [vmem:[#allocation67_spill] sm:$0xff]  ;;  %v7452_v60 = vld [vmem:[#allocation68_spill] sm:$0xff] }
 0x754   :  { %4715 = vmatprep.subr.bf16.mxu0 %v7442_v3  ;;  %4779 = vmatprep.subr.bf16.mxu1 %v7443_v36  ;;  %v7453_v3 = vld [vmem:[#allocation69_spill] sm:$0xff]  ;;  %v7454_v36 = vld [vmem:[#allocation70_spill] sm:$0xff] }
 0x757   :  { %4717 = vmatpush1.bf16.msra.mxu0 %v7444_v58  ;;  %4781 = vmatpush1.bf16.msra.mxu1 %v7445_v23  ;;  %v7455_v58 = vld [vmem:[#allocation71_spill] sm:$0xff]  ;;  %v7456_v23 = vld [vmem:[#allocation74_spill] sm:$0xff] }
 0x758   :  { %4719 = vmatprep.subr.bf16.mxu0 %v7446_v48  ;;  %4783 = vmatprep.subr.bf16.mxu1 %v7447_v61  ;;  %vm3038_vm7 = vcmp.gt.s32.totalorder %v7456_v23, 6  ;;  %vm3392_vm8 = vcmp.gt.s32.totalorder %v7456_v23, 7  ;;  %v7457_v48 = vld [vmem:[#allocation73_spill] sm:$0xff] }
 0x75b   :  { %4721 = vmatpush1.bf16.msra.mxu0 %v7448_v32  ;;  %4785 = vmatpush1.bf16.msra.mxu1 %v7449_v1  ;;  %v3494_v32 = vsel %vm3038_vm7, 1.0, %v7150_v0  ;;  %v3501_v1 = vsel %vm3392_vm8, 1.0, %v7150_v0 }
 0x75c   :  { %4723 = vmatprep.subr.bf16.mxu0 %v7450_v45  ;;  %4787 = vmatprep.subr.bf16.mxu1 %v7451_v52  ;;  %v5012_v61 = vpack.i.bf16 %v3501_v1, %v3494_v32 }
 0x75e   :  { %5013 = vperm.xlu1 %5006, %v5012_v61  }
 0x75f   :  { %4725 = vmatpush1.bf16.msra.mxu0 %v7452_v60  ;;  %4789 = vmatpush1.bf16.msra.mxu1 %v7453_v3 }
 0x760   :  { %4791 = vmatprep.subr.bf16.mxu0 %v7454_v36  ;;  %4823 = vmatprep.subr.bf16.mxu1 %v7455_v58 }
 0x7d5   :  { %v2584_v45 = vpop.f32.mrb[38].mxu0  ;;  %v2655_v52 = vpop.f32.mrb[38].mxu1 }
 0x7d6   :  { %v2585_v60 = vadd.f32 %v2584_v45, %v7457_v48  ;;  %v2586_v30 = vpop.f32.mrb[39].mxu0  ;;  %v2657_v3 = vpop.f32.mrb[39].mxu1  ;;  %v2656_v23 = vadd.f32 %v2655_v52, %v7459_v41 }
 0x7d7   :  { %v2587_v36 = vadd.f32 %v2586_v30, %v7458_v47  ;;  %v2658_v56 = vadd.f32 %v2657_v3, %v7460_v12  ;;  %v7464_v47 = vld [vmem:[#allocation97_spill] sm:$0xff] }
 0x7d8   :  { %v3484_v5 = vmul.f32 -1.442695, %v2585_v60  ;;  %v3486_v18 = vmul.f32 -1.442695, %v2656_v23  ;;  %v7461_v23 = vld [vmem:[#allocation94_spill] sm:$0xff] }
 0x7d9   :  { %v3485_v58 = vmul.f32 -1.442695, %v2587_v36 }
 0x7da   :  { %5203 = vpow2.f32 %v3484_v5 }
 0x7db   :  { %5205 = vpow2.f32 %v3485_v58 }
 0x7dc   :  { %5207 = vtanh.f32 %v2658_v56  ;;  %v7462_v56 = vld [vmem:[#allocation95_spill] sm:$0xff] }
 0x7dd   :  { %5209 = vpow2.f32 %v3486_v18 }
 0x7e4   :  { %v5204_v19 = vpop.eup %5203 }
 0x7e5   :  { %v2669_v32 = vadd.f32 1.0, %v5204_v19  ;;  %v5206_v61 = vpop.eup %5205 }
 0x7e6   :  { %v2670_v1 = vadd.f32 1.0, %v5206_v61  ;;  %v5208_v45 = vpop.eup %5207  ;;  %v7463_v61 = vld [vmem:[#allocation96_spill] sm:$0xff] }
 0x7e7   :  { %5211 = vrcp.f32 %v2669_v32  ;;  %v5210_v48 = vpop.eup %5209 }
 0x7e8   :  { %5213 = vrcp.f32 %v2670_v1  ;;  %v2671_v5 = vadd.f32 1.0, %v5210_v48 }
 0x7ea   :  { %5215 = vrcp.f32 %v2671_v5 }
 0x7f1   :  { %v5212_v30 = vpop.eup %5211 }
 0x7f2   :  { %v2680_v60 = vmul.f32 %v5212_v30, %v5208_v45  ;;  %v5214_v36 = vpop.eup %5213  ;;  %v5011_v30 = vunpack.i.h.bf16 %v6567_v2 }
 0x7f3   :  { %v2679_v58 = vmul.f32 %v5214_v36, %v6560_v4 }
 0x7f4   :  { %v5216_v4 = vpop.eup %5215 }
 0x7f5   :  { %v2768_v52 = vpop.f32.mrb[40].mxu0  ;;  %v2839_v41 = vpop.f32.mrb[40].mxu1  ;;  %v6681_v3 = vadd.f32 %v2680_v60, %v2679_v58 }
 0x7f6   :  { %v2844_v19 = vadd.f32 %v2768_v52, %v7461_v23  ;;  %v2846_v12 = vadd.f32 %v2839_v41, %v7462_v56  ;;  %v2770_v18 = vpop.f32.mrb[41].mxu0  ;;  %v2841_v32 = vpop.f32.mrb[41].mxu1 }
 0x7f7   :  { %v2845_v1 = vadd.f32 %v2770_v18, %v7463_v61  ;;  %v2847_v31 = vadd.f32 %v2841_v32, %v7464_v47  ;;  %5217 = vtanh.f32 %v6681_v3 }
 0x7f8   :  { %v3488_v45 = vmul.f32 -1.442695, %v2844_v19  ;;  %v3490_v36 = vmul.f32 -1.442695, %v2846_v12 }
 0x7f9   :  { %v3489_v48 = vmul.f32 -1.442695, %v2845_v1 }
 0x7fa   :  { %5219 = vpow2.f32 %v3488_v45 }
 0x7fb   :  { %5221 = vpow2.f32 %v3489_v48 }
 0x7fc   :  { %5223 = vtanh.f32 %v2847_v31 }
 0x7fd   :  { %5225 = vpow2.f32 %v3490_v36  ;;  %v7510_v36 = vld [vmem:[#allocation61_spill] sm:$0xff] }
 0x801   :  { %v5218_v60 = vpop.eup %5217 }
 0x802   :  { %v2683_v58 = vmul.f32 %v5218_v60, %v5216_v4  ;;  %v7507_v4 = vld [vmem:[#allocation58_spill] sm:$0xff]  ;;  %v7509_v60 = vld [vmem:[#allocation60_spill] sm:$0xff] }
 0x804   :  { %v5220_v41 = vpop.eup %5219  ;;  %v2692_v5 = vmul.f32 %v5011_v30, %v2683_v58  ;;  %2936 = vmatprep.mubr.f32.mxu0 %v2683_v58  ;;  %3007 = vmatprep.mubr.f32.mxu1 %v2683_v58  ;;  %v7508_v30 = vld [vmem:[#allocation59_spill] sm:$0xff]  ;;  %v7511_v58 = vld [vmem:[#allocation62_spill] sm:$0xff] }
 0x805   :  { %v2857_v52 = vadd.f32 1.0, %v5220_v41  ;;  %v5222_v23 = vpop.eup %5221  ;;  %v7512_v41 = vld [vmem:[#allocation63_spill] sm:$0xff] }
 0x806   :  { %v2858_v47 = vadd.f32 1.0, %v5222_v23  ;;  %2694 = vst [vmem:[#allocation11 + $0x28] sm:$0xff] %v2692_v5  ;;  %v5224_v19 = vpop.eup %5223  ;;  %v7514_v5 = vld [vmem:[#allocation65_spill] sm:$0xff]  ;;  %v7515_v23 = vld [vmem:[#allocation66_spill] sm:$0xff] }
 0x807   :  { %5227 = vrcp.f32 %v2857_v52  ;;  %v5226_v56 = vpop.eup %5225  ;;  %v7513_v52 = vld [vmem:[#allocation64_spill] sm:$0xff] }
 0x808   :  { %5229 = vrcp.f32 %v2858_v47  ;;  %v2859_v61 = vadd.f32 1.0, %v5226_v56  ;;  %v7516_v47 = vld [vmem:[#allocation67_spill] sm:$0xff]  ;;  %v7518_v56 = vld [vmem:[#allocation69_spill] sm:$0xff] }
 0x80a   :  { %5231 = vrcp.f32 %v2859_v61 }
 0x811   :  { %v5228_v18 = vpop.eup %5227 }
 0x812   :  { %v2868_v32 = vmul.f32 %v5228_v18, %v5224_v19  ;;  %v5230_v2 = vpop.eup %5229  ;;  %v7517_v19 = vld [vmem:[#allocation68_spill] sm:$0xff] }
 0x813   :  { %v2867_v12 = vmul.f32 %v5230_v2, %v6571_v7  ;;  %v7506_v7 = vld [vmem:[#allocation57_spill] sm:$0xff] }
 0x814   :  { %v5232_v31 = vpop.eup %5231  ;;  %v7519_v2 = vld [vmem:[#allocation73_spill] sm:$0xff] }
 0x815   :  { %v6690_v1 = vadd.f32 %v2868_v32, %v2867_v12 }
 0x817   :  { %5233 = vtanh.f32 %v6690_v1 }
 0x821   :  { %v5234_v45 = vpop.eup %5233 }
 0x822   :  { %v2871_v48 = vmul.f32 %v5234_v45, %v5232_v31  ;;  %v7520_v45 = vld [vmem:[#allocation120_spill] sm:$0xff] }
 0x824   :  { %2937 = vmatmul.mubr.f32.vlgmr.msra.gmra.mrb[42].mxu0 %v2871_v48  ;;  %3008 = vmatmul.mubr.f32.vlgmr.msra.gmra.mrb[42].mxu1 %v2871_v48 }
 0x825   :  { %4793 = vmatpush1.bf16.msra.mxu0 %v7147_v38  ;;  %4825 = vmatpush1.bf16.msra.mxu1 %v7148_v21  ;;  %v7488_v38 = vld [vmem:[#allocation39_spill] sm:$0xff]  ;;  %v7489_v21 = vld [vmem:[#allocation40_spill] sm:$0xff] }
 0x826   :  { %4795 = vmatprep.subr.bf16.mxu0 %v5902_v54  ;;  %4827 = vmatprep.subr.bf16.mxu1 %v7149_v11  ;;  %v7467_v54 = vld [vmem:[#allocation18_spill] sm:$0xff]  ;;  %v7490_v11 = vld [vmem:[#allocation41_spill] sm:$0xff] }
 0x827   :  { %3120 = vmatprep.mubr.f32.mxu0 %v7150_v0  ;;  %3191 = vmatprep.mubr.f32.mxu1 %v7150_v0  ;;  %v7491_v0 = vld [vmem:[#allocation42_spill] sm:$0xff] }
 0x829   :  { %4797 = vmatpush1.bf16.msra.mxu0 %v7151_v20  ;;  %4829 = vmatpush1.bf16.msra.mxu1 %v7209_v13  ;;  %v7492_v20 = vld [vmem:[#allocation43_spill] sm:$0xff] }
 0x82a   :  { %4799 = vmatprep.subr.bf16.mxu0 %v7210_v27  ;;  %4831 = vmatprep.subr.bf16.mxu1 %v7154_v14  ;;  %v7495_v14 = vld [vmem:[#allocation46_spill] sm:$0xff]  ;;  %v7504_v13 = vld [vmem:[#allocation55_spill] sm:$0xff]  ;;  %v7505_v27 = vld [vmem:[#allocation56_spill] sm:$0xff] }
 0x82d   :  { %4801 = vmatpush1.bf16.msra.mxu0 %v7155_v53  ;;  %4833 = vmatpush1.bf16.msra.mxu1 %v7156_v40  ;;  %v7496_v53 = vld [vmem:[#allocation47_spill] sm:$0xff]  ;;  %v7497_v40 = vld [vmem:[#allocation48_spill] sm:$0xff] }
 0x82e   :  { %4803 = vmatprep.subr.bf16.mxu0 %v7157_v37  ;;  %4835 = vmatprep.subr.bf16.mxu1 %v7158_v46  ;;  %v7498_v37 = vld [vmem:[#allocation49_spill] sm:$0xff]  ;;  %v7499_v46 = vld [vmem:[#allocation50_spill] sm:$0xff] }
 0x831   :  { %4805 = vmatpush1.bf16.msra.mxu0 %v7159_v63  ;;  %4837 = vmatpush1.bf16.msra.mxu1 %v7160_v62  ;;  %v7500_v63 = vld [vmem:[#allocation51_spill] sm:$0xff]  ;;  %v7501_v62 = vld [vmem:[#allocation52_spill] sm:$0xff] }
 0x832   :  { %4807 = vmatprep.subr.bf16.mxu0 %v7161_v9  ;;  %4839 = vmatprep.subr.bf16.mxu1 %v7162_v16  ;;  %v7502_v9 = vld [vmem:[#allocation53_spill] sm:$0xff]  ;;  %v7503_v16 = vld [vmem:[#allocation54_spill] sm:$0xff] }
 0x835   :  { %4809 = vmatpush1.bf16.msra.mxu0 %v7163_v8  ;;  %4841 = vmatpush1.bf16.msra.mxu1 %v7164_v10  ;;  %v7493_v8 = vld [vmem:[#allocation44_spill] sm:$0xff]  ;;  %v7494_v10 = vld [vmem:[#allocation45_spill] sm:$0xff] }
 0x836   :  { %4811 = vmatprep.subr.bf16.mxu0 %v5954_v42  ;;  %4843 = vmatprep.subr.bf16.mxu1 %v5956_v15  ;;  %v7476_v42 = vld [vmem:[#allocation27_spill] sm:$0xff]  ;;  %v7477_v15 = vld [vmem:[#allocation28_spill] sm:$0xff] }
 0x839   :  { %4813 = vmatpush1.bf16.msra.mxu0 %v5960_v22  ;;  %4845 = vmatpush1.bf16.msra.mxu1 %v5962_v50  ;;  %v7478_v22 = vld [vmem:[#allocation29_spill] sm:$0xff]  ;;  %v7479_v50 = vld [vmem:[#allocation30_spill] sm:$0xff] }
 0x83a   :  { %4815 = vmatprep.subr.bf16.mxu0 %v5966_v49  ;;  %4847 = vmatprep.subr.bf16.mxu1 %v5968_v33  ;;  %v7480_v49 = vld [vmem:[#allocation31_spill] sm:$0xff]  ;;  %v7481_v33 = vld [vmem:[#allocation32_spill] sm:$0xff] }
 0x83d   :  { %4817 = vmatpush1.bf16.msra.mxu0 %v5972_v6  ;;  %4849 = vmatpush1.bf16.msra.mxu1 %v5974_v59  ;;  %v7482_v6 = vld [vmem:[#allocation33_spill] sm:$0xff]  ;;  %v7483_v59 = vld [vmem:[#allocation34_spill] sm:$0xff] }
 0x83e   :  { %4819 = vmatprep.subr.bf16.mxu0 %v5978_v57  ;;  %4851 = vmatprep.subr.bf16.mxu1 %v5980_v28  ;;  %v7484_v57 = vld [vmem:[#allocation35_spill] sm:$0xff]  ;;  %v7485_v28 = vld [vmem:[#allocation36_spill] sm:$0xff] }
 0x841   :  { %4821 = vmatpush1.bf16.msra.mxu0 %v5984_v26  ;;  %4853 = vmatpush1.bf16.msra.mxu1 %v5986_v17  ;;  %v7486_v26 = vld [vmem:[#allocation37_spill] sm:$0xff]  ;;  %v7487_v17 = vld [vmem:[#allocation38_spill] sm:$0xff] }
 0x842   :  { %4855 = vmatprep.subr.bf16.mxu0 %v5549_v24  ;;  %4919 = vmatprep.subr.bf16.mxu1 %v5551_v25  ;;  %v7465_v24 = vld [vmem:[#allocation16_spill] sm:$0xff]  ;;  %v7466_v25 = vld [vmem:[#allocation17_spill] sm:$0xff] }
 0x844   :  { %3121 = vmatmul.mubr.f32.vlgmr.msra.gmra.mrb[44].mxu0 %v2871_v48  ;;  %3192 = vmatmul.mubr.f32.vlgmr.msra.gmra.mrb[44].mxu1 %v2871_v48 }
 0x845   :  { %4857 = vmatpush1.bf16.msra.mxu0 %v5555_v29  ;;  %4921 = vmatpush1.bf16.msra.mxu1 %v5562_v34  ;;  %v7468_v29 = vld [vmem:[#allocation19_spill] sm:$0xff]  ;;  %v7469_v34 = vld [vmem:[#allocation20_spill] sm:$0xff] }
 0x846   :  { %4859 = vmatprep.subr.bf16.mxu0 %v5564_v35  ;;  %4923 = vmatprep.subr.bf16.mxu1 %v5568_v39  ;;  %v7470_v35 = vld [vmem:[#allocation21_spill] sm:$0xff]  ;;  %v7471_v39 = vld [vmem:[#allocation22_spill] sm:$0xff] }
 0x849   :  { %4861 = vmatpush1.bf16.msra.mxu0 %v5572_v43  ;;  %4925 = vmatpush1.bf16.msra.mxu1 %v5574_v44  ;;  %v7472_v43 = vld [vmem:[#allocation23_spill] sm:$0xff]  ;;  %v7473_v44 = vld [vmem:[#allocation24_spill] sm:$0xff] }
 0x84a   :  { %4863 = vmatprep.subr.bf16.mxu0 %v5577_v51  ;;  %4927 = vmatprep.subr.bf16.mxu1 %v5580_v55  ;;  %v7474_v51 = vld [vmem:[#allocation25_spill] sm:$0xff]  ;;  %v7475_v55 = vld [vmem:[#allocation26_spill] sm:$0xff] }
 0x84d   :  { %4865 = vmatpush1.bf16.msra.mxu0 %v7465_v24  ;;  %4929 = vmatpush1.bf16.msra.mxu1 %v7466_v25 }
 0x84e   :  { %4867 = vmatprep.subr.bf16.mxu0 %v7467_v54  ;;  %4931 = vmatprep.subr.bf16.mxu1 %v7468_v29  ;;  %v7521_v54 = vld [vmem:[#allocation121_spill] sm:$0xff] }
 0x851   :  { %4869 = vmatpush1.bf16.msra.mxu0 %v7469_v34  ;;  %4933 = vmatpush1.bf16.msra.mxu1 %v7470_v35  ;;  %v7522_v34 = vld [vmem:[#allocation122_spill] sm:$0xff] }
 0x852   :  { %4871 = vmatprep.subr.bf16.mxu0 %v7471_v39  ;;  %4935 = vmatprep.subr.bf16.mxu1 %v7472_v43 }
 0x855   :  { %4873 = vmatpush1.bf16.msra.mxu0 %v7473_v44  ;;  %4937 = vmatpush1.bf16.msra.mxu1 %v7474_v51 }
 0x856   :  { %4875 = vmatprep.subr.bf16.mxu0 %v7475_v55  ;;  %4939 = vmatprep.subr.bf16.mxu1 %v7476_v42 }
 0x859   :  { %4877 = vmatpush1.bf16.msra.mxu0 %v7477_v15  ;;  %4941 = vmatpush1.bf16.msra.mxu1 %v7478_v22 }
 0x85a   :  { %4879 = vmatprep.subr.bf16.mxu0 %v7479_v50  ;;  %4943 = vmatprep.subr.bf16.mxu1 %v7480_v49 }
 0x85d   :  { %4881 = vmatpush1.bf16.msra.mxu0 %v7481_v33  ;;  %4945 = vmatpush1.bf16.msra.mxu1 %v7482_v6 }
 0x85e   :  { %4883 = vmatprep.subr.bf16.mxu0 %v7483_v59  ;;  %4947 = vmatprep.subr.bf16.mxu1 %v7484_v57 }
 0x861   :  { %4885 = vmatpush1.bf16.msra.mxu0 %v7485_v28  ;;  %4949 = vmatpush1.bf16.msra.mxu1 %v7486_v26  ;;  %v7523_v26 = vld [vmem:[#allocation98_spill] sm:$0xff] }
 0x862   :  { %4887 = vmatprep.subr.bf16.mxu0 %v7487_v17  ;;  %4951 = vmatprep.subr.bf16.mxu1 %v7488_v38  ;;  %v7524_v38 = vld [vmem:[#allocation99_spill] sm:$0xff] }
 0x865   :  { %4889 = vmatpush1.bf16.msra.mxu0 %v7489_v21  ;;  %4953 = vmatpush1.bf16.msra.mxu1 %v7490_v11 }
 0x866   :  { %4891 = vmatprep.subr.bf16.mxu0 %v7491_v0  ;;  %4955 = vmatprep.subr.bf16.mxu1 %v7492_v20  ;;  %v7525_v20 = vld [vmem:[#allocation100_spill] sm:$0xff] }
 0x869   :  { %4893 = vmatpush1.bf16.msra.mxu0 %v7493_v8  ;;  %4957 = vmatpush1.bf16.msra.mxu1 %v7494_v10  ;;  %v7526_v10 = vld [vmem:[#allocation101_spill] sm:$0xff] }
 0x86a   :  { %4895 = vmatprep.subr.bf16.mxu0 %v7495_v14  ;;  %4959 = vmatprep.subr.bf16.mxu1 %v7496_v53 }
 0x86d   :  { %4897 = vmatpush1.bf16.msra.mxu0 %v7497_v40  ;;  %4961 = vmatpush1.bf16.msra.mxu1 %v7498_v37 }
 0x86e   :  { %4899 = vmatprep.subr.bf16.mxu0 %v7499_v46  ;;  %4963 = vmatprep.subr.bf16.mxu1 %v7500_v63 }
 0x871   :  { %4901 = vmatpush1.bf16.msra.mxu0 %v7501_v62  ;;  %4965 = vmatpush1.bf16.msra.mxu1 %v7502_v9 }
 0x872   :  { %4903 = vmatprep.subr.bf16.mxu0 %v7503_v16  ;;  %4967 = vmatprep.subr.bf16.mxu1 %v7504_v13 }
 0x875   :  { %4905 = vmatpush1.bf16.msra.mxu0 %v7505_v27  ;;  %4969 = vmatpush1.bf16.msra.mxu1 %v7506_v7 }
 0x876   :  { %4907 = vmatprep.subr.bf16.mxu0 %v7507_v4  ;;  %4971 = vmatprep.subr.bf16.mxu1 %v7508_v30 }
 0x879   :  { %4909 = vmatpush1.bf16.msra.mxu0 %v7509_v60  ;;  %4973 = vmatpush1.bf16.msra.mxu1 %v7510_v36 }
 0x87a   :  { %4911 = vmatprep.subr.bf16.mxu0 %v7511_v58  ;;  %4975 = vmatprep.subr.bf16.mxu1 %v7512_v41 }
 0x87d   :  { %4913 = vmatpush1.bf16.msra.mxu0 %v7513_v52  ;;  %4977 = vmatpush1.bf16.msra.mxu1 %v7514_v5 }
 0x87e   :  { %4915 = vmatprep.subr.bf16.mxu0 %v7515_v23  ;;  %4979 = vmatprep.subr.bf16.mxu1 %v7516_v47 }
 0x881   :  { %4917 = vmatpush1.bf16.msra.mxu0 %v7517_v19  ;;  %4981 = vmatpush1.bf16.msra.mxu1 %v7518_v56 }
 0x8f7   :  { %v2938_v18 = vpop.f32.mrb[42].mxu0  ;;  %v3009_v32 = vpop.f32.mrb[42].mxu1 }
 0x8f8   :  { %v2939_v61 = vadd.f32 %v2938_v18, %v7519_v2  ;;  %v2940_v12 = vpop.f32.mrb[43].mxu0  ;;  %v3011_v31 = vpop.f32.mrb[43].mxu1  ;;  %v3010_v29 = vadd.f32 %v3009_v32, %v7521_v54 }
 0x8f9   :  { %v2941_v48 = vadd.f32 %v2940_v12, %v7520_v45  ;;  %v3012_v35 = vadd.f32 %v3011_v31, %v7522_v34 }
 0x8fa   :  { %v3491_v24 = vmul.f32 -1.442695, %v2939_v61  ;;  %v3493_v39 = vmul.f32 -1.442695, %v3010_v29 }
 0x8fb   :  { %v3492_v25 = vmul.f32 -1.442695, %v2941_v48 }
 0x8fc   :  { %5235 = vpow2.f32 %v3491_v24 }
 0x8fd   :  { %5237 = vpow2.f32 %v3492_v25 }
 0x8fe   :  { %5239 = vtanh.f32 %v3012_v35 }
 0x8ff   :  { %5241 = vpow2.f32 %v3493_v39 }
 0x906   :  { %v5236_v43 = vpop.eup %5235 }
 0x907   :  { %v3023_v44 = vadd.f32 1.0, %v5236_v43  ;;  %v5238_v51 = vpop.eup %5237 }
 0x908   :  { %v3024_v55 = vadd.f32 1.0, %v5238_v51  ;;  %v5240_v42 = vpop.eup %5239 }
 0x909   :  { %5243 = vrcp.f32 %v3023_v44  ;;  %v5242_v15 = vpop.eup %5241 }
 0x90a   :  { %5245 = vrcp.f32 %v3024_v55  ;;  %v3025_v33 = vadd.f32 1.0, %v5242_v15 }
 0x90c   :  { %5247 = vrcp.f32 %v3025_v33 }
 0x913   :  { %v5244_v22 = vpop.eup %5243 }
 0x914   :  { %v3034_v50 = vmul.f32 %v5244_v22, %v5240_v42  ;;  %v5246_v49 = vpop.eup %5245 }
 0x915   :  { %v3033_v6 = vmul.f32 %v5246_v49, %v6681_v3  ;;  %v6801_v3 = vpop.permute.xlu1 %5013 }
 0x916   :  { %v5248_v37 = vpop.eup %5247  ;;  %v5015_v46 = vunpack.i.l.bf16 %v6801_v3  ;;  %v5016_v33 = vunpack.i.h.bf16 %v6801_v3 }
 0x917   :  { %v3122_v59 = vpop.f32.mrb[44].mxu0  ;;  %v3193_v57 = vpop.f32.mrb[44].mxu1  ;;  %v6794_v28 = vadd.f32 %v3034_v50, %v3033_v6 }
 0x918   :  { %v3198_v17 = vadd.f32 %v3122_v59, %v7523_v26  ;;  %v3200_v21 = vadd.f32 %v3193_v57, %v7524_v38  ;;  %v3124_v11 = vpop.f32.mrb[45].mxu0  ;;  %v3195_v0 = vpop.f32.mrb[45].mxu1 }
 0x919   :  { %v3199_v8 = vadd.f32 %v3124_v11, %v7525_v20  ;;  %v3201_v14 = vadd.f32 %v3195_v0, %v7526_v10  ;;  %5249 = vtanh.f32 %v6794_v28 }
 0x91a   :  { %v3495_v53 = vmul.f32 -1.442695, %v3198_v17  ;;  %v3497_v62 = vmul.f32 -1.442695, %v3200_v21 }
 0x91b   :  { %v3496_v40 = vmul.f32 -1.442695, %v3199_v8 }
 0x91c   :  { %5251 = vpow2.f32 %v3495_v53 }
 0x91d   :  { %5253 = vpow2.f32 %v3496_v40 }
 0x91e   :  { %5255 = vtanh.f32 %v3201_v14 }
 0x91f   :  { %5257 = vpow2.f32 %v3497_v62 }
 0x923   :  { %v5250_v63 = vpop.eup %5249 }
 0x924   :  { %v3037_v9 = vmul.f32 %v5250_v63, %v5248_v37 }
 0x926   :  { %v5252_v16 = vpop.eup %5251  ;;  %v3046_v27 = vmul.f32 %v5015_v46, %v3037_v9  ;;  %3290 = vmatprep.mubr.f32.mxu0 %v3037_v9  ;;  %3361 = vmatprep.mubr.f32.mxu1 %v3037_v9 }
 0x927   :  { %v3211_v13 = vadd.f32 1.0, %v5252_v16  ;;  %v5254_v7 = vpop.eup %5253 }
 0x928   :  { %v3212_v4 = vadd.f32 1.0, %v5254_v7  ;;  %3048 = vst [vmem:[#allocation11 + $0x30] sm:$0xff] %v3046_v27  ;;  %v5256_v30 = vpop.eup %5255 }
 0x929   :  { %5259 = vrcp.f32 %v3211_v13  ;;  %v5258_v60 = vpop.eup %5257 }
 0x92a   :  { %5261 = vrcp.f32 %v3212_v4  ;;  %v3213_v52 = vadd.f32 1.0, %v5258_v60 }
 0x92c   :  { %5263 = vrcp.f32 %v3213_v52 }
 0x933   :  { %v5260_v36 = vpop.eup %5259 }
 0x934   :  { %v3222_v58 = vmul.f32 %v5260_v36, %v5256_v30  ;;  %v5262_v41 = vpop.eup %5261 }
 0x935   :  { %v3221_v5 = vmul.f32 %v5262_v41, %v6690_v1 }
 0x936   :  { %v5264_v47 = vpop.eup %5263 }
 0x937   :  { %v3223_v23 = vadd.f32 %v3222_v58, %v3221_v5 }
 0x939   :  { %5265 = vtanh.f32 %v3223_v23 }
 0x943   :  { %v5266_v19 = vpop.eup %5265 }
 0x944   :  { %v3225_v56 = vmul.f32 %v5266_v19, %v5264_v47 }
 0x946   :  { %3291 = vmatmul.mubr.f32.vlgmr.msra.gmra.mrb[46].mxu0 %v3225_v56  ;;  %3362 = vmatmul.mubr.f32.vlgmr.msra.gmra.mrb[46].mxu1 %v3225_v56 }
 0xa19   :  { %v3292_v18 = vpop.f32.mrb[46].mxu0  ;;  %v3363_v32 = vpop.f32.mrb[46].mxu1 }
 0xa1a   :  { %v3293_v61 = vadd.f32 %v3292_v18, %v7519_v2  ;;  %v3294_v12 = vpop.f32.mrb[47].mxu0  ;;  %v3365_v31 = vpop.f32.mrb[47].mxu1  ;;  %v3364_v1 = vadd.f32 %v3363_v32, %v7521_v54 }
 0xa1b   :  { %v3295_v48 = vadd.f32 %v3294_v12, %v7520_v45  ;;  %v3366_v29 = vadd.f32 %v3365_v31, %v7522_v34 }
 0xa1c   :  { %v3498_v24 = vmul.f32 -1.442695, %v3293_v61  ;;  %v3500_v35 = vmul.f32 -1.442695, %v3364_v1 }
 0xa1d   :  { %v3499_v25 = vmul.f32 -1.442695, %v3295_v48 }
 0xa1e   :  { %5267 = vpow2.f32 %v3498_v24 }
 0xa1f   :  { %5269 = vpow2.f32 %v3499_v25 }
 0xa20   :  { %5271 = vtanh.f32 %v3366_v29 }
 0xa21   :  { %5273 = vpow2.f32 %v3500_v35 }
 0xa28   :  { %v5268_v39 = vpop.eup %5267 }
 0xa29   :  { %v3377_v43 = vadd.f32 1.0, %v5268_v39  ;;  %v5270_v44 = vpop.eup %5269 }
 0xa2a   :  { %v3378_v2 = vadd.f32 1.0, %v5270_v44  ;;  %v5272_v51 = vpop.eup %5271 }
 0xa2b   :  { %5275 = vrcp.f32 %v3377_v43  ;;  %v5274_v55 = vpop.eup %5273 }
 0xa2c   :  { %5277 = vrcp.f32 %v3378_v2  ;;  %v3379_v22 = vadd.f32 1.0, %v5274_v55 }
 0xa2e   :  { %5279 = vrcp.f32 %v3379_v22 }
 0xa35   :  { %v5276_v45 = vpop.eup %5275 }
 0xa36   :  { %v3388_v42 = vmul.f32 %v5276_v45, %v5272_v51  ;;  %v5278_v15 = vpop.eup %5277 }
 0xa37   :  { %v3387_v50 = vmul.f32 %v5278_v15, %v6794_v28 }
 0xa38   :  { %v5280_v34 = vpop.eup %5279 }
 0xa39   :  { %v3389_v54 = vadd.f32 %v3388_v42, %v3387_v50 }
 0xa3b   :  { %5281 = vtanh.f32 %v3389_v54 }
 0xa45   :  { %v5282_v49 = vpop.eup %5281 }
 0xa46   :  { %v3391_v6 = vmul.f32 %v5282_v49, %v5280_v34 }
 0xa48   :  { %v3400_v59 = vmul.f32 %v5016_v33, %v3391_v6 }
 0xa4a   :  { %3401 = vst [vmem:[#allocation11 + $0x38] sm:$0xff] %v3400_v59 }
 0xa4b   :  { %5383 = shalt.err (!%p5380_p8)
}
 0xa4c   :  { %s5384_s21 = scalar_lea.hbm %s6832_s9, 1024 }
 0xa4d   :  { %p5385_p9 = scmp.ne.s32.totalorder %s6832_s9, %s5384_s21  ;;  %p5388_p10 = scmp.lt.u32.totalorder %s5384_s21, %s6832_s9 }
 0xa4f   :  { %p5390_p11 = pnand %p5388_p10, %p5385_p9 }
 0xa51   :  { %5393 = shalt.err (!%p5390_p11)
}
 0xa52   :  { %s5413_s25 = smov 128   ;;  %s5414_s27 = smov 8  }
 0xa53   :  { %3413 = dma.vmem_to_hbm [thread:$0]  %s3408_s17, 1024, %s6832_s9, [#allocation5], %s5413_s25, %s5413_s25, %s5414_s27  }
 0xa54   :  { %5400 = dma.done.wait [#allocation5], 1024  }
 0xa55   :  { %5401 = vsyncadd [#allocation5], 4294966272 }
 0xa56   :  { %3417 = vsyncpa [#allocation4], 1 }
 0xa57   :  { %3418 = vsyncpa [#allocation7], 1 }
 0xa58   :  { %3419 = vsyncpa [#allocation10], 1 }
 0xa59   :  { %3420 = vsyncpa [#allocation5], 1 }

</bundles_post_ra>
